<compile_context>
chip_gen: v7x
topology: tpu7x:2x2x1
jax: 0.10.0
libtpu: 0.0.40
codegen_flags: <defaults>
</compile_context>

<pallas_src>
import functools

import jax
import jax.numpy as jnp
from jax.experimental import pallas as pl
from jax.experimental.pallas import tpu as pltpu

LEAKY_RATE = 0.1


# ----------------------------------------------------------------------------
# Pallas kernel: fused WeightNet MLP + per-point contraction + Linear + LeakyReLU
# ----------------------------------------------------------------------------
def _pointconv_kernel(g_ref, p_ref, w1_ref, w2_ref, b2_ref, w3_ref, b3_ref,
                      lwt_ref, lb_ref, o_ref, cw_ref, *,
                      nsample, weightnet, cin):
    # g_ref  : (1, K*4,   TN)  rows = k*4 + c   (xyz-norm channels + ones row)
    # p_ref  : (1, K*Cin, TN)  rows = k*Cin + c (xyz-norm ++ point features)
    # w1_ref : (K*H, K*4)      kron(I_K, [w1; b1]^T)   (bias folded)
    # w2_ref : (K*H, K*H)      kron(I_K, w2^T)
    # w3_ref : (K*W, K*H)      kron(I_K, w3^T)
    # b2_ref : (K*H, 1), b3_ref: (K*W, 1), lb_ref: (Cout, 1)   f32 columns
    # lwt_ref: (Cout, Cin*W)   Linear weight, transposed
    # o_ref  : (1, Cout, TN)   lane-dense channel-first output tile
    # cw_ref : (Cin*W, TN)     VMEM scratch holding cw^T
    K, W, Cin = nsample, weightnet, cin
    TN = o_ref.shape[2]
    cdt = w2_ref.dtype

    # ---- WeightNet on all K neighbors at once (points stay on lanes) --------
    g = g_ref[0]                                                       # (K*4, TN)
    h = jnp.dot(w1_ref[...], g, preferred_element_type=jnp.float32)    # b1 folded
    h = jnp.maximum(h, 0.0)
    h = jnp.dot(w2_ref[...], h.astype(cdt),
                preferred_element_type=jnp.float32) + b2_ref[...]
    h = jnp.maximum(h, 0.0)
    wt = jnp.dot(w3_ref[...], h.astype(cdt),
                 preferred_element_type=jnp.float32) + b3_ref[...]
    wt = jnp.maximum(wt, 0.0)                                          # (K*W, TN)

    # ---- per-point contraction over the K neighbors (lane-parallel VPU):
    #      cw^T[c*W + w, n] = sum_k p[(k,c), n] * wt[(k,w), n]
    p_f = p_ref[0].astype(jnp.float32)                                 # (K*Cin, TN)
    wt_k = [wt[k * W:(k + 1) * W, :] for k in range(K)]                # K x (W, TN)
    for c in range(Cin):
        blk = jnp.zeros((W, TN), jnp.float32)
        for k in range(K):
            prow = p_f[k * Cin + c:k * Cin + c + 1, :]                 # (1, TN)
            blk = blk + prow * wt_k[k]                                 # lane-bcast MAC
        cw_ref[pl.ds(c * W, W), :] = blk.astype(cw_ref.dtype)

    # ---- final Linear: ONE (Cout, Cin*W) @ (Cin*W, TN) matmul (256-deep
    #      contraction) -> lane-dense (Cout, TN) tile, then LeakyReLU(0.1).
    out_t = jnp.dot(lwt_ref[...], cw_ref[...],
                    preferred_element_type=jnp.float32) + lb_ref[...]
    o_ref[0] = jnp.where(out_t > 0, out_t, LEAKY_RATE * out_t).astype(o_ref.dtype)


# ----------------------------------------------------------------------------
# Plain-JAX glue: KNN (topk) + neighbor gather
# ----------------------------------------------------------------------------
def _group(nsample, xyz_t, pts_t):
    # TODO(synk): KNN top_k + gather stay in plain JAX (data-dependent gather
    # has no clean Pallas TPU equivalent here).  A further HBM-traffic win is
    # to scalar-prefetch the idx and gather inside the kernel, avoiding the
    # K-fold replication of features.
    sq = jnp.sum(xyz_t ** 2, axis=-1)                                   # [B, N]
    dist = (sq[:, :, None] + sq[:, None, :]
            - 2.0 * jnp.einsum('bnc,bmc->bnm', xyz_t, xyz_t))           # [B, N, N]
    _, idx = jax.lax.top_k(-dist, nsample)                              # [B, N, K]
    gather = jax.vmap(lambda p, i: p[i])
    grouped_xyz = gather(xyz_t, idx)                                    # [B, N, K, 3]
    grouped_xyz_norm = grouped_xyz - xyz_t[:, :, None, :]
    grouped_points = gather(pts_t, idx)                                 # [B, N, K, D]
    new_points = jnp.concatenate([grouped_xyz_norm, grouped_points], -1)
    return new_points, grouped_xyz_norm


# ----------------------------------------------------------------------------
# Wrapper
# ----------------------------------------------------------------------------
def pointconv_forward(xyz, points, params, nsample, *, tile_n=128,
                      compute_dtype=jnp.bfloat16):
    """xyz: [B, 3, N], points: [B, D, N]  ->  [B, out_channel, N]"""
    w1, b1, w2, b2, w3, b3, lw, lb = params
    B, _, N = xyz.shape
    D = points.shape[1]
    Cin = 3 + D
    H = w1.shape[1]                       # WeightNet hidden width (8)
    W = w3.shape[1]                       # weightnet channels
    Cout = lw.shape[1]
    K = nsample
    TN = min(tile_n, N)
    assert N % TN == 0, "N must be a multiple of the point tile"  # TODO(synk): mask ragged tail

    xyz_t = jnp.transpose(xyz, (0, 2, 1)).astype(jnp.float32)           # [B, N, 3]
    pts_t = jnp.transpose(points, (0, 2, 1)).astype(jnp.float32)        # [B, N, D]
    new_points, gxyz = _group(K, xyz_t, pts_t)                          # [B,N,K,Cin], [B,N,K,3]

    # k-major / channel-on-sublane / point-on-lane layouts (free HBM-side).
    ones = jnp.ones(gxyz.shape[:3] + (1,), jnp.float32)
    g_in = jnp.concatenate([gxyz, ones], axis=-1)                       # ones row folds b1
    g_in = jnp.transpose(g_in, (0, 2, 3, 1)).reshape(B, K * 4, N)
    p_in = jnp.transpose(new_points, (0, 2, 3, 1)).reshape(B, K * Cin, N)
    g_in = g_in.astype(compute_dtype)
    p_in = p_in.astype(compute_dtype)

    # Block-diagonal WeightNet weights: apply all K neighbors in one matmul.
    eye_k = jnp.eye(K, dtype=jnp.float32)
    w1_aug = jnp.concatenate([w1, b1], axis=0)                          # (4, H)
    w1_blk = jnp.kron(eye_k, w1_aug.T).astype(compute_dtype)            # (K*H, K*4)
    w2_blk = jnp.kron(eye_k, w2.T).astype(compute_dtype)                # (K*H, K*H)
    w3_blk = jnp.kron(eye_k, w3.T).astype(compute_dtype)                # (K*W, K*H)
    b2_col = jnp.tile(b2, (K, 1)).reshape(K * H, 1).astype(jnp.float32)
    b3_col = jnp.tile(b3, (K, 1)).reshape(K * W, 1).astype(jnp.float32)
    lwt = jnp.transpose(lw).astype(compute_dtype)                       # (Cout, Cin*W)
    lb_col = lb.reshape(Cout, 1).astype(jnp.float32)

    kernel = functools.partial(_pointconv_kernel,
                               nsample=K, weightnet=W, cin=Cin)

    out = pl.pallas_call(
        kernel,
        out_shape=jax.ShapeDtypeStruct((B, Cout, N), jnp.float32),
        grid_spec=pltpu.PrefetchScalarGridSpec(
            num_scalar_prefetch=0,
            grid=(B, N // TN),
            in_specs=[
                pl.BlockSpec((1, K * 4, TN), lambda b, n: (b, 0, n)),
                pl.BlockSpec((1, K * Cin, TN), lambda b, n: (b, 0, n)),
                pl.BlockSpec((K * H, K * 4), lambda b, n: (0, 0)),
                pl.BlockSpec((K * H, K * H), lambda b, n: (0, 0)),
                pl.BlockSpec((K * H, 1), lambda b, n: (0, 0)),
                pl.BlockSpec((K * W, K * H), lambda b, n: (0, 0)),
                pl.BlockSpec((K * W, 1), lambda b, n: (0, 0)),
                pl.BlockSpec((Cout, Cin * W), lambda b, n: (0, 0)),
                pl.BlockSpec((Cout, 1), lambda b, n: (0, 0)),
            ],
            out_specs=pl.BlockSpec((1, Cout, TN), lambda b, n: (b, 0, n)),
            scratch_shapes=[pltpu.VMEM((Cin * W, TN), compute_dtype)],
        ),
        compiler_params=pltpu.CompilerParams(
            dimension_semantics=("parallel", "parallel"),
            vmem_limit_bytes=32 * 1024 * 1024),
    )(g_in, p_in, w1_blk, w2_blk, b2_col, w3_blk, b3_col, lwt, lb_col)

    return out                                                          # [B, Cout, N]


# ----------------------------------------------------------------------------
# Pure-JAX f32 reference (same math, no Pallas) for correctness checks
# ----------------------------------------------------------------------------
def pointconv_reference(xyz, points, params, nsample):
    w1, b1, w2, b2, w3, b3, lw, lb = params
    B, _, N = xyz.shape
    xyz_t = jnp.transpose(xyz, (0, 2, 1)).astype(jnp.float32)
    pts_t = jnp.transpose(points, (0, 2, 1)).astype(jnp.float32)
    new_points, g = _group(nsample, xyz_t, pts_t)
    h = jnp.maximum(jnp.einsum('bnkc,cd->bnkd', g, w1) + b1[0], 0.0)
    h = jnp.maximum(jnp.einsum('bnkc,cd->bnkd', h, w2) + b2[0], 0.0)
    wts = jnp.maximum(jnp.einsum('bnkc,cd->bnkd', h, w3) + b3[0], 0.0)
    cw = jnp.einsum('bnkc,bnkw->bncw', new_points, wts)
    flat = cw.reshape(B, N, -1)
    y = flat @ lw + lb[0]
    y = jnp.where(y > 0, y, LEAKY_RATE * y)
    return jnp.transpose(y, (0, 2, 1))                                  # [B, Cout, N]


def init_params(key, in_channel, weightnet, out_channel):
    ks = jax.random.split(key, 8)
    s = 0.3
    w1 = s * jax.random.normal(ks[0], (3, 8), jnp.float32)
    b1 = s * jax.random.normal(ks[1], (1, 8), jnp.float32)
    w2 = s * jax.random.normal(ks[2], (8, 8), jnp.float32)
    b2 = s * jax.random.normal(ks[3], (1, 8), jnp.float32)
    w3 = s * jax.random.normal(ks[4], (8, weightnet), jnp.float32)
    b3 = s * jax.random.normal(ks[5], (1, weightnet), jnp.float32)
    lw = s * jax.random.normal(ks[6], (weightnet * in_channel, out_channel), jnp.float32)
    lb = s * jax.random.normal(ks[7], (1, out_channel), jnp.float32)
    return (w1, b1, w2, b2, w3, b3, lw, lb)


if __name__ == "__main__":
    B, N, D, K = 2, 256, 13, 8          # batch, points, feature channels, nsample
    weightnet = 16
    in_channel = D + 3                  # PointConv(nsample, in_channel=D+3, out_channel)
    out_channel = 32

    key = jax.random.PRNGKey(0)
    k_xyz, k_pts, k_par = jax.random.split(key, 3)
    xyz = jax.random.normal(k_xyz, (B, 3, N), jnp.float32)       # [B, 3, N]
    points = jax.random.normal(k_pts, (B, D, N), jnp.float32)    # [B, D, N]
    params = init_params(k_par, in_channel, weightnet, out_channel)

    ref = jax.block_until_ready(pointconv_reference(xyz, points, params, K))
    scale = max(float(jnp.max(jnp.abs(ref))), 1.0)

    # 1) exactness check: f32 compute path through the same kernel
    out_f32 = jax.block_until_ready(
        pointconv_forward(xyz, points, params, K, compute_dtype=jnp.float32))
    assert out_f32.shape == (B, out_channel, N), out_f32.shape
    err_f32 = float(jnp.max(jnp.abs(out_f32 - ref)))
    assert err_f32 <= 1e-3 * scale, (err_f32, scale)

    # 2) performance configuration: bf16 inputs/weights, f32 accumulation
    out_bf16 = jax.block_until_ready(
        pointconv_forward(xyz, points, params, K, compute_dtype=jnp.bfloat16))
    assert out_bf16.shape == (B, out_channel, N), out_bf16.shape
    err_bf16 = float(jnp.max(jnp.abs(out_bf16 - ref)))
    assert err_bf16 <= 3e-2 * scale, (err_bf16, scale)

    print("KERNEL_OK")
</pallas_src>

<mosaic_0001>
module attributes {stable_mosaic.version = 11 : i64} {
  func.func @_pointconv_kernel(%arg0: i32, %arg1: i32, %arg2: memref<1x32x128xf32, #tpu.memory_space<vmem>>, %arg3: memref<1x128x128xf32, #tpu.memory_space<vmem>>, %arg4: memref<64x32xf32, #tpu.memory_space<vmem>>, %arg5: memref<64x64xf32, #tpu.memory_space<vmem>>, %arg6: memref<64x1xf32, #tpu.memory_space<vmem>>, %arg7: memref<128x64xf32, #tpu.memory_space<vmem>>, %arg8: memref<128x1xf32, #tpu.memory_space<vmem>>, %arg9: memref<32x256xf32, #tpu.memory_space<vmem>>, %arg10: memref<32x1xf32, #tpu.memory_space<vmem>>, %arg11: memref<1x32x128xf32, #tpu.memory_space<vmem>>, %arg12: memref<256x128xf32, #tpu.memory_space<vmem>>) attributes {dimension_semantics = [#tpu.dimension_semantics<parallel>, #tpu.dimension_semantics<parallel>], iteration_bounds = array<i64: 2, 2>, scalar_prefetch = 0 : i64, scratch_operands = 1 : i64, tpu.core_type = #tpu.core_type<tc>, window_params = [{transform_indices = @transform_0, window_bounds = array<i64: 1, 32, 128>}, {transform_indices = @transform_1, window_bounds = array<i64: 1, 128, 128>}, {pipeline_mode = #tpu.pipeline_mode<synchronous>, transform_indices = @transform_2, window_bounds = array<i64: 64, 32>}, {pipeline_mode = #tpu.pipeline_mode<synchronous>, transform_indices = @transform_3, window_bounds = array<i64: 64, 64>}, {pipeline_mode = #tpu.pipeline_mode<synchronous>, transform_indices = @transform_4, window_bounds = array<i64: 64, 1>}, {pipeline_mode = #tpu.pipeline_mode<synchronous>, transform_indices = @transform_5, window_bounds = array<i64: 128, 64>}, {pipeline_mode = #tpu.pipeline_mode<synchronous>, transform_indices = @transform_6, window_bounds = array<i64: 128, 1>}, {pipeline_mode = #tpu.pipeline_mode<synchronous>, transform_indices = @transform_7, window_bounds = array<i64: 32, 256>}, {pipeline_mode = #tpu.pipeline_mode<synchronous>, transform_indices = @transform_8, window_bounds = array<i64: 32, 1>}, {transform_indices = @transform_9, window_bounds = array<i64: 1, 32, 128>}]} {
    %c0 = arith.constant 0 : index
    %c0_0 = arith.constant 0 : index
    %c0_1 = arith.constant 0 : index
    %0 = vector.load %arg2[%c0, %c0_0, %c0_1] : memref<1x32x128xf32, #tpu.memory_space<vmem>>, vector<1x32x128xf32>
    %1 = vector.shape_cast %0 : vector<1x32x128xf32> to vector<32x128xf32>
    %c0_2 = arith.constant 0 : index
    %c0_3 = arith.constant 0 : index
    %2 = vector.load %arg4[%c0_2, %c0_3] : memref<64x32xf32, #tpu.memory_space<vmem>>, vector<64x32xf32>
    %cst = arith.constant dense<0.000000e+00> : vector<64x128xf32>
    %3 = tpu.matmul %2, %1, %cst {dimension_numbers = #tpu.dot_dimension_numbers<[1], [0], [0], [1], [0, 0, 1, 1], [], []>} : vector<64x32xf32>, vector<32x128xf32>, vector<64x128xf32> -> vector<64x128xf32>
    %cst_4 = arith.constant 0.000000e+00 : f32
    %4 = vector.broadcast %cst_4 : f32 to vector<64x128xf32>
    %5 = arith.maximumf %3, %4 : vector<64x128xf32>
    %c0_5 = arith.constant 0 : index
    %c0_6 = arith.constant 0 : index
    %6 = vector.load %arg5[%c0_5, %c0_6] : memref<64x64xf32, #tpu.memory_space<vmem>>, vector<64x64xf32>
    %cst_7 = arith.constant dense<0.000000e+00> : vector<64x128xf32>
    %7 = tpu.matmul %6, %5, %cst_7 {dimension_numbers = #tpu.dot_dimension_numbers<[1], [0], [0], [1], [0, 0, 1, 1], [], []>} : vector<64x64xf32>, vector<64x128xf32>, vector<64x128xf32> -> vector<64x128xf32>
    %c0_8 = arith.constant 0 : index
    %c0_9 = arith.constant 0 : index
    %8 = vector.load %arg6[%c0_8, %c0_9] : memref<64x1xf32, #tpu.memory_space<vmem>>, vector<64x1xf32>
    %9 = vector.broadcast %8 : vector<64x1xf32> to vector<64x128xf32>
    %10 = arith.addf %7, %9 : vector<64x128xf32>
    %cst_10 = arith.constant 0.000000e+00 : f32
    %11 = vector.broadcast %cst_10 : f32 to vector<64x128xf32>
    %12 = arith.maximumf %10, %11 : vector<64x128xf32>
    %c0_11 = arith.constant 0 : index
    %c0_12 = arith.constant 0 : index
    %13 = vector.load %arg7[%c0_11, %c0_12] : memref<128x64xf32, #tpu.memory_space<vmem>>, vector<128x64xf32>
    %cst_13 = arith.constant dense<0.000000e+00> : vector<128x128xf32>
    %14 = tpu.matmul %13, %12, %cst_13 {dimension_numbers = #tpu.dot_dimension_numbers<[1], [0], [0], [1], [0, 0, 1, 1], [], []>} : vector<128x64xf32>, vector<64x128xf32>, vector<128x128xf32> -> vector<128x128xf32>
    %c0_14 = arith.constant 0 : index
    %c0_15 = arith.constant 0 : index
    %15 = vector.load %arg8[%c0_14, %c0_15] : memref<128x1xf32, #tpu.memory_space<vmem>>, vector<128x1xf32>
    %16 = vector.broadcast %15 : vector<128x1xf32> to vector<128x128xf32>
    %17 = arith.addf %14, %16 : vector<128x128xf32>
    %cst_16 = arith.constant 0.000000e+00 : f32
    %18 = vector.broadcast %cst_16 : f32 to vector<128x128xf32>
    %19 = arith.maximumf %17, %18 : vector<128x128xf32>
    %c0_17 = arith.constant 0 : index
    %c0_18 = arith.constant 0 : index
    %c0_19 = arith.constant 0 : index
    %20 = vector.load %arg3[%c0_17, %c0_18, %c0_19] : memref<1x128x128xf32, #tpu.memory_space<vmem>>, vector<1x128x128xf32>
    %21 = vector.shape_cast %20 : vector<1x128x128xf32> to vector<128x128xf32>
    %22 = vector.extract_strided_slice %19 {offsets = [0, 0], sizes = [16, 128], strides = [1, 1]} : vector<128x128xf32> to vector<16x128xf32>
    %23 = vector.extract_strided_slice %19 {offsets = [16, 0], sizes = [16, 128], strides = [1, 1]} : vector<128x128xf32> to vector<16x128xf32>
    %24 = vector.extract_strided_slice %19 {offsets = [32, 0], sizes = [16, 128], strides = [1, 1]} : vector<128x128xf32> to vector<16x128xf32>
    %25 = vector.extract_strided_slice %19 {offsets = [48, 0], sizes = [16, 128], strides = [1, 1]} : vector<128x128xf32> to vector<16x128xf32>
    %26 = vector.extract_strided_slice %19 {offsets = [64, 0], sizes = [16, 128], strides = [1, 1]} : vector<128x128xf32> to vector<16x128xf32>
    %27 = vector.extract_strided_slice %19 {offsets = [80, 0], sizes = [16, 128], strides = [1, 1]} : vector<128x128xf32> to vector<16x128xf32>
    %28 = vector.extract_strided_slice %19 {offsets = [96, 0], sizes = [16, 128], strides = [1, 1]} : vector<128x128xf32> to vector<16x128xf32>
    %29 = vector.extract_strided_slice %19 {offsets = [112, 0], sizes = [16, 128], strides = [1, 1]} : vector<128x128xf32> to vector<16x128xf32>
    %cst_20 = arith.constant 0.000000e+00 : f32
    %30 = vector.broadcast %cst_20 : f32 to vector<16x128xf32>
    %31 = vector.extract_strided_slice %21 {offsets = [0, 0], sizes = [1, 128], strides = [1, 1]} : vector<128x128xf32> to vector<1x128xf32>
    %32 = vector.broadcast %31 : vector<1x128xf32> to vector<16x128xf32>
    %33 = arith.mulf %32, %22 : vector<16x128xf32>
    %34 = arith.addf %30, %33 : vector<16x128xf32>
    %35 = vector.extract_strided_slice %21 {offsets = [16, 0], sizes = [1, 128], strides = [1, 1]} : vector<128x128xf32> to vector<1x128xf32>
    %36 = vector.broadcast %35 : vector<1x128xf32> to vector<16x128xf32>
    %37 = arith.mulf %36, %23 : vector<16x128xf32>
    %38 = arith.addf %34, %37 : vector<16x128xf32>
    %39 = vector.extract_strided_slice %21 {offsets = [32, 0], sizes = [1, 128], strides = [1, 1]} : vector<128x128xf32> to vector<1x128xf32>
    %40 = vector.broadcast %39 : vector<1x128xf32> to vector<16x128xf32>
    %41 = arith.mulf %40, %24 : vector<16x128xf32>
    %42 = arith.addf %38, %41 : vector<16x128xf32>
    %43 = vector.extract_strided_slice %21 {offsets = [48, 0], sizes = [1, 128], strides = [1, 1]} : vector<128x128xf32> to vector<1x128xf32>
    %44 = vector.broadcast %43 : vector<1x128xf32> to vector<16x128xf32>
    %45 = arith.mulf %44, %25 : vector<16x128xf32>
    %46 = arith.addf %42, %45 : vector<16x128xf32>
    %47 = vector.extract_strided_slice %21 {offsets = [64, 0], sizes = [1, 128], strides = [1, 1]} : vector<128x128xf32> to vector<1x128xf32>
    %48 = vector.broadcast %47 : vector<1x128xf32> to vector<16x128xf32>
    %49 = arith.mulf %48, %26 : vector<16x128xf32>
    %50 = arith.addf %46, %49 : vector<16x128xf32>
    %51 = vector.extract_strided_slice %21 {offsets = [80, 0], sizes = [1, 128], strides = [1, 1]} : vector<128x128xf32> to vector<1x128xf32>
    %52 = vector.broadcast %51 : vector<1x128xf32> to vector<16x128xf32>
    %53 = arith.mulf %52, %27 : vector<16x128xf32>
    %54 = arith.addf %50, %53 : vector<16x128xf32>
    %55 = vector.extract_strided_slice %21 {offsets = [96, 0], sizes = [1, 128], strides = [1, 1]} : vector<128x128xf32> to vector<1x128xf32>
    %56 = vector.broadcast %55 : vector<1x128xf32> to vector<16x128xf32>
    %57 = arith.mulf %56, %28 : vector<16x128xf32>
    %58 = arith.addf %54, %57 : vector<16x128xf32>
    %59 = vector.extract_strided_slice %21 {offsets = [112, 0], sizes = [1, 128], strides = [1, 1]} : vector<128x128xf32> to vector<1x128xf32>
    %60 = vector.broadcast %59 : vector<1x128xf32> to vector<16x128xf32>
    %61 = arith.mulf %60, %29 : vector<16x128xf32>
    %62 = arith.addf %58, %61 : vector<16x128xf32>
    %c0_21 = arith.constant 0 : index
    %c0_22 = arith.constant 0 : index
    %63 = vector.load %arg12[%c0_21, %c0_22] : memref<256x128xf32, #tpu.memory_space<vmem>>, vector<16x128xf32>
    tpu.vector_store %arg12[%c0_21, %c0_22], %62 {strides = array<i32>} : memref<256x128xf32, #tpu.memory_space<vmem>>, vector<16x128xf32>,
    %cst_23 = arith.constant 0.000000e+00 : f32
    %64 = vector.broadcast %cst_23 : f32 to vector<16x128xf32>
    %65 = vector.extract_strided_slice %21 {offsets = [1, 0], sizes = [1, 128], strides = [1, 1]} : vector<128x128xf32> to vector<1x128xf32>
    %66 = vector.broadcast %65 : vector<1x128xf32> to vector<16x128xf32>
    %67 = arith.mulf %66, %22 : vector<16x128xf32>
    %68 = arith.addf %64, %67 : vector<16x128xf32>
    %69 = vector.extract_strided_slice %21 {offsets = [17, 0], sizes = [1, 128], strides = [1, 1]} : vector<128x128xf32> to vector<1x128xf32>
    %70 = vector.broadcast %69 : vector<1x128xf32> to vector<16x128xf32>
    %71 = arith.mulf %70, %23 : vector<16x128xf32>
    %72 = arith.addf %68, %71 : vector<16x128xf32>
    %73 = vector.extract_strided_slice %21 {offsets = [33, 0], sizes = [1, 128], strides = [1, 1]} : vector<128x128xf32> to vector<1x128xf32>
    %74 = vector.broadcast %73 : vector<1x128xf32> to vector<16x128xf32>
    %75 = arith.mulf %74, %24 : vector<16x128xf32>
    %76 = arith.addf %72, %75 : vector<16x128xf32>
    %77 = vector.extract_strided_slice %21 {offsets = [49, 0], sizes = [1, 128], strides = [1, 1]} : vector<128x128xf32> to vector<1x128xf32>
    %78 = vector.broadcast %77 : vector<1x128xf32> to vector<16x128xf32>
    %79 = arith.mulf %78, %25 : vector<16x128xf32>
    %80 = arith.addf %76, %79 : vector<16x128xf32>
    %81 = vector.extract_strided_slice %21 {offsets = [65, 0], sizes = [1, 128], strides = [1, 1]} : vector<128x128xf32> to vector<1x128xf32>
    %82 = vector.broadcast %81 : vector<1x128xf32> to vector<16x128xf32>
    %83 = arith.mulf %82, %26 : vector<16x128xf32>
    %84 = arith.addf %80, %83 : vector<16x128xf32>
    %85 = vector.extract_strided_slice %21 {offsets = [81, 0], sizes = [1, 128], strides = [1, 1]} : vector<128x128xf32> to vector<1x128xf32>
    %86 = vector.broadcast %85 : vector<1x128xf32> to vector<16x128xf32>
    %87 = arith.mulf %86, %27 : vector<16x128xf32>
    %88 = arith.addf %84, %87 : vector<16x128xf32>
    %89 = vector.extract_strided_slice %21 {offsets = [97, 0], sizes = [1, 128], strides = [1, 1]} : vector<128x128xf32> to vector<1x128xf32>
    %90 = vector.broadcast %89 : vector<1x128xf32> to vector<16x128xf32>
    %91 = arith.mulf %90, %28 : vector<16x128xf32>
    %92 = arith.addf %88, %91 : vector<16x128xf32>
    %93 = vector.extract_strided_slice %21 {offsets = [113, 0], sizes = [1, 128], strides = [1, 1]} : vector<128x128xf32> to vector<1x128xf32>
    %94 = vector.broadcast %93 : vector<1x128xf32> to vector<16x128xf32>
    %95 = arith.mulf %94, %29 : vector<16x128xf32>
    %96 = arith.addf %92, %95 : vector<16x128xf32>
    %c16 = arith.constant 16 : index
    %c0_24 = arith.constant 0 : index
    %97 = vector.load %arg12[%c16, %c0_24] : memref<256x128xf32, #tpu.memory_space<vmem>>, vector<16x128xf32>
    tpu.vector_store %arg12[%c16, %c0_24], %96 {strides = array<i32>} : memref<256x128xf32, #tpu.memory_space<vmem>>, vector<16x128xf32>,
    %cst_25 = arith.constant 0.000000e+00 : f32
    %98 = vector.broadcast %cst_25 : f32 to vector<16x128xf32>
    %99 = vector.extract_strided_slice %21 {offsets = [2, 0], sizes = [1, 128], strides = [1, 1]} : vector<128x128xf32> to vector<1x128xf32>
    %100 = vector.broadcast %99 : vector<1x128xf32> to vector<16x128xf32>
    %101 = arith.mulf %100, %22 : vector<16x128xf32>
    %102 = arith.addf %98, %101 : vector<16x128xf32>
    %103 = vector.extract_strided_slice %21 {offsets = [18, 0], sizes = [1, 128], strides = [1, 1]} : vector<128x128xf32> to vector<1x128xf32>
    %104 = vector.broadcast %103 : vector<1x128xf32> to vector<16x128xf32>
    %105 = arith.mulf %104, %23 : vector<16x128xf32>
    %106 = arith.addf %102, %105 : vector<16x128xf32>
    %107 = vector.extract_strided_slice %21 {offsets = [34, 0], sizes = [1, 128], strides = [1, 1]} : vector<128x128xf32> to vector<1x128xf32>
    %108 = vector.broadcast %107 : vector<1x128xf32> to vector<16x128xf32>
    %109 = arith.mulf %108, %24 : vector<16x128xf32>
    %110 = arith.addf %106, %109 : vector<16x128xf32>
    %111 = vector.extract_strided_slice %21 {offsets = [50, 0], sizes = [1, 128], strides = [1, 1]} : vector<128x128xf32> to vector<1x128xf32>
    %112 = vector.broadcast %111 : vector<1x128xf32> to vector<16x128xf32>
    %113 = arith.mulf %112, %25 : vector<16x128xf32>
    %114 = arith.addf %110, %113 : vector<16x128xf32>
    %115 = vector.extract_strided_slice %21 {offsets = [66, 0], sizes = [1, 128], strides = [1, 1]} : vector<128x128xf32> to vector<1x128xf32>
    %116 = vector.broadcast %115 : vector<1x128xf32> to vector<16x128xf32>
    %117 = arith.mulf %116, %26 : vector<16x128xf32>
    %118 = arith.addf %114, %117 : vector<16x128xf32>
    %119 = vector.extract_strided_slice %21 {offsets = [82, 0], sizes = [1, 128], strides = [1, 1]} : vector<128x128xf32> to vector<1x128xf32>
    %120 = vector.broadcast %119 : vector<1x128xf32> to vector<16x128xf32>
    %121 = arith.mulf %120, %27 : vector<16x128xf32>
    %122 = arith.addf %118, %121 : vector<16x128xf32>
    %123 = vector.extract_strided_slice %21 {offsets = [98, 0], sizes = [1, 128], strides = [1, 1]} : vector<128x128xf32> to vector<1x128xf32>
    %124 = vector.broadcast %123 : vector<1x128xf32> to vector<16x128xf32>
    %125 = arith.mulf %124, %28 : vector<16x128xf32>
    %126 = arith.addf %122, %125 : vector<16x128xf32>
    %127 = vector.extract_strided_slice %21 {offsets = [114, 0], sizes = [1, 128], strides = [1, 1]} : vector<128x128xf32> to vector<1x128xf32>
    %128 = vector.broadcast %127 : vector<1x128xf32> to vector<16x128xf32>
    %129 = arith.mulf %128, %29 : vector<16x128xf32>
    %130 = arith.addf %126, %129 : vector<16x128xf32>
    %c32 = arith.constant 32 : index
    %c0_26 = arith.constant 0 : index
    %131 = vector.load %arg12[%c32, %c0_26] : memref<256x128xf32, #tpu.memory_space<vmem>>, vector<16x128xf32>
    tpu.vector_store %arg12[%c32, %c0_26], %130 {strides = array<i32>} : memref<256x128xf32, #tpu.memory_space<vmem>>, vector<16x128xf32>,
    %cst_27 = arith.constant 0.000000e+00 : f32
    %132 = vector.broadcast %cst_27 : f32 to vector<16x128xf32>
    %133 = vector.extract_strided_slice %21 {offsets = [3, 0], sizes = [1, 128], strides = [1, 1]} : vector<128x128xf32> to vector<1x128xf32>
    %134 = vector.broadcast %133 : vector<1x128xf32> to vector<16x128xf32>
    %135 = arith.mulf %134, %22 : vector<16x128xf32>
    %136 = arith.addf %132, %135 : vector<16x128xf32>
    %137 = vector.extract_strided_slice %21 {offsets = [19, 0], sizes = [1, 128], strides = [1, 1]} : vector<128x128xf32> to vector<1x128xf32>
    %138 = vector.broadcast %137 : vector<1x128xf32> to vector<16x128xf32>
    %139 = arith.mulf %138, %23 : vector<16x128xf32>
    %140 = arith.addf %136, %139 : vector<16x128xf32>
    %141 = vector.extract_strided_slice %21 {offsets = [35, 0], sizes = [1, 128], strides = [1, 1]} : vector<128x128xf32> to vector<1x128xf32>
    %142 = vector.broadcast %141 : vector<1x128xf32> to vector<16x128xf32>
    %143 = arith.mulf %142, %24 : vector<16x128xf32>
    %144 = arith.addf %140, %143 : vector<16x128xf32>
    %145 = vector.extract_strided_slice %21 {offsets = [51, 0], sizes = [1, 128], strides = [1, 1]} : vector<128x128xf32> to vector<1x128xf32>
    %146 = vector.broadcast %145 : vector<1x128xf32> to vector<16x128xf32>
    %147 = arith.mulf %146, %25 : vector<16x128xf32>
    %148 = arith.addf %144, %147 : vector<16x128xf32>
    %149 = vector.extract_strided_slice %21 {offsets = [67, 0], sizes = [1, 128], strides = [1, 1]} : vector<128x128xf32> to vector<1x128xf32>
    %150 = vector.broadcast %149 : vector<1x128xf32> to vector<16x128xf32>
    %151 = arith.mulf %150, %26 : vector<16x128xf32>
    %152 = arith.addf %148, %151 : vector<16x128xf32>
    %153 = vector.extract_strided_slice %21 {offsets = [83, 0], sizes = [1, 128], strides = [1, 1]} : vector<128x128xf32> to vector<1x128xf32>
    %154 = vector.broadcast %153 : vector<1x128xf32> to vector<16x128xf32>
    %155 = arith.mulf %154, %27 : vector<16x128xf32>
    %156 = arith.addf %152, %155 : vector<16x128xf32>
    %157 = vector.extract_strided_slice %21 {offsets = [99, 0], sizes = [1, 128], strides = [1, 1]} : vector<128x128xf32> to vector<1x128xf32>
    %158 = vector.broadcast %157 : vector<1x128xf32> to vector<16x128xf32>
    %159 = arith.mulf %158, %28 : vector<16x128xf32>
    %160 = arith.addf %156, %159 : vector<16x128xf32>
    %161 = vector.extract_strided_slice %21 {offsets = [115, 0], sizes = [1, 128], strides = [1, 1]} : vector<128x128xf32> to vector<1x128xf32>
    %162 = vector.broadcast %161 : vector<1x128xf32> to vector<16x128xf32>
    %163 = arith.mulf %162, %29 : vector<16x128xf32>
    %164 = arith.addf %160, %163 : vector<16x128xf32>
    %c48 = arith.constant 48 : index
    %c0_28 = arith.constant 0 : index
    %165 = vector.load %arg12[%c48, %c0_28] : memref<256x128xf32, #tpu.memory_space<vmem>>, vector<16x128xf32>
    tpu.vector_store %arg12[%c48, %c0_28], %164 {strides = array<i32>} : memref<256x128xf32, #tpu.memory_space<vmem>>, vector<16x128xf32>,
    %cst_29 = arith.constant 0.000000e+00 : f32
    %166 = vector.broadcast %cst_29 : f32 to vector<16x128xf32>
    %167 = vector.extract_strided_slice %21 {offsets = [4, 0], sizes = [1, 128], strides = [1, 1]} : vector<128x128xf32> to vector<1x128xf32>
    %168 = vector.broadcast %167 : vector<1x128xf32> to vector<16x128xf32>
    %169 = arith.mulf %168, %22 : vector<16x128xf32>
    %170 = arith.addf %166, %169 : vector<16x128xf32>
    %171 = vector.extract_strided_slice %21 {offsets = [20, 0], sizes = [1, 128], strides = [1, 1]} : vector<128x128xf32> to vector<1x128xf32>
    %172 = vector.broadcast %171 : vector<1x128xf32> to vector<16x128xf32>
    %173 = arith.mulf %172, %23 : vector<16x128xf32>
    %174 = arith.addf %170, %173 : vector<16x128xf32>
    %175 = vector.extract_strided_slice %21 {offsets = [36, 0], sizes = [1, 128], strides = [1, 1]} : vector<128x128xf32> to vector<1x128xf32>
    %176 = vector.broadcast %175 : vector<1x128xf32> to vector<16x128xf32>
    %177 = arith.mulf %176, %24 : vector<16x128xf32>
    %178 = arith.addf %174, %177 : vector<16x128xf32>
    %179 = vector.extract_strided_slice %21 {offsets = [52, 0], sizes = [1, 128], strides = [1, 1]} : vector<128x128xf32> to vector<1x128xf32>
    %180 = vector.broadcast %179 : vector<1x128xf32> to vector<16x128xf32>
    %181 = arith.mulf %180, %25 : vector<16x128xf32>
    %182 = arith.addf %178, %181 : vector<16x128xf32>
    %183 = vector.extract_strided_slice %21 {offsets = [68, 0], sizes = [1, 128], strides = [1, 1]} : vector<128x128xf32> to vector<1x128xf32>
    %184 = vector.broadcast %183 : vector<1x128xf32> to vector<16x128xf32>
    %185 = arith.mulf %184, %26 : vector<16x128xf32>
    %186 = arith.addf %182, %185 : vector<16x128xf32>
    %187 = vector.extract_strided_slice %21 {offsets = [84, 0], sizes = [1, 128], strides = [1, 1]} : vector<128x128xf32> to vector<1x128xf32>
    %188 = vector.broadcast %187 : vector<1x128xf32> to vector<16x128xf32>
    %189 = arith.mulf %188, %27 : vector<16x128xf32>
    %190 = arith.addf %186, %189 : vector<16x128xf32>
    %191 = vector.extract_strided_slice %21 {offsets = [100, 0], sizes = [1, 128], strides = [1, 1]} : vector<128x128xf32> to vector<1x128xf32>
    %192 = vector.broadcast %191 : vector<1x128xf32> to vector<16x128xf32>
    %193 = arith.mulf %192, %28 : vector<16x128xf32>
    %194 = arith.addf %190, %193 : vector<16x128xf32>
    %195 = vector.extract_strided_slice %21 {offsets = [116, 0], sizes = [1, 128], strides = [1, 1]} : vector<128x128xf32> to vector<1x128xf32>
    %196 = vector.broadcast %195 : vector<1x128xf32> to vector<16x128xf32>
    %197 = arith.mulf %196, %29 : vector<16x128xf32>
    %198 = arith.addf %194, %197 : vector<16x128xf32>
    %c64 = arith.constant 64 : index
    %c0_30 = arith.constant 0 : index
    %199 = vector.load %arg12[%c64, %c0_30] : memref<256x128xf32, #tpu.memory_space<vmem>>, vector<16x128xf32>
    tpu.vector_store %arg12[%c64, %c0_30], %198 {strides = array<i32>} : memref<256x128xf32, #tpu.memory_space<vmem>>, vector<16x128xf32>,
    %cst_31 = arith.constant 0.000000e+00 : f32
    %200 = vector.broadcast %cst_31 : f32 to vector<16x128xf32>
    %201 = vector.extract_strided_slice %21 {offsets = [5, 0], sizes = [1, 128], strides = [1, 1]} : vector<128x128xf32> to vector<1x128xf32>
    %202 = vector.broadcast %201 : vector<1x128xf32> to vector<16x128xf32>
    %203 = arith.mulf %202, %22 : vector<16x128xf32>
    %204 = arith.addf %200, %203 : vector<16x128xf32>
    %205 = vector.extract_strided_slice %21 {offsets = [21, 0], sizes = [1, 128], strides = [1, 1]} : vector<128x128xf32> to vector<1x128xf32>
    %206 = vector.broadcast %205 : vector<1x128xf32> to vector<16x128xf32>
    %207 = arith.mulf %206, %23 : vector<16x128xf32>
    %208 = arith.addf %204, %207 : vector<16x128xf32>
    %209 = vector.extract_strided_slice %21 {offsets = [37, 0], sizes = [1, 128], strides = [1, 1]} : vector<128x128xf32> to vector<1x128xf32>
    %210 = vector.broadcast %209 : vector<1x128xf32> to vector<16x128xf32>
    %211 = arith.mulf %210, %24 : vector<16x128xf32>
    %212 = arith.addf %208, %211 : vector<16x128xf32>
    %213 = vector.extract_strided_slice %21 {offsets = [53, 0], sizes = [1, 128], strides = [1, 1]} : vector<128x128xf32> to vector<1x128xf32>
    %214 = vector.broadcast %213 : vector<1x128xf32> to vector<16x128xf32>
    %215 = arith.mulf %214, %25 : vector<16x128xf32>
    %216 = arith.addf %212, %215 : vector<16x128xf32>
    %217 = vector.extract_strided_slice %21 {offsets = [69, 0], sizes = [1, 128], strides = [1, 1]} : vector<128x128xf32> to vector<1x128xf32>
    %218 = vector.broadcast %217 : vector<1x128xf32> to vector<16x128xf32>
    %219 = arith.mulf %218, %26 : vector<16x128xf32>
    %220 = arith.addf %216, %219 : vector<16x128xf32>
    %221 = vector.extract_strided_slice %21 {offsets = [85, 0], sizes = [1, 128], strides = [1, 1]} : vector<128x128xf32> to vector<1x128xf32>
    %222 = vector.broadcast %221 : vector<1x128xf32> to vector<16x128xf32>
    %223 = arith.mulf %222, %27 : vector<16x128xf32>
    %224 = arith.addf %220, %223 : vector<16x128xf32>
    %225 = vector.extract_strided_slice %21 {offsets = [101, 0], sizes = [1, 128], strides = [1, 1]} : vector<128x128xf32> to vector<1x128xf32>
    %226 = vector.broadcast %225 : vector<1x128xf32> to vector<16x128xf32>
    %227 = arith.mulf %226, %28 : vector<16x128xf32>
    %228 = arith.addf %224, %227 : vector<16x128xf32>
    %229 = vector.extract_strided_slice %21 {offsets = [117, 0], sizes = [1, 128], strides = [1, 1]} : vector<128x128xf32> to vector<1x128xf32>
    %230 = vector.broadcast %229 : vector<1x128xf32> to vector<16x128xf32>
    %231 = arith.mulf %230, %29 : vector<16x128xf32>
    %232 = arith.addf %228, %231 : vector<16x128xf32>
    %c80 = arith.constant 80 : index
    %c0_32 = arith.constant 0 : index
    %233 = vector.load %arg12[%c80, %c0_32] : memref<256x128xf32, #tpu.memory_space<vmem>>, vector<16x128xf32>
    tpu.vector_store %arg12[%c80, %c0_32], %232 {strides = array<i32>} : memref<256x128xf32, #tpu.memory_space<vmem>>, vector<16x128xf32>,
    %cst_33 = arith.constant 0.000000e+00 : f32
    %234 = vector.broadcast %cst_33 : f32 to vector<16x128xf32>
    %235 = vector.extract_strided_slice %21 {offsets = [6, 0], sizes = [1, 128], strides = [1, 1]} : vector<128x128xf32> to vector<1x128xf32>
    %236 = vector.broadcast %235 : vector<1x128xf32> to vector<16x128xf32>
    %237 = arith.mulf %236, %22 : vector<16x128xf32>
    %238 = arith.addf %234, %237 : vector<16x128xf32>
    %239 = vector.extract_strided_slice %21 {offsets = [22, 0], sizes = [1, 128], strides = [1, 1]} : vector<128x128xf32> to vector<1x128xf32>
    %240 = vector.broadcast %239 : vector<1x128xf32> to vector<16x128xf32>
    %241 = arith.mulf %240, %23 : vector<16x128xf32>
    %242 = arith.addf %238, %241 : vector<16x128xf32>
    %243 = vector.extract_strided_slice %21 {offsets = [38, 0], sizes = [1, 128], strides = [1, 1]} : vector<128x128xf32> to vector<1x128xf32>
    %244 = vector.broadcast %243 : vector<1x128xf32> to vector<16x128xf32>
    %245 = arith.mulf %244, %24 : vector<16x128xf32>
    %246 = arith.addf %242, %245 : vector<16x128xf32>
    %247 = vector.extract_strided_slice %21 {offsets = [54, 0], sizes = [1, 128], strides = [1, 1]} : vector<128x128xf32> to vector<1x128xf32>
    %248 = vector.broadcast %247 : vector<1x128xf32> to vector<16x128xf32>
    %249 = arith.mulf %248, %25 : vector<16x128xf32>
    %250 = arith.addf %246, %249 : vector<16x128xf32>
    %251 = vector.extract_strided_slice %21 {offsets = [70, 0], sizes = [1, 128], strides = [1, 1]} : vector<128x128xf32> to vector<1x128xf32>
    %252 = vector.broadcast %251 : vector<1x128xf32> to vector<16x128xf32>
    %253 = arith.mulf %252, %26 : vector<16x128xf32>
    %254 = arith.addf %250, %253 : vector<16x128xf32>
    %255 = vector.extract_strided_slice %21 {offsets = [86, 0], sizes = [1, 128], strides = [1, 1]} : vector<128x128xf32> to vector<1x128xf32>
    %256 = vector.broadcast %255 : vector<1x128xf32> to vector<16x128xf32>
    %257 = arith.mulf %256, %27 : vector<16x128xf32>
    %258 = arith.addf %254, %257 : vector<16x128xf32>
    %259 = vector.extract_strided_slice %21 {offsets = [102, 0], sizes = [1, 128], strides = [1, 1]} : vector<128x128xf32> to vector<1x128xf32>
    %260 = vector.broadcast %259 : vector<1x128xf32> to vector<16x128xf32>
    %261 = arith.mulf %260, %28 : vector<16x128xf32>
    %262 = arith.addf %258, %261 : vector<16x128xf32>
    %263 = vector.extract_strided_slice %21 {offsets = [118, 0], sizes = [1, 128], strides = [1, 1]} : vector<128x128xf32> to vector<1x128xf32>
    %264 = vector.broadcast %263 : vector<1x128xf32> to vector<16x128xf32>
    %265 = arith.mulf %264, %29 : vector<16x128xf32>
    %266 = arith.addf %262, %265 : vector<16x128xf32>
    %c96 = arith.constant 96 : index
    %c0_34 = arith.constant 0 : index
    %267 = vector.load %arg12[%c96, %c0_34] : memref<256x128xf32, #tpu.memory_space<vmem>>, vector<16x128xf32>
    tpu.vector_store %arg12[%c96, %c0_34], %266 {strides = array<i32>} : memref<256x128xf32, #tpu.memory_space<vmem>>, vector<16x128xf32>,
    %cst_35 = arith.constant 0.000000e+00 : f32
    %268 = vector.broadcast %cst_35 : f32 to vector<16x128xf32>
    %269 = vector.extract_strided_slice %21 {offsets = [7, 0], sizes = [1, 128], strides = [1, 1]} : vector<128x128xf32> to vector<1x128xf32>
    %270 = vector.broadcast %269 : vector<1x128xf32> to vector<16x128xf32>
    %271 = arith.mulf %270, %22 : vector<16x128xf32>
    %272 = arith.addf %268, %271 : vector<16x128xf32>
    %273 = vector.extract_strided_slice %21 {offsets = [23, 0], sizes = [1, 128], strides = [1, 1]} : vector<128x128xf32> to vector<1x128xf32>
    %274 = vector.broadcast %273 : vector<1x128xf32> to vector<16x128xf32>
    %275 = arith.mulf %274, %23 : vector<16x128xf32>
    %276 = arith.addf %272, %275 : vector<16x128xf32>
    %277 = vector.extract_strided_slice %21 {offsets = [39, 0], sizes = [1, 128], strides = [1, 1]} : vector<128x128xf32> to vector<1x128xf32>
    %278 = vector.broadcast %277 : vector<1x128xf32> to vector<16x128xf32>
    %279 = arith.mulf %278, %24 : vector<16x128xf32>
    %280 = arith.addf %276, %279 : vector<16x128xf32>
    %281 = vector.extract_strided_slice %21 {offsets = [55, 0], sizes = [1, 128], strides = [1, 1]} : vector<128x128xf32> to vector<1x128xf32>
    %282 = vector.broadcast %281 : vector<1x128xf32> to vector<16x128xf32>
    %283 = arith.mulf %282, %25 : vector<16x128xf32>
    %284 = arith.addf %280, %283 : vector<16x128xf32>
    %285 = vector.extract_strided_slice %21 {offsets = [71, 0], sizes = [1, 128], strides = [1, 1]} : vector<128x128xf32> to vector<1x128xf32>
    %286 = vector.broadcast %285 : vector<1x128xf32> to vector<16x128xf32>
    %287 = arith.mulf %286, %26 : vector<16x128xf32>
    %288 = arith.addf %284, %287 : vector<16x128xf32>
    %289 = vector.extract_strided_slice %21 {offsets = [87, 0], sizes = [1, 128], strides = [1, 1]} : vector<128x128xf32> to vector<1x128xf32>
    %290 = vector.broadcast %289 : vector<1x128xf32> to vector<16x128xf32>
    %291 = arith.mulf %290, %27 : vector<16x128xf32>
    %292 = arith.addf %288, %291 : vector<16x128xf32>
    %293 = vector.extract_strided_slice %21 {offsets = [103, 0], sizes = [1, 128], strides = [1, 1]} : vector<128x128xf32> to vector<1x128xf32>
    %294 = vector.broadcast %293 : vector<1x128xf32> to vector<16x128xf32>
    %295 = arith.mulf %294, %28 : vector<16x128xf32>
    %296 = arith.addf %292, %295 : vector<16x128xf32>
    %297 = vector.extract_strided_slice %21 {offsets = [119, 0], sizes = [1, 128], strides = [1, 1]} : vector<128x128xf32> to vector<1x128xf32>
    %298 = vector.broadcast %297 : vector<1x128xf32> to vector<16x128xf32>
    %299 = arith.mulf %298, %29 : vector<16x128xf32>
    %300 = arith.addf %296, %299 : vector<16x128xf32>
    %c112 = arith.constant 112 : index
    %c0_36 = arith.constant 0 : index
    %301 = vector.load %arg12[%c112, %c0_36] : memref<256x128xf32, #tpu.memory_space<vmem>>, vector<16x128xf32>
    tpu.vector_store %arg12[%c112, %c0_36], %300 {strides = array<i32>} : memref<256x128xf32, #tpu.memory_space<vmem>>, vector<16x128xf32>,
    %cst_37 = arith.constant 0.000000e+00 : f32
    %302 = vector.broadcast %cst_37 : f32 to vector<16x128xf32>
    %303 = vector.extract_strided_slice %21 {offsets = [8, 0], sizes = [1, 128], strides = [1, 1]} : vector<128x128xf32> to vector<1x128xf32>
    %304 = vector.broadcast %303 : vector<1x128xf32> to vector<16x128xf32>
    %305 = arith.mulf %304, %22 : vector<16x128xf32>
    %306 = arith.addf %302, %305 : vector<16x128xf32>
    %307 = vector.extract_strided_slice %21 {offsets = [24, 0], sizes = [1, 128], strides = [1, 1]} : vector<128x128xf32> to vector<1x128xf32>
    %308 = vector.broadcast %307 : vector<1x128xf32> to vector<16x128xf32>
    %309 = arith.mulf %308, %23 : vector<16x128xf32>
    %310 = arith.addf %306, %309 : vector<16x128xf32>
    %311 = vector.extract_strided_slice %21 {offsets = [40, 0], sizes = [1, 128], strides = [1, 1]} : vector<128x128xf32> to vector<1x128xf32>
    %312 = vector.broadcast %311 : vector<1x128xf32> to vector<16x128xf32>
    %313 = arith.mulf %312, %24 : vector<16x128xf32>
    %314 = arith.addf %310, %313 : vector<16x128xf32>
    %315 = vector.extract_strided_slice %21 {offsets = [56, 0], sizes = [1, 128], strides = [1, 1]} : vector<128x128xf32> to vector<1x128xf32>
    %316 = vector.broadcast %315 : vector<1x128xf32> to vector<16x128xf32>
    %317 = arith.mulf %316, %25 : vector<16x128xf32>
    %318 = arith.addf %314, %317 : vector<16x128xf32>
    %319 = vector.extract_strided_slice %21 {offsets = [72, 0], sizes = [1, 128], strides = [1, 1]} : vector<128x128xf32> to vector<1x128xf32>
    %320 = vector.broadcast %319 : vector<1x128xf32> to vector<16x128xf32>
    %321 = arith.mulf %320, %26 : vector<16x128xf32>
    %322 = arith.addf %318, %321 : vector<16x128xf32>
    %323 = vector.extract_strided_slice %21 {offsets = [88, 0], sizes = [1, 128], strides = [1, 1]} : vector<128x128xf32> to vector<1x128xf32>
    %324 = vector.broadcast %323 : vector<1x128xf32> to vector<16x128xf32>
    %325 = arith.mulf %324, %27 : vector<16x128xf32>
    %326 = arith.addf %322, %325 : vector<16x128xf32>
    %327 = vector.extract_strided_slice %21 {offsets = [104, 0], sizes = [1, 128], strides = [1, 1]} : vector<128x128xf32> to vector<1x128xf32>
    %328 = vector.broadcast %327 : vector<1x128xf32> to vector<16x128xf32>
    %329 = arith.mulf %328, %28 : vector<16x128xf32>
    %330 = arith.addf %326, %329 : vector<16x128xf32>
    %331 = vector.extract_strided_slice %21 {offsets = [120, 0], sizes = [1, 128], strides = [1, 1]} : vector<128x128xf32> to vector<1x128xf32>
    %332 = vector.broadcast %331 : vector<1x128xf32> to vector<16x128xf32>
    %333 = arith.mulf %332, %29 : vector<16x128xf32>
    %334 = arith.addf %330, %333 : vector<16x128xf32>
    %c128 = arith.constant 128 : index
    %c0_38 = arith.constant 0 : index
    %335 = vector.load %arg12[%c128, %c0_38] : memref<256x128xf32, #tpu.memory_space<vmem>>, vector<16x128xf32>
    tpu.vector_store %arg12[%c128, %c0_38], %334 {strides = array<i32>} : memref<256x128xf32, #tpu.memory_space<vmem>>, vector<16x128xf32>,
    %cst_39 = arith.constant 0.000000e+00 : f32
    %336 = vector.broadcast %cst_39 : f32 to vector<16x128xf32>
    %337 = vector.extract_strided_slice %21 {offsets = [9, 0], sizes = [1, 128], strides = [1, 1]} : vector<128x128xf32> to vector<1x128xf32>
    %338 = vector.broadcast %337 : vector<1x128xf32> to vector<16x128xf32>
    %339 = arith.mulf %338, %22 : vector<16x128xf32>
    %340 = arith.addf %336, %339 : vector<16x128xf32>
    %341 = vector.extract_strided_slice %21 {offsets = [25, 0], sizes = [1, 128], strides = [1, 1]} : vector<128x128xf32> to vector<1x128xf32>
    %342 = vector.broadcast %341 : vector<1x128xf32> to vector<16x128xf32>
    %343 = arith.mulf %342, %23 : vector<16x128xf32>
    %344 = arith.addf %340, %343 : vector<16x128xf32>
    %345 = vector.extract_strided_slice %21 {offsets = [41, 0], sizes = [1, 128], strides = [1, 1]} : vector<128x128xf32> to vector<1x128xf32>
    %346 = vector.broadcast %345 : vector<1x128xf32> to vector<16x128xf32>
    %347 = arith.mulf %346, %24 : vector<16x128xf32>
    %348 = arith.addf %344, %347 : vector<16x128xf32>
    %349 = vector.extract_strided_slice %21 {offsets = [57, 0], sizes = [1, 128], strides = [1, 1]} : vector<128x128xf32> to vector<1x128xf32>
    %350 = vector.broadcast %349 : vector<1x128xf32> to vector<16x128xf32>
    %351 = arith.mulf %350, %25 : vector<16x128xf32>
    %352 = arith.addf %348, %351 : vector<16x128xf32>
    %353 = vector.extract_strided_slice %21 {offsets = [73, 0], sizes = [1, 128], strides = [1, 1]} : vector<128x128xf32> to vector<1x128xf32>
    %354 = vector.broadcast %353 : vector<1x128xf32> to vector<16x128xf32>
    %355 = arith.mulf %354, %26 : vector<16x128xf32>
    %356 = arith.addf %352, %355 : vector<16x128xf32>
    %357 = vector.extract_strided_slice %21 {offsets = [89, 0], sizes = [1, 128], strides = [1, 1]} : vector<128x128xf32> to vector<1x128xf32>
    %358 = vector.broadcast %357 : vector<1x128xf32> to vector<16x128xf32>
    %359 = arith.mulf %358, %27 : vector<16x128xf32>
    %360 = arith.addf %356, %359 : vector<16x128xf32>
    %361 = vector.extract_strided_slice %21 {offsets = [105, 0], sizes = [1, 128], strides = [1, 1]} : vector<128x128xf32> to vector<1x128xf32>
    %362 = vector.broadcast %361 : vector<1x128xf32> to vector<16x128xf32>
    %363 = arith.mulf %362, %28 : vector<16x128xf32>
    %364 = arith.addf %360, %363 : vector<16x128xf32>
    %365 = vector.extract_strided_slice %21 {offsets = [121, 0], sizes = [1, 128], strides = [1, 1]} : vector<128x128xf32> to vector<1x128xf32>
    %366 = vector.broadcast %365 : vector<1x128xf32> to vector<16x128xf32>
    %367 = arith.mulf %366, %29 : vector<16x128xf32>
    %368 = arith.addf %364, %367 : vector<16x128xf32>
    %c144 = arith.constant 144 : index
    %c0_40 = arith.constant 0 : index
    %369 = vector.load %arg12[%c144, %c0_40] : memref<256x128xf32, #tpu.memory_space<vmem>>, vector<16x128xf32>
    tpu.vector_store %arg12[%c144, %c0_40], %368 {strides = array<i32>} : memref<256x128xf32, #tpu.memory_space<vmem>>, vector<16x128xf32>,
    %cst_41 = arith.constant 0.000000e+00 : f32
    %370 = vector.broadcast %cst_41 : f32 to vector<16x128xf32>
    %371 = vector.extract_strided_slice %21 {offsets = [10, 0], sizes = [1, 128], strides = [1, 1]} : vector<128x128xf32> to vector<1x128xf32>
    %372 = vector.broadcast %371 : vector<1x128xf32> to vector<16x128xf32>
    %373 = arith.mulf %372, %22 : vector<16x128xf32>
    %374 = arith.addf %370, %373 : vector<16x128xf32>
    %375 = vector.extract_strided_slice %21 {offsets = [26, 0], sizes = [1, 128], strides = [1, 1]} : vector<128x128xf32> to vector<1x128xf32>
    %376 = vector.broadcast %375 : vector<1x128xf32> to vector<16x128xf32>
    %377 = arith.mulf %376, %23 : vector<16x128xf32>
    %378 = arith.addf %374, %377 : vector<16x128xf32>
    %379 = vector.extract_strided_slice %21 {offsets = [42, 0], sizes = [1, 128], strides = [1, 1]} : vector<128x128xf32> to vector<1x128xf32>
    %380 = vector.broadcast %379 : vector<1x128xf32> to vector<16x128xf32>
    %381 = arith.mulf %380, %24 : vector<16x128xf32>
    %382 = arith.addf %378, %381 : vector<16x128xf32>
    %383 = vector.extract_strided_slice %21 {offsets = [58, 0], sizes = [1, 128], strides = [1, 1]} : vector<128x128xf32> to vector<1x128xf32>
    %384 = vector.broadcast %383 : vector<1x128xf32> to vector<16x128xf32>
    %385 = arith.mulf %384, %25 : vector<16x128xf32>
    %386 = arith.addf %382, %385 : vector<16x128xf32>
    %387 = vector.extract_strided_slice %21 {offsets = [74, 0], sizes = [1, 128], strides = [1, 1]} : vector<128x128xf32> to vector<1x128xf32>
    %388 = vector.broadcast %387 : vector<1x128xf32> to vector<16x128xf32>
    %389 = arith.mulf %388, %26 : vector<16x128xf32>
    %390 = arith.addf %386, %389 : vector<16x128xf32>
    %391 = vector.extract_strided_slice %21 {offsets = [90, 0], sizes = [1, 128], strides = [1, 1]} : vector<128x128xf32> to vector<1x128xf32>
    %392 = vector.broadcast %391 : vector<1x128xf32> to vector<16x128xf32>
    %393 = arith.mulf %392, %27 : vector<16x128xf32>
    %394 = arith.addf %390, %393 : vector<16x128xf32>
    %395 = vector.extract_strided_slice %21 {offsets = [106, 0], sizes = [1, 128], strides = [1, 1]} : vector<128x128xf32> to vector<1x128xf32>
    %396 = vector.broadcast %395 : vector<1x128xf32> to vector<16x128xf32>
    %397 = arith.mulf %396, %28 : vector<16x128xf32>
    %398 = arith.addf %394, %397 : vector<16x128xf32>
    %399 = vector.extract_strided_slice %21 {offsets = [122, 0], sizes = [1, 128], strides = [1, 1]} : vector<128x128xf32> to vector<1x128xf32>
    %400 = vector.broadcast %399 : vector<1x128xf32> to vector<16x128xf32>
    %401 = arith.mulf %400, %29 : vector<16x128xf32>
    %402 = arith.addf %398, %401 : vector<16x128xf32>
    %c160 = arith.constant 160 : index
    %c0_42 = arith.constant 0 : index
    %403 = vector.load %arg12[%c160, %c0_42] : memref<256x128xf32, #tpu.memory_space<vmem>>, vector<16x128xf32>
    tpu.vector_store %arg12[%c160, %c0_42], %402 {strides = array<i32>} : memref<256x128xf32, #tpu.memory_space<vmem>>, vector<16x128xf32>,
    %cst_43 = arith.constant 0.000000e+00 : f32
    %404 = vector.broadcast %cst_43 : f32 to vector<16x128xf32>
    %405 = vector.extract_strided_slice %21 {offsets = [11, 0], sizes = [1, 128], strides = [1, 1]} : vector<128x128xf32> to vector<1x128xf32>
    %406 = vector.broadcast %405 : vector<1x128xf32> to vector<16x128xf32>
    %407 = arith.mulf %406, %22 : vector<16x128xf32>
    %408 = arith.addf %404, %407 : vector<16x128xf32>
    %409 = vector.extract_strided_slice %21 {offsets = [27, 0], sizes = [1, 128], strides = [1, 1]} : vector<128x128xf32> to vector<1x128xf32>
    %410 = vector.broadcast %409 : vector<1x128xf32> to vector<16x128xf32>
    %411 = arith.mulf %410, %23 : vector<16x128xf32>
    %412 = arith.addf %408, %411 : vector<16x128xf32>
    %413 = vector.extract_strided_slice %21 {offsets = [43, 0], sizes = [1, 128], strides = [1, 1]} : vector<128x128xf32> to vector<1x128xf32>
    %414 = vector.broadcast %413 : vector<1x128xf32> to vector<16x128xf32>
    %415 = arith.mulf %414, %24 : vector<16x128xf32>
    %416 = arith.addf %412, %415 : vector<16x128xf32>
    %417 = vector.extract_strided_slice %21 {offsets = [59, 0], sizes = [1, 128], strides = [1, 1]} : vector<128x128xf32> to vector<1x128xf32>
    %418 = vector.broadcast %417 : vector<1x128xf32> to vector<16x128xf32>
    %419 = arith.mulf %418, %25 : vector<16x128xf32>
    %420 = arith.addf %416, %419 : vector<16x128xf32>
    %421 = vector.extract_strided_slice %21 {offsets = [75, 0], sizes = [1, 128], strides = [1, 1]} : vector<128x128xf32> to vector<1x128xf32>
    %422 = vector.broadcast %421 : vector<1x128xf32> to vector<16x128xf32>
    %423 = arith.mulf %422, %26 : vector<16x128xf32>
    %424 = arith.addf %420, %423 : vector<16x128xf32>
    %425 = vector.extract_strided_slice %21 {offsets = [91, 0], sizes = [1, 128], strides = [1, 1]} : vector<128x128xf32> to vector<1x128xf32>
    %426 = vector.broadcast %425 : vector<1x128xf32> to vector<16x128xf32>
    %427 = arith.mulf %426, %27 : vector<16x128xf32>
    %428 = arith.addf %424, %427 : vector<16x128xf32>
    %429 = vector.extract_strided_slice %21 {offsets = [107, 0], sizes = [1, 128], strides = [1, 1]} : vector<128x128xf32> to vector<1x128xf32>
    %430 = vector.broadcast %429 : vector<1x128xf32> to vector<16x128xf32>
    %431 = arith.mulf %430, %28 : vector<16x128xf32>
    %432 = arith.addf %428, %431 : vector<16x128xf32>
    %433 = vector.extract_strided_slice %21 {offsets = [123, 0], sizes = [1, 128], strides = [1, 1]} : vector<128x128xf32> to vector<1x128xf32>
    %434 = vector.broadcast %433 : vector<1x128xf32> to vector<16x128xf32>
    %435 = arith.mulf %434, %29 : vector<16x128xf32>
    %436 = arith.addf %432, %435 : vector<16x128xf32>
    %c176 = arith.constant 176 : index
    %c0_44 = arith.constant 0 : index
    %437 = vector.load %arg12[%c176, %c0_44] : memref<256x128xf32, #tpu.memory_space<vmem>>, vector<16x128xf32>
    tpu.vector_store %arg12[%c176, %c0_44], %436 {strides = array<i32>} : memref<256x128xf32, #tpu.memory_space<vmem>>, vector<16x128xf32>,
    %cst_45 = arith.constant 0.000000e+00 : f32
    %438 = vector.broadcast %cst_45 : f32 to vector<16x128xf32>
    %439 = vector.extract_strided_slice %21 {offsets = [12, 0], sizes = [1, 128], strides = [1, 1]} : vector<128x128xf32> to vector<1x128xf32>
    %440 = vector.broadcast %439 : vector<1x128xf32> to vector<16x128xf32>
    %441 = arith.mulf %440, %22 : vector<16x128xf32>
    %442 = arith.addf %438, %441 : vector<16x128xf32>
    %443 = vector.extract_strided_slice %21 {offsets = [28, 0], sizes = [1, 128], strides = [1, 1]} : vector<128x128xf32> to vector<1x128xf32>
    %444 = vector.broadcast %443 : vector<1x128xf32> to vector<16x128xf32>
    %445 = arith.mulf %444, %23 : vector<16x128xf32>
    %446 = arith.addf %442, %445 : vector<16x128xf32>
    %447 = vector.extract_strided_slice %21 {offsets = [44, 0], sizes = [1, 128], strides = [1, 1]} : vector<128x128xf32> to vector<1x128xf32>
    %448 = vector.broadcast %447 : vector<1x128xf32> to vector<16x128xf32>
    %449 = arith.mulf %448, %24 : vector<16x128xf32>
    %450 = arith.addf %446, %449 : vector<16x128xf32>
    %451 = vector.extract_strided_slice %21 {offsets = [60, 0], sizes = [1, 128], strides = [1, 1]} : vector<128x128xf32> to vector<1x128xf32>
    %452 = vector.broadcast %451 : vector<1x128xf32> to vector<16x128xf32>
    %453 = arith.mulf %452, %25 : vector<16x128xf32>
    %454 = arith.addf %450, %453 : vector<16x128xf32>
    %455 = vector.extract_strided_slice %21 {offsets = [76, 0], sizes = [1, 128], strides = [1, 1]} : vector<128x128xf32> to vector<1x128xf32>
    %456 = vector.broadcast %455 : vector<1x128xf32> to vector<16x128xf32>
    %457 = arith.mulf %456, %26 : vector<16x128xf32>
    %458 = arith.addf %454, %457 : vector<16x128xf32>
    %459 = vector.extract_strided_slice %21 {offsets = [92, 0], sizes = [1, 128], strides = [1, 1]} : vector<128x128xf32> to vector<1x128xf32>
    %460 = vector.broadcast %459 : vector<1x128xf32> to vector<16x128xf32>
    %461 = arith.mulf %460, %27 : vector<16x128xf32>
    %462 = arith.addf %458, %461 : vector<16x128xf32>
    %463 = vector.extract_strided_slice %21 {offsets = [108, 0], sizes = [1, 128], strides = [1, 1]} : vector<128x128xf32> to vector<1x128xf32>
    %464 = vector.broadcast %463 : vector<1x128xf32> to vector<16x128xf32>
    %465 = arith.mulf %464, %28 : vector<16x128xf32>
    %466 = arith.addf %462, %465 : vector<16x128xf32>
    %467 = vector.extract_strided_slice %21 {offsets = [124, 0], sizes = [1, 128], strides = [1, 1]} : vector<128x128xf32> to vector<1x128xf32>
    %468 = vector.broadcast %467 : vector<1x128xf32> to vector<16x128xf32>
    %469 = arith.mulf %468, %29 : vector<16x128xf32>
    %470 = arith.addf %466, %469 : vector<16x128xf32>
    %c192 = arith.constant 192 : index
    %c0_46 = arith.constant 0 : index
    %471 = vector.load %arg12[%c192, %c0_46] : memref<256x128xf32, #tpu.memory_space<vmem>>, vector<16x128xf32>
    tpu.vector_store %arg12[%c192, %c0_46], %470 {strides = array<i32>} : memref<256x128xf32, #tpu.memory_space<vmem>>, vector<16x128xf32>,
    %cst_47 = arith.constant 0.000000e+00 : f32
    %472 = vector.broadcast %cst_47 : f32 to vector<16x128xf32>
    %473 = vector.extract_strided_slice %21 {offsets = [13, 0], sizes = [1, 128], strides = [1, 1]} : vector<128x128xf32> to vector<1x128xf32>
    %474 = vector.broadcast %473 : vector<1x128xf32> to vector<16x128xf32>
    %475 = arith.mulf %474, %22 : vector<16x128xf32>
    %476 = arith.addf %472, %475 : vector<16x128xf32>
    %477 = vector.extract_strided_slice %21 {offsets = [29, 0], sizes = [1, 128], strides = [1, 1]} : vector<128x128xf32> to vector<1x128xf32>
    %478 = vector.broadcast %477 : vector<1x128xf32> to vector<16x128xf32>
    %479 = arith.mulf %478, %23 : vector<16x128xf32>
    %480 = arith.addf %476, %479 : vector<16x128xf32>
    %481 = vector.extract_strided_slice %21 {offsets = [45, 0], sizes = [1, 128], strides = [1, 1]} : vector<128x128xf32> to vector<1x128xf32>
    %482 = vector.broadcast %481 : vector<1x128xf32> to vector<16x128xf32>
    %483 = arith.mulf %482, %24 : vector<16x128xf32>
    %484 = arith.addf %480, %483 : vector<16x128xf32>
    %485 = vector.extract_strided_slice %21 {offsets = [61, 0], sizes = [1, 128], strides = [1, 1]} : vector<128x128xf32> to vector<1x128xf32>
    %486 = vector.broadcast %485 : vector<1x128xf32> to vector<16x128xf32>
    %487 = arith.mulf %486, %25 : vector<16x128xf32>
    %488 = arith.addf %484, %487 : vector<16x128xf32>
    %489 = vector.extract_strided_slice %21 {offsets = [77, 0], sizes = [1, 128], strides = [1, 1]} : vector<128x128xf32> to vector<1x128xf32>
    %490 = vector.broadcast %489 : vector<1x128xf32> to vector<16x128xf32>
    %491 = arith.mulf %490, %26 : vector<16x128xf32>
    %492 = arith.addf %488, %491 : vector<16x128xf32>
    %493 = vector.extract_strided_slice %21 {offsets = [93, 0], sizes = [1, 128], strides = [1, 1]} : vector<128x128xf32> to vector<1x128xf32>
    %494 = vector.broadcast %493 : vector<1x128xf32> to vector<16x128xf32>
    %495 = arith.mulf %494, %27 : vector<16x128xf32>
    %496 = arith.addf %492, %495 : vector<16x128xf32>
    %497 = vector.extract_strided_slice %21 {offsets = [109, 0], sizes = [1, 128], strides = [1, 1]} : vector<128x128xf32> to vector<1x128xf32>
    %498 = vector.broadcast %497 : vector<1x128xf32> to vector<16x128xf32>
    %499 = arith.mulf %498, %28 : vector<16x128xf32>
    %500 = arith.addf %496, %499 : vector<16x128xf32>
    %501 = vector.extract_strided_slice %21 {offsets = [125, 0], sizes = [1, 128], strides = [1, 1]} : vector<128x128xf32> to vector<1x128xf32>
    %502 = vector.broadcast %501 : vector<1x128xf32> to vector<16x128xf32>
    %503 = arith.mulf %502, %29 : vector<16x128xf32>
    %504 = arith.addf %500, %503 : vector<16x128xf32>
    %c208 = arith.constant 208 : index
    %c0_48 = arith.constant 0 : index
    %505 = vector.load %arg12[%c208, %c0_48] : memref<256x128xf32, #tpu.memory_space<vmem>>, vector<16x128xf32>
    tpu.vector_store %arg12[%c208, %c0_48], %504 {strides = array<i32>} : memref<256x128xf32, #tpu.memory_space<vmem>>, vector<16x128xf32>,
    %cst_49 = arith.constant 0.000000e+00 : f32
    %506 = vector.broadcast %cst_49 : f32 to vector<16x128xf32>
    %507 = vector.extract_strided_slice %21 {offsets = [14, 0], sizes = [1, 128], strides = [1, 1]} : vector<128x128xf32> to vector<1x128xf32>
    %508 = vector.broadcast %507 : vector<1x128xf32> to vector<16x128xf32>
    %509 = arith.mulf %508, %22 : vector<16x128xf32>
    %510 = arith.addf %506, %509 : vector<16x128xf32>
    %511 = vector.extract_strided_slice %21 {offsets = [30, 0], sizes = [1, 128], strides = [1, 1]} : vector<128x128xf32> to vector<1x128xf32>
    %512 = vector.broadcast %511 : vector<1x128xf32> to vector<16x128xf32>
    %513 = arith.mulf %512, %23 : vector<16x128xf32>
    %514 = arith.addf %510, %513 : vector<16x128xf32>
    %515 = vector.extract_strided_slice %21 {offsets = [46, 0], sizes = [1, 128], strides = [1, 1]} : vector<128x128xf32> to vector<1x128xf32>
    %516 = vector.broadcast %515 : vector<1x128xf32> to vector<16x128xf32>
    %517 = arith.mulf %516, %24 : vector<16x128xf32>
    %518 = arith.addf %514, %517 : vector<16x128xf32>
    %519 = vector.extract_strided_slice %21 {offsets = [62, 0], sizes = [1, 128], strides = [1, 1]} : vector<128x128xf32> to vector<1x128xf32>
    %520 = vector.broadcast %519 : vector<1x128xf32> to vector<16x128xf32>
    %521 = arith.mulf %520, %25 : vector<16x128xf32>
    %522 = arith.addf %518, %521 : vector<16x128xf32>
    %523 = vector.extract_strided_slice %21 {offsets = [78, 0], sizes = [1, 128], strides = [1, 1]} : vector<128x128xf32> to vector<1x128xf32>
    %524 = vector.broadcast %523 : vector<1x128xf32> to vector<16x128xf32>
    %525 = arith.mulf %524, %26 : vector<16x128xf32>
    %526 = arith.addf %522, %525 : vector<16x128xf32>
    %527 = vector.extract_strided_slice %21 {offsets = [94, 0], sizes = [1, 128], strides = [1, 1]} : vector<128x128xf32> to vector<1x128xf32>
    %528 = vector.broadcast %527 : vector<1x128xf32> to vector<16x128xf32>
    %529 = arith.mulf %528, %27 : vector<16x128xf32>
    %530 = arith.addf %526, %529 : vector<16x128xf32>
    %531 = vector.extract_strided_slice %21 {offsets = [110, 0], sizes = [1, 128], strides = [1, 1]} : vector<128x128xf32> to vector<1x128xf32>
    %532 = vector.broadcast %531 : vector<1x128xf32> to vector<16x128xf32>
    %533 = arith.mulf %532, %28 : vector<16x128xf32>
    %534 = arith.addf %530, %533 : vector<16x128xf32>
    %535 = vector.extract_strided_slice %21 {offsets = [126, 0], sizes = [1, 128], strides = [1, 1]} : vector<128x128xf32> to vector<1x128xf32>
    %536 = vector.broadcast %535 : vector<1x128xf32> to vector<16x128xf32>
    %537 = arith.mulf %536, %29 : vector<16x128xf32>
    %538 = arith.addf %534, %537 : vector<16x128xf32>
    %c224 = arith.constant 224 : index
    %c0_50 = arith.constant 0 : index
    %539 = vector.load %arg12[%c224, %c0_50] : memref<256x128xf32, #tpu.memory_space<vmem>>, vector<16x128xf32>
    tpu.vector_store %arg12[%c224, %c0_50], %538 {strides = array<i32>} : memref<256x128xf32, #tpu.memory_space<vmem>>, vector<16x128xf32>,
    %cst_51 = arith.constant 0.000000e+00 : f32
    %540 = vector.broadcast %cst_51 : f32 to vector<16x128xf32>
    %541 = vector.extract_strided_slice %21 {offsets = [15, 0], sizes = [1, 128], strides = [1, 1]} : vector<128x128xf32> to vector<1x128xf32>
    %542 = vector.broadcast %541 : vector<1x128xf32> to vector<16x128xf32>
    %543 = arith.mulf %542, %22 : vector<16x128xf32>
    %544 = arith.addf %540, %543 : vector<16x128xf32>
    %545 = vector.extract_strided_slice %21 {offsets = [31, 0], sizes = [1, 128], strides = [1, 1]} : vector<128x128xf32> to vector<1x128xf32>
    %546 = vector.broadcast %545 : vector<1x128xf32> to vector<16x128xf32>
    %547 = arith.mulf %546, %23 : vector<16x128xf32>
    %548 = arith.addf %544, %547 : vector<16x128xf32>
    %549 = vector.extract_strided_slice %21 {offsets = [47, 0], sizes = [1, 128], strides = [1, 1]} : vector<128x128xf32> to vector<1x128xf32>
    %550 = vector.broadcast %549 : vector<1x128xf32> to vector<16x128xf32>
    %551 = arith.mulf %550, %24 : vector<16x128xf32>
    %552 = arith.addf %548, %551 : vector<16x128xf32>
    %553 = vector.extract_strided_slice %21 {offsets = [63, 0], sizes = [1, 128], strides = [1, 1]} : vector<128x128xf32> to vector<1x128xf32>
    %554 = vector.broadcast %553 : vector<1x128xf32> to vector<16x128xf32>
    %555 = arith.mulf %554, %25 : vector<16x128xf32>
    %556 = arith.addf %552, %555 : vector<16x128xf32>
    %557 = vector.extract_strided_slice %21 {offsets = [79, 0], sizes = [1, 128], strides = [1, 1]} : vector<128x128xf32> to vector<1x128xf32>
    %558 = vector.broadcast %557 : vector<1x128xf32> to vector<16x128xf32>
    %559 = arith.mulf %558, %26 : vector<16x128xf32>
    %560 = arith.addf %556, %559 : vector<16x128xf32>
    %561 = vector.extract_strided_slice %21 {offsets = [95, 0], sizes = [1, 128], strides = [1, 1]} : vector<128x128xf32> to vector<1x128xf32>
    %562 = vector.broadcast %561 : vector<1x128xf32> to vector<16x128xf32>
    %563 = arith.mulf %562, %27 : vector<16x128xf32>
    %564 = arith.addf %560, %563 : vector<16x128xf32>
    %565 = vector.extract_strided_slice %21 {offsets = [111, 0], sizes = [1, 128], strides = [1, 1]} : vector<128x128xf32> to vector<1x128xf32>
    %566 = vector.broadcast %565 : vector<1x128xf32> to vector<16x128xf32>
    %567 = arith.mulf %566, %28 : vector<16x128xf32>
    %568 = arith.addf %564, %567 : vector<16x128xf32>
    %569 = vector.extract_strided_slice %21 {offsets = [127, 0], sizes = [1, 128], strides = [1, 1]} : vector<128x128xf32> to vector<1x128xf32>
    %570 = vector.broadcast %569 : vector<1x128xf32> to vector<16x128xf32>
    %571 = arith.mulf %570, %29 : vector<16x128xf32>
    %572 = arith.addf %568, %571 : vector<16x128xf32>
    %c240 = arith.constant 240 : index
    %c0_52 = arith.constant 0 : index
    %573 = vector.load %arg12[%c240, %c0_52] : memref<256x128xf32, #tpu.memory_space<vmem>>, vector<16x128xf32>
    tpu.vector_store %arg12[%c240, %c0_52], %572 {strides = array<i32>} : memref<256x128xf32, #tpu.memory_space<vmem>>, vector<16x128xf32>,
    %c0_53 = arith.constant 0 : index
    %c0_54 = arith.constant 0 : index
    %574 = vector.load %arg9[%c0_53, %c0_54] : memref<32x256xf32, #tpu.memory_space<vmem>>, vector<32x256xf32>
    %c0_55 = arith.constant 0 : index
    %c0_56 = arith.constant 0 : index
    %575 = vector.load %arg12[%c0_55, %c0_56] : memref<256x128xf32, #tpu.memory_space<vmem>>, vector<256x128xf32>
    %cst_57 = arith.constant dense<0.000000e+00> : vector<32x128xf32>
    %576 = tpu.matmul %574, %575, %cst_57 {dimension_numbers = #tpu.dot_dimension_numbers<[1], [0], [0], [1], [0, 0, 1, 1], [], []>} : vector<32x256xf32>, vector<256x128xf32>, vector<32x128xf32> -> vector<32x128xf32>
    %c0_58 = arith.constant 0 : index
    %c0_59 = arith.constant 0 : index
    %577 = vector.load %arg10[%c0_58, %c0_59] : memref<32x1xf32, #tpu.memory_space<vmem>>, vector<32x1xf32>
    %578 = vector.broadcast %577 : vector<32x1xf32> to vector<32x128xf32>
    %579 = arith.addf %576, %578 : vector<32x128xf32>
    %cst_60 = arith.constant 0.000000e+00 : f32
    %580 = vector.broadcast %cst_60 : f32 to vector<32x128xf32>
    %581 = arith.cmpf ogt, %579, %580 : vector<32x128xf32>
    %cst_61 = arith.constant 1.000000e-01 : f32
    %582 = vector.broadcast %cst_61 : f32 to vector<32x128xf32>
    %583 = arith.mulf %582, %579 : vector<32x128xf32>
    %584 = arith.select %581, %579, %583 : vector<32x128xi1>, vector<32x128xf32>
    %c0_62 = arith.constant 0 : index
    %c0_63 = arith.constant 0 : index
    %c0_64 = arith.constant 0 : index
    %585 = vector.load %arg11[%c0_62, %c0_63, %c0_64] : memref<1x32x128xf32, #tpu.memory_space<vmem>>, vector<1x32x128xf32>
    %586 = vector.shape_cast %585 : vector<1x32x128xf32> to vector<32x128xf32>
    %587 = vector.shape_cast %584 : vector<32x128xf32> to vector<1x32x128xf32>
    tpu.vector_store %arg11[%c0_62, %c0_63, %c0_64], %587 {strides = array<i32>} : memref<1x32x128xf32, #tpu.memory_space<vmem>>, vector<1x32x128xf32>,
    return
  }
  func.func @transform_0(%arg0: i32, %arg1: i32) -> (i32, i32, i32) {
    %c0_i32 = arith.constant 0 : i32
    %c0_i32_0 = arith.constant 0 : i32
    return %arg0, %c0_i32, %arg1 : i32, i32, i32
  }
  func.func @transform_1(%arg0: i32, %arg1: i32) -> (i32, i32, i32) {
    %c0_i32 = arith.constant 0 : i32
    %c0_i32_0 = arith.constant 0 : i32
    return %arg0, %c0_i32, %arg1 : i32, i32, i32
  }
  func.func @transform_2(%arg0: i32, %arg1: i32) -> (i32, i32) {
    %c0_i32 = arith.constant 0 : i32
    %c0_i32_0 = arith.constant 0 : i32
    %c0_i32_1 = arith.constant 0 : i32
    return %c0_i32, %c0_i32_0 : i32, i32
  }
  func.func @transform_3(%arg0: i32, %arg1: i32) -> (i32, i32) {
    %c0_i32 = arith.constant 0 : i32
    %c0_i32_0 = arith.constant 0 : i32
    %c0_i32_1 = arith.constant 0 : i32
    return %c0_i32, %c0_i32_0 : i32, i32
  }
  func.func @transform_4(%arg0: i32, %arg1: i32) -> (i32, i32) {
    %c0_i32 = arith.constant 0 : i32
    %c0_i32_0 = arith.constant 0 : i32
    %c0_i32_1 = arith.constant 0 : i32
    return %c0_i32, %c0_i32_0 : i32, i32
  }
  func.func @transform_5(%arg0: i32, %arg1: i32) -> (i32, i32) {
    %c0_i32 = arith.constant 0 : i32
    %c0_i32_0 = arith.constant 0 : i32
    %c0_i32_1 = arith.constant 0 : i32
    return %c0_i32, %c0_i32_0 : i32, i32
  }
  func.func @transform_6(%arg0: i32, %arg1: i32) -> (i32, i32) {
    %c0_i32 = arith.constant 0 : i32
    %c0_i32_0 = arith.constant 0 : i32
    %c0_i32_1 = arith.constant 0 : i32
    return %c0_i32, %c0_i32_0 : i32, i32
  }
  func.func @transform_7(%arg0: i32, %arg1: i32) -> (i32, i32) {
    %c0_i32 = arith.constant 0 : i32
    %c0_i32_0 = arith.constant 0 : i32
    %c0_i32_1 = arith.constant 0 : i32
    return %c0_i32, %c0_i32_0 : i32, i32
  }
  func.func @transform_8(%arg0: i32, %arg1: i32) -> (i32, i32) {
    %c0_i32 = arith.constant 0 : i32
    %c0_i32_0 = arith.constant 0 : i32
    %c0_i32_1 = arith.constant 0 : i32
    return %c0_i32, %c0_i32_0 : i32, i32
  }
  func.func @transform_9(%arg0: i32, %arg1: i32) -> (i32, i32, i32) {
    %c0_i32 = arith.constant 0 : i32
    %c0_i32_0 = arith.constant 0 : i32
    return %arg0, %c0_i32, %arg1 : i32, i32, i32
  }
}

</mosaic_0001>

<bundles_post_ra>
// kernel: tpu_custom_call.1
= control target key start
LH: loop header
LB: loop body
LE: loop exit
PB: predicated region body
PF: predicated region fallthrough
CT: control target
= control target key end

     0   :  { %s4735_s0 = inlined_call_operand.hbm [shape: f32[2,32,256], index: 0, kind: input, shape index: {}]   ;;  %s4736_s1 = inlined_call_operand.vmem [shape: f32[2,128,256], index: 1, kind: input, shape index: {}]   ;;  %s4737_s2 = inlined_call_operand.vmem [shape: f32[64,32], index: 2, kind: input, shape index: {}]   ;;  %s4738_s3 = inlined_call_operand.hbm [shape: f32[64,64], index: 3, kind: input, shape index: {}]   ;;  %s4739_s4 = inlined_call_operand.vmem [shape: f32[64,1], index: 4, kind: input, shape index: {}]   ;;  %s4740_s5 = inlined_call_operand.vmem [shape: f32[128,64], index: 5, kind: input, shape index: {}]   ;;  %s4741_s6 = inlined_call_operand.vmem [shape: f32[128,1], index: 6, kind: input, shape index: {}]   ;;  %s4742_s7 = inlined_call_operand.hbm [shape: f32[32,256], index: 7, kind: input, shape index: {}]   ;;  %s4743_s8 = inlined_call_operand.vmem [shape: f32[32,1], index: 8, kind: input, shape index: {}]   ;;  %s4744_s9 = inlined_call_operand.hbm [shape: f32[2,32,256], index: 9, kind: output, shape index: {}]  }
   0x1   :  { %4850 = sst [smem:[#allocation112_spill]] %s4740_s5 }
   0x2   :  { %4851 = sst [smem:[#allocation113_spill]] %s4744_s9 }
   0x3   :  { %14 = vsyncpa [#allocation4], 0 }
   0x4   :  { %16 = vsyncpa [#allocation4 + $0x1], 0 }
   0x5   :  { %17 = vsyncpa [#allocation8], 0 }
   0x6   :  { %18 = vsyncpa [#allocation5], 0 }
   0x7   :  { %20 = vsyncpa [#allocation5 + $0x1], 0  ;;  %s3253_s30 = smov 0   ;;  %s3255_s10 = smov 0  }
   0x8   :  { %s3257_s11 = smov 0   ;;  %s3259_s12 = smov 0  }
   0x9   :  { %s3261_s13 = smov 0   ;;  %s3263_s14 = smov 0  }
   0xa   :  { %s3265_s15 = smov 0   ;;  %s3267_s16 = smov 0  }
   0xb LB: > { %4852 = sst [smem:[#allocation14_spill]] %s3158_s30  ;;  %s2559_s17 = sadd.s32 4294967295, %s3186_s16   ;;  %s3186_s16 = sphi %s3267_s16, %s26_s16   ;;  %s3182_s15 = sphi %s3265_s15, %s5069_s15   ;;  %s3178_s14 = sphi %s3263_s14, %s5068_s14   ;;  %s3174_s13 = sphi %s3261_s13, %s5067_s13   ;;  %s3170_s12 = sphi %s3259_s12, %s5066_s12   ;;  %s3166_s11 = sphi %s3257_s11, %s5065_s11   ;;  %s3162_s10 = sphi %s3255_s10, %s5064_s10   ;;  %s3158_s30 = sphi %s3253_s30, %s5063_s30  }
   0xc   : > { %4853 = sst [smem:[#allocation15_spill]] %s3170_s12  ;;  %s2560_s18 = sadd.s32 4294967294, %s3186_s16  }
   0xd   : > { %4854 = sst [smem:[#allocation16_spill]] %s3174_s13  ;;  %s35_s19 = sadd.s32 1, %s3178_s14 }
   0xe   : > { %s38_s20 = sadd.s32 1, %s3182_s15  ;;  %p36_p0 = scmp.ge.s32.totalorder %s35_s19, 2 }
   0xf   : > { %s47_s21 = sadd.s32 1, %s3166_s11  ;;  %p54_p1 = scmp.ne.s32.totalorder %s3166_s11, %s3162_s10 }
  0x10   : > { %p55_p2 = scmp.eq.s32.totalorder %s3186_s16, 0  ;;  %s5071_s19 = smov (%p36_p0, %s35_s19), 0 }
  0x11   : > { %4855 = sst [smem:[#allocation17_spill]] %s5071_s19  ;;  %s5073_s20 = smov (!%p36_p0, %s38_s20), %s3182_s15 }
  0x12   : > { %s43_s22 = ssub.s32 %s3178_s14, %s5071_s19  ;;  %p3306_p3 = por %p55_p2, %p54_p1 }
  0x13   : > { %p40_p4 = scmp.ge.s32.totalorder %s5073_s20, 2  ;;  %p60_p5 = scmp.ne.s32.totalorder %s3162_s10, %s3158_s30 }
  0x14   : > { %s4856_s23 = scalar_select %p3306_p3, 1, 0 }
  0x15   : > { %p3312_p6 = scmp.eq.s32.totalorder %s2559_s17, 0  ;;  %p261_p7 = scmp.eq.s32.totalorder %s2559_s17, 3 }
  0x16   : > { %s5075_s20 = smov (%p40_p4, %s5073_s20), 0  ;;  %p267_p10 = scmp.eq.s32.totalorder %s2560_s18, 3 }
  0x17   : > { %s4857_s24 = scalar_select %p3312_p6, 1, 0 }
  0x18   : > { %4858 = sst [smem:[#allocation18_spill]] %s5075_s20  ;;  %p3320_p8 = por %p3312_p6, %p60_p5 }
  0x19   : > { %p3324_p9 = por %p261_p7, %p54_p1  ;;  %s42_s27 = ssub.s32 %s3182_s15, %s5075_s20 }
  0x1a   : > { %s4859_s25 = scalar_select %p3320_p8, 1, 0 }
  0x1b   : > { %s4860_s26 = scalar_select %p3324_p9, 1, 0 }
  0x1c   : > { %s44_s28 = sor.u32 %s43_s22, %s42_s27  ;;  %p2561_p11 = scmp.ge.s32.totalorder %s3186_s16, 1 }
  0x1d   : > { %4861 = sst [smem:[#allocation19_spill]] %s4860_s26  ;;  %p45_p12 = scmp.eq.s32.totalorder %s44_s28, 0 }
  0x1e   : > { %p3331_p13 = por %p267_p10, %p60_p5  ;;  %p274_p0 = scmp.lt.s32.totalorder %s3186_s16, 5 }
  0x1f   : > { %s3337_s17 = scalar_select %p45_p12, %s3166_s11, %s47_s21  }
  0x20   : > { %s4862_s29 = scalar_select %p3331_p13, 1, 0 }
  0x21   : > { %4864 = sst [smem:[#allocation21_spill]] %s3337_s17  ;;  %p3339_p2 = pnand %p2561_p11, %p274_p0 }
  0x22   : > { %4863 = sst [smem:[#allocation20_spill]] %s4862_s29  ;;  %s3188_s30 = smov [#allocation7]  }
  0x23   : > { %s4865_s19 = scalar_select %p3339_p2, 1, 0 }
  0x24   : > { %s289_s9 = sshll.u32 %s3188_s30, 4  ;;  %p2898_p1 = pneg %p3339_p2  ;;  %s290_s9 = int_to_ptr.vmem [resolvable:$true] %s289_s9 }
  0x25   : > { %s3189_s22 = smov [#allocation9]   ;;  %s3000_s20 = scalar_lea.hbm %s4738_s3, 1024 }
  0x26   : > { %p3347_p4 = pnand %p2898_p1, %p3312_p6  ;;  %s311_s21 = sshll.u32 %s3189_s22, 4  ;;  %s3351_s21 = int_to_ptr.vmem [resolvable:$true] %s311_s21 }
  0x27   : > { %p3001_p5 = scmp.ne.s32.totalorder %s4738_s3, %s3000_s20  ;;  %p3007_p12 = scmp.lt.u32.totalorder %s3000_s20, %s4738_s3 }
  0x28   : > { %p3002_p7 = pneg %p3347_p4 }
  0x2a   : > { %p3003_p10 = pnand %p3002_p7, %p3001_p5 }
  0x2c   : > { %p3004_p11 = pneg %p3003_p10 }
  0x2e   : > { %p3009_p0 = pnand %p3007_p12, %p3004_p11 }
  0x30   : > { %3012 = shalt.err (!%p3009_p0)
}
  0x31   : > { %s3013_s22 = scalar_lea.vmem %s290_s9, 1024  ;;  %p3021_p6 = scmp.lt.s32.totalorder %s290_s9, %s290_s9 }
  0x32   : > { %p3014_p1 = scmp.ne.s32.totalorder %s290_s9, %s3013_s22  ;;  %p3022_p8 = scmp.lt.s32.totalorder %s3013_s22, %s3013_s22 }
  0x34   : > { %p3016_p13 = pnand %p3014_p1, %p3002_p7  ;;  %p3023_p2 = por %p3022_p8, %p3021_p6 }
  0x36   : > { %p3017_p9 = pneg %p3016_p13 }
  0x38   : > { %p3024_p3 = pnand %p3023_p2, %p3017_p9 }
  0x3a   : > { %3027 = shalt.err (!%p3024_p3)
}
  0x3b   : > { %s3190_s17 = smov 128   ;;  %s3191_s27 = smov 8  }
  0x3c   : > { %2901 = dma.hbm_to_vmem [thread:$0]  (!%p3347_p4), %s4738_s3, 1024, %s290_s9, [#allocation8], %s3190_s17, %s3190_s17, %s3191_s27  }
  0x3d   : > { %s3028_s30 = scalar_lea.hbm %s4742_s7, 1024 }
  0x3e   : > { %p3029_p13 = scmp.ne.s32.totalorder %s4742_s7, %s3028_s30  ;;  %p3035_p8 = scmp.lt.u32.totalorder %s3028_s30, %s4742_s7 }
  0x40   : > { %p3031_p3 = pnand %p3029_p13, %p3002_p7 }
  0x42   : > { %p3032_p6 = pneg %p3031_p3 }
  0x44   : > { %p3037_p9 = pnand %p3035_p8, %p3032_p6 }
  0x46   : > { %3040 = shalt.err (!%p3037_p9)
}
  0x47   : > { %s3041_s9 = scalar_lea.vmem %s3351_s21, 1024  ;;  %p3049_p11 = scmp.lt.s32.totalorder %s3351_s21, %s3351_s21 }
  0x48   : > { %p3042_p2 = scmp.ne.s32.totalorder %s3351_s21, %s3041_s9  ;;  %p3050_p12 = scmp.lt.s32.totalorder %s3041_s9, %s3041_s9 }
  0x4a   : > { %p3044_p5 = pnand %p3042_p2, %p3002_p7  ;;  %p3051_p0 = por %p3050_p12, %p3049_p11 }
  0x4c   : > { %p3045_p10 = pneg %p3044_p5 }
  0x4e   : > { %p3052_p1 = pnand %p3051_p0, %p3045_p10 }
  0x50   : > { %3055 = shalt.err (!%p3052_p1)
}
  0x51   : > { %s3192_s5 = smov 256   ;;  %s3193_s12 = smov 16  }
  0x52   : > { %2904 = dma.hbm_to_vmem [thread:$0]  (!%p3347_p4), %s4742_s7, 1024, %s3351_s21, [#allocation8], %s3192_s5, %s3192_s5, %s3193_s12  }
  0x53   : > { %p2564_p13 = scmp.ge.s32.totalorder %s3186_s16, 4 }
  0x54   : > { %s3402_s27 = sand.u32 (!%p2564_p13), 1, %s3166_s11   ;;  %s2566_s20 = sshll.u32 (!%p2564_p13), %s3182_s15, 3 }
  0x55   : > { %324 = sbr.rel (%p2564_p13) target bundleno = 126 (0x7e), region = 44  ;;  %s2565_s26 = sshll.u32 (!%p2564_p13), %s3402_s27, 5 }
  0x56   : > { %s337_s29 = sadd.s32 (!%p2564_p13), %s3178_s14, %s2566_s20  ;;  %s332_s18 = scalar_lea.vmem (!%p2564_p13), [#allocation3], %s2565_s26 }
  0x57   : > { %s2567_s28 = sshll.u32 (!%p2564_p13), %s337_s29, 7  ;;  %s340_s30 = sshll.u32 (!%p2564_p13), %s332_s18, 4  ;;  %s3412_s30 = int_to_ptr.vmem [resolvable:$true] %s340_s30 }
  0x58   : > { %s3410_s21 = scalar_lea.hbm (!%p2564_p13), %s4735_s0, %s2567_s28  ;;  %s329_s5 = scalar_lea.sflag (!%p2564_p13), [#allocation4], %s3402_s27 }
  0x59   : > { %s3056_s12 = scalar_lea.hbm (!%p2564_p13), %s3410_s21, 512  ;;  %p4867_p7 = scmp.ne.s32.totalorder (!%p2564_p13), %s4856_s23, 0 }
  0x5a   : > { %p3057_p4 = scmp.ne.s32.totalorder (!%p2564_p13), %s3410_s21, %s3056_s12  ;;  %s3060_s20 = scalar_lea.hbm (!%p2564_p13), %s4735_s0, 2048 }
  0x5b   : > { %p3061_p8 = scmp.lt.u32.totalorder (!%p2564_p13), %s3410_s21, %s4735_s0  ;;  %p3062_p9 = scmp.lt.u32.totalorder (!%p2564_p13), %s3060_s20, %s3056_s12 }
  0x5c   : > { %p3058_p3 = pnand %p3057_p4, %p4867_p7  ;;  %p3064_p5 = scmp.lt.u32.totalorder %s3056_s12, %s3410_s21 }
  0x5d   : > { %p3063_p2 = por %p3062_p9, %p3061_p8 }
  0x5e   : > { %p3059_p6 = pneg %p3058_p3 }
  0x5f   : > { %p3065_p10 = por %p3064_p5, %p3063_p2 }
  0x61   : > { %p3066_p11 = pnand %p3065_p10, %p3059_p6 }
  0x63   : > { %3069 = shalt.err (!%p3066_p11)
}
  0x64   : > { %s3070_s28 = scalar_lea.vmem %s3412_s30, 512  ;;  %s3194_s18 = smov [#allocation3]  }
  0x65   : > { %p3071_p12 = scmp.ne.s32.totalorder %s3412_s30, %s3070_s28  ;;  %s3074_s22 = sshll.u32 %s3194_s18, 4  ;;  %s3075_s22 = int_to_ptr.vmem [resolvable:$false] %s3074_s22 }
  0x66   : > { %s3076_s9 = scalar_lea.vmem %s3075_s22, 1024  ;;  %p3077_p13 = scmp.lt.s32.totalorder %s3412_s30, %s3075_s22 }
  0x67   : > { %p3072_p0 = pnand %p3071_p12, %p4867_p7  ;;  %p3078_p4 = scmp.lt.s32.totalorder %s3076_s9, %s3070_s28 }
  0x69   : > { %p3073_p1 = pneg %p3072_p0  ;;  %p3079_p3 = por %p3078_p4, %p3077_p13 }
  0x6b   : > { %p3080_p8 = pnand %p3079_p3, %p3073_p1 }
  0x6d   : > { %3083 = shalt.err (!%p3080_p8)
}
  0x6e   : > { %s3195_s12 = smov 256   ;;  %s3196_s13 = smov 128  }
  0x6f   : > { %s3197_s17 = smov 8   ;;  %349 = sbr.rel (!%p4867_p7) target bundleno = 126 (0x7e), region = 52 }
  0x70   : > { %2890 = dma.hbm_to_vmem [thread:$0]  (%p4867_p7), %s3410_s21, 512, %s3412_s30, %s329_s5, %s3195_s12, %s3196_s13, %s3197_s17  }
  0x71   : > { %s2568_s20 = sshll.u32 (%p4867_p7), %s3402_s27, 7  ;;  %s2569_s26 = sshll.u32 (%p4867_p7), %s3182_s15, 5 }
  0x72   : > { %s355_s29 = sadd.s32 (%p4867_p7), %s3178_s14, %s2569_s26  ;;  %s353_s23 = scalar_lea.vmem (%p4867_p7), [#allocation6], %s2568_s20 }
  0x73   : > { %s2570_s28 = sshll.u32 (%p4867_p7), %s355_s29, 3 }
  0x74   : > { %s3446_s9 = scalar_lea.vmem (%p4867_p7), %s4736_s1, %s2570_s28 }
  0x75   : > { %v415_v0 = vld [vmem:[%s3446_s9] sm:$0xff] (%p4867_p7)  ;;  %v417_v1 = vld [vmem:[%s3446_s9 + $0x10] sm:$0xff] (%p4867_p7) }
  0x76   : > { %v419_v2 = vld [vmem:[%s3446_s9 + $0x20] sm:$0xff]  ;;  %416 = vst [vmem:[%s353_s23] sm:$0xff] %v415_v0  ;;  %418 = vst [vmem:[%s353_s23 + $0x8] sm:$0xff] %v417_v1  ;;  %v421_v3 = vld [vmem:[%s3446_s9 + $0x30] sm:$0xff] }
  0x77   : > { %420 = vst [vmem:[%s353_s23 + $0x10] sm:$0xff] %v419_v2  ;;  %v423_v4 = vld [vmem:[%s3446_s9 + $0x40] sm:$0xff]  ;;  %v425_v5 = vld [vmem:[%s3446_s9 + $0x50] sm:$0xff]  ;;  %422 = vst [vmem:[%s353_s23 + $0x18] sm:$0xff] %v421_v3 }
  0x78   : > { %424 = vst [vmem:[%s353_s23 + $0x20] sm:$0xff] %v423_v4  ;;  %426 = vst [vmem:[%s353_s23 + $0x28] sm:$0xff] %v425_v5  ;;  %v427_v6 = vld [vmem:[%s3446_s9 + $0x60] sm:$0xff]  ;;  %v429_v7 = vld [vmem:[%s3446_s9 + $0x70] sm:$0xff] }
  0x79   : > { %v431_v8 = vld [vmem:[%s3446_s9 + $0x80] sm:$0xff]  ;;  %428 = vst [vmem:[%s353_s23 + $0x30] sm:$0xff] %v427_v6  ;;  %430 = vst [vmem:[%s353_s23 + $0x38] sm:$0xff] %v429_v7  ;;  %v433_v9 = vld [vmem:[%s3446_s9 + $0x90] sm:$0xff] }
  0x7a   : > { %432 = vst [vmem:[%s353_s23 + $0x40] sm:$0xff] %v431_v8  ;;  %v435_v10 = vld [vmem:[%s3446_s9 + $0xa0] sm:$0xff]  ;;  %v437_v11 = vld [vmem:[%s3446_s9 + $0xb0] sm:$0xff]  ;;  %434 = vst [vmem:[%s353_s23 + $0x48] sm:$0xff] %v433_v9 }
  0x7b   : > { %436 = vst [vmem:[%s353_s23 + $0x50] sm:$0xff] %v435_v10  ;;  %438 = vst [vmem:[%s353_s23 + $0x58] sm:$0xff] %v437_v11  ;;  %v439_v12 = vld [vmem:[%s3446_s9 + $0xc0] sm:$0xff]  ;;  %v441_v13 = vld [vmem:[%s3446_s9 + $0xd0] sm:$0xff] }
  0x7c   : > { %v443_v14 = vld [vmem:[%s3446_s9 + $0xe0] sm:$0xff]  ;;  %440 = vst [vmem:[%s353_s23 + $0x60] sm:$0xff] %v439_v12  ;;  %442 = vst [vmem:[%s353_s23 + $0x68] sm:$0xff] %v441_v13  ;;  %v445_v15 = vld [vmem:[%s3446_s9 + $0xf0] sm:$0xff] }
  0x7d   : > { %444 = vst [vmem:[%s353_s23 + $0x70] sm:$0xff] %v443_v14  ;;  %446 = vst [vmem:[%s353_s23 + $0x78] sm:$0xff] %v445_v15 }
  0x7e PF: > { %p4868_p7 = scmp.ne.s32.totalorder %s4865_s19, 0 }
  0x80   : > { %455 = sbr.rel (%p4868_p7) target bundleno = 1228 (0x4cc), region = 90 }
  0x87   : > { %s3467_s27 = sand.u32 1, %s3162_s10   ;;  %p4869_p6 = scmp.ne.s32.totalorder %s4859_s25, 0 }
  0x88   : > { %s2572_s30 = sshll.u32 %s3467_s27, 5  ;;  %s458_s21 = scalar_lea.sflag [#allocation4], %s3467_s27 }
  0x89   : > { %s461_s5 = scalar_lea.vmem [#allocation3], %s2572_s30 }
  0x8a   : > { %3145 = dma.done.wait (%p4869_p6), %s458_s21, 512  }
  0x8b   : > { %3147 = vsyncadd (%p4869_p6), %s458_s21, 4294966784  ;;  %s2573_s19 = sshll.u32 %s3467_s27, 7  ;;  %p4870_p9 = scmp.ne.s32.totalorder %s4857_s24, 0 }
  0x8c   : > { %s3478_s12 = scalar_lea.vmem [#allocation6], %s2573_s19 }
  0x8d   : > { %3149 = dma.done.wait (%p4870_p9), [#allocation8], 2048  }
  0x8e   : > { %3151 = vsyncadd (%p4870_p9), [#allocation8], 4294965248  ;;  %vm527_vm0 = vcmask 261120   ;;  %v515_v16 = vld [vmem:[%s461_s5] sm:$0xff]  ;;  %v516_v17 = vld [vmem:[%s461_s5 + $0x8] sm:$0xff]  ;;  %vm721_vm1 = vcmask 523264  }
  0x8f   : > { %v517_v18 = vld [vmem:[%s461_s5 + $0x10] sm:$0xff]  ;;  %v2798_v19 = vpack.c.bf16 %v516_v17, %v515_v16  ;;  %v518_v20 = vld [vmem:[%s461_s5 + $0x18] sm:$0xff]  ;;  %v519_v21 = vld [vmem:[%s4737_s2] sm:$0xff]  ;;  %v3198_v33 = vmov 0   ;;  %s4871_s19 = sld [smem:[#allocation112_spill]]  ;;  %s5053_s25 = sld [smem:[#allocation15_spill]] }
  0x90   : > { %v2802_v22 = vpack.c.bf16 %v518_v20, %v517_v18  ;;  %2718 = vmatprep.mubr.msk.f32.mxu0 %vm527_vm0, %v519_v21  ;;  %v520_v23 = vld [vmem:[%s4737_s2 + $0x8] sm:$0xff]  ;;  %v521_v24 = vld [vmem:[%s4737_s2 + $0x10] sm:$0xff]  ;;  %v522_v25 = vld [vmem:[%s4737_s2 + $0x18] sm:$0xff]  ;;  %2991 = vset.pattern.permute.xlu0 %v3198_v33  ;;  %s514_s20 = scalar_lea.vmem [#allocation10], %s2572_s30  ;;  %s5054_s28 = sld [smem:[#allocation19_spill]] }
  0x91   : > { %2799 = vmatprep.subr.bf16.mxu0 %v2798_v19  ;;  %v523_v26 = vld [vmem:[%s4737_s2 + $0x20] sm:$0xff]  ;;  %v524_v27 = vld [vmem:[%s4737_s2 + $0x28] sm:$0xff]  ;;  %v525_v28 = vld [vmem:[%s4737_s2 + $0x30] sm:$0xff]  ;;  %2992 = vset.pattern.permute.xlu1 %v3198_v33  ;;  %s2432_s29 = sshll.u32 %s514_s20, 4  ;;  %s5055_s9 = sld [smem:[#allocation113_spill]]  ;;  %s4676_s29 = int_to_ptr.vmem [resolvable:$true] %s2432_s29 }
  0x92   : > { %2801 = vmatpush3.bf16.msra.mxu0 %v2798_v19  ;;  %v526_v29 = vld [vmem:[%s4737_s2 + $0x38] sm:$0xff]  ;;  %v665_v30 = vld [vmem:[#allocation7] sm:$0xff]  ;;  %v675_v32 = vld [vmem:[%s4739_s4 + $0x10] sm:$0xff]  ;;  %s2418_s21 = scalar_lea.sflag [#allocation5], %s3467_s27  ;;  %s3084_s5 = scalar_lea.vmem %s4676_s29, 512 }
  0x93   : > { %2803 = vmatprep.subr.bf16.mxu0 %v2802_v22  ;;  %2746 = vmatprep.mubr.msk.f32.mxu1 %vm721_vm1, %v665_v30  ;;  %v673_v31 = vld [vmem:[%s4739_s4] sm:$0xff]  ;;  %v674_v34 = vld [vmem:[%s4739_s4 + $0x8] sm:$0xff]  ;;  %v676_v35 = vld [vmem:[%s4739_s4 + $0x18] sm:$0xff]  ;;  %p3085_p2 = scmp.ne.s32.totalorder %s4676_s29, %s3084_s5  ;;  %s3199_s13 = smov [#allocation10]  }
  0x94   : > { %683 = vperm.xlu0 %2991, %v673_v31   ;;  %693 = vperm.xlu1 %2992, %v675_v32   ;;  %v677_v36 = vld [vmem:[%s4739_s4 + $0x20] sm:$0xff]  ;;  %v678_v37 = vld [vmem:[%s4739_s4 + $0x28] sm:$0xff]  ;;  %v679_v38 = vld [vmem:[%s4739_s4 + $0x30] sm:$0xff]  ;;  %s3088_s17 = sshll.u32 %s3199_s13, 4  ;;  %s3089_s17 = int_to_ptr.vmem [resolvable:$false] %s3088_s17 }
  0x95   : > { %v680_v39 = vld [vmem:[%s4739_s4 + $0x38] sm:$0xff]  ;;  %v875_v40 = vld [vmem:[%s4741_s6] sm:$0xff]  ;;  %v876_v41 = vld [vmem:[%s4741_s6 + $0x8] sm:$0xff]  ;;  %p3091_p12 = scmp.lt.s32.totalorder %s4676_s29, %s3089_s17 }
  0x96   : > { %2805 = vmatpush3.bf16.msra.mxu0 %v2802_v22  ;;  %v877_v42 = vld [vmem:[%s4741_s6 + $0x10] sm:$0xff]  ;;  %v878_v43 = vld [vmem:[%s4741_s6 + $0x18] sm:$0xff]  ;;  %v879_v44 = vld [vmem:[%s4741_s6 + $0x20] sm:$0xff]  ;;  %p5056_p5 = scmp.ne.s32.totalorder %s5054_s28, 0 }
  0x97   : > { %v880_v45 = vld [vmem:[%s4741_s6 + $0x28] sm:$0xff]  ;;  %v881_v46 = vld [vmem:[%s4741_s6 + $0x30] sm:$0xff]  ;;  %v882_v47 = vld [vmem:[%s4741_s6 + $0x38] sm:$0xff] }
  0x98   : > { %688 = vperm.xlu0 %2991, %v674_v34   ;;  %698 = vperm.xlu1 %2992, %v676_v35   ;;  %v883_v48 = vld [vmem:[%s4741_s6 + $0x40] sm:$0xff]  ;;  %v884_v49 = vld [vmem:[%s4741_s6 + $0x48] sm:$0xff]  ;;  %v885_v50 = vld [vmem:[%s4741_s6 + $0x50] sm:$0xff]  ;;  %p3086_p10 = pnand %p3085_p2, %p5056_p5 }
  0x99   : > { %2719 = vmatmul.mubr.msk.f32.vlgmr.msra.gmra.mrb[0].mxu0 %vm527_vm0, %v520_v23  ;;  %v886_v51 = vld [vmem:[%s4741_s6 + $0x58] sm:$0xff]  ;;  %v887_v52 = vld [vmem:[%s4741_s6 + $0x60] sm:$0xff]  ;;  %v888_v53 = vld [vmem:[%s4741_s6 + $0x68] sm:$0xff] }
  0x9a   : > { %2721 = vmatprep.mubr.msk.f32.mxu0 %vm527_vm0, %v521_v24  ;;  %v889_v54 = vld [vmem:[%s4741_s6 + $0x70] sm:$0xff]  ;;  %v890_v55 = vld [vmem:[%s4741_s6 + $0x78] sm:$0xff]  ;;  %v2292_v56 = vld [vmem:[%s4743_s8] sm:$0xff]  ;;  %p3087_p11 = pneg %p3086_p10 }
  0x9b   : > { %v2293_v57 = vld [vmem:[%s4743_s8 + $0x8] sm:$0xff]  ;;  %v2294_v58 = vld [vmem:[%s4743_s8 + $0x10] sm:$0xff]  ;;  %v2295_v59 = vld [vmem:[%s4743_s8 + $0x18] sm:$0xff] }
  0x9c   : > { %703 = vperm.xlu0 %2991, %v677_v36   ;;  %708 = vperm.xlu1 %2992, %v678_v37   ;;  %v666_v16 = vld [vmem:[#allocation7 + $0x8] sm:$0xff]  ;;  %v667_v17 = vld [vmem:[#allocation7 + $0x10] sm:$0xff]  ;;  %v668_v18 = vld [vmem:[#allocation7 + $0x18] sm:$0xff] }
  0x9d   : > { %2722 = vmatmul.mubr.msk.f32.gmra.mrb[2].mxu0 %vm527_vm0, %v522_v25  ;;  %v669_v19 = vld [vmem:[#allocation7 + $0x20] sm:$0xff]  ;;  %v670_v20 = vld [vmem:[#allocation7 + $0x28] sm:$0xff]  ;;  %v671_v21 = vld [vmem:[#allocation7 + $0x30] sm:$0xff] }
  0x9e   : > { %2724 = vmatprep.mubr.msk.f32.mxu0 %vm527_vm0, %v523_v26  ;;  %v672_v22 = vld [vmem:[#allocation7 + $0x38] sm:$0xff]  ;;  %v859_v23 = vld [vmem:[%s4871_s19] sm:$0xff] }
  0xa0   : > { %713 = vperm.xlu0 %2991, %v679_v38   ;;  %718 = vperm.xlu1 %2992, %v680_v39  }
  0xa1   : > { %2725 = vmatmul.mubr.msk.f32.gmra.mrb[4].mxu0 %vm527_vm0, %v524_v27 }
  0xa2   : > { %2727 = vmatprep.mubr.msk.f32.mxu0 %vm527_vm0, %v525_v28 }
  0xa4   : > { %893 = vperm.xlu0 %2991, %v875_v40   ;;  %898 = vperm.xlu1 %2992, %v876_v41  }
  0xa5   : > { %2728 = vmatmul.mubr.msk.f32.gmra.mrb[6].mxu0 %vm527_vm0, %v526_v29 }
  0xa6   : > { %2774 = vmatprep.mubr.msk.f32.mxu0 %vm721_vm1, %v859_v23  ;;  %v3701_v23 = vld [vmem:[%s3478_s12 + $0x30] sm:$0xff] }
  0xa8   : > { %903 = vperm.xlu0 %2991, %v877_v42   ;;  %908 = vperm.xlu1 %2992, %v878_v43  }
  0xac   : > { %913 = vperm.xlu0 %2991, %v879_v44   ;;  %918 = vperm.xlu1 %2992, %v880_v45  }
  0xb0   : > { %923 = vperm.xlu0 %2991, %v881_v46   ;;  %928 = vperm.xlu1 %2992, %v882_v47  }
  0xb4   : > { %933 = vperm.xlu0 %2991, %v883_v48   ;;  %938 = vperm.xlu1 %2992, %v884_v49  }
  0xb8   : > { %943 = vperm.xlu0 %2991, %v885_v50   ;;  %948 = vperm.xlu1 %2992, %v886_v51  }
  0xbc   : > { %953 = vperm.xlu0 %2991, %v887_v52   ;;  %958 = vperm.xlu1 %2992, %v888_v53  }
  0xc0   : > { %963 = vperm.xlu0 %2991, %v889_v54   ;;  %968 = vperm.xlu1 %2992, %v890_v55  }
  0xc4   : > { %2298 = vperm.xlu0 %2991, %v2292_v56   ;;  %2303 = vperm.xlu1 %2992, %v2293_v57  }
  0xc8   : > { %2308 = vperm.xlu0 %2991, %v2294_v58   ;;  %2313 = vperm.xlu1 %2992, %v2295_v59  }
 0x113   : > { %v684_v24 = vpop.permute.xlu0 %683  ;;  %v694_v25 = vpop.permute.xlu1 %693 }
 0x117   : > { %v689_v26 = vpop.permute.xlu0 %688  ;;  %v699_v27 = vpop.permute.xlu1 %698 }
 0x11b   : > { %v709_v37 = vpop.permute.xlu1 %708  ;;  %v704_v40 = vpop.permute.xlu0 %703 }
 0x11f   : > { %v719_v49 = vpop.permute.xlu1 %718  ;;  %v714_v52 = vpop.permute.xlu0 %713 }
 0x16c   : > { %v2720_v60 = vpop.f32.mrb[0].mxu0 }
 0x16d   : > { %v658_v61 = vmax.f32 %v2720_v60, 0.0  ;;  %v618_v62 = vpop.f32.mrb[1].mxu0  ;;  %v860_v60 = vld [vmem:[%s4871_s19 + $0x8] sm:$0xff] }
 0x16e   : > { %v657_v63 = vmax.f32 %v618_v62, 0.0  ;;  %v862_v62 = vld [vmem:[%s4871_s19 + $0x18] sm:$0xff] }
 0x170   : > { %v2723_v0 = vpop.f32.mrb[2].mxu0  ;;  %v2806_v1 = vpack.c.bf16 %v658_v61, %v657_v63  ;;  %v861_v61 = vld [vmem:[%s4871_s19 + $0x10] sm:$0xff]  ;;  %v863_v63 = vld [vmem:[%s4871_s19 + $0x20] sm:$0xff] }
 0x171   : > { %v660_v2 = vmax.f32 %v2723_v0, 0.0  ;;  %v628_v3 = vpop.f32.mrb[3].mxu0  ;;  %v864_v0 = vld [vmem:[%s4871_s19 + $0x28] sm:$0xff] }
 0x172   : > { %v659_v4 = vmax.f32 %v628_v3, 0.0  ;;  %2807 = vmatprep.subr.bf16.mxu1 %v2806_v1  ;;  %v867_v3 = vld [vmem:[%s4871_s19 + $0x40] sm:$0xff] }
 0x173   : > { %2809 = vmatpush3.bf16.msra.mxu1 %v2806_v1  ;;  %v865_v1 = vld [vmem:[%s4871_s19 + $0x30] sm:$0xff] }
 0x174   : > { %v2810_v5 = vpack.c.bf16 %v660_v2, %v659_v4  ;;  %v2726_v6 = vpop.f32.mrb[4].mxu0  ;;  %v866_v2 = vld [vmem:[%s4871_s19 + $0x38] sm:$0xff]  ;;  %v868_v4 = vld [vmem:[%s4871_s19 + $0x48] sm:$0xff] }
 0x175   : > { %v662_v7 = vmax.f32 %v2726_v6, 0.0  ;;  %v638_v8 = vpop.f32.mrb[5].mxu0  ;;  %v870_v6 = vld [vmem:[%s4871_s19 + $0x58] sm:$0xff] }
 0x176   : > { %v661_v9 = vmax.f32 %v638_v8, 0.0  ;;  %2811 = vmatprep.subr.bf16.mxu1 %v2810_v5  ;;  %v872_v8 = vld [vmem:[%s4871_s19 + $0x68] sm:$0xff] }
 0x177   : > { %2813 = vmatpush3.bf16.msra.mxu1 %v2810_v5  ;;  %v869_v5 = vld [vmem:[%s4871_s19 + $0x50] sm:$0xff] }
 0x178   : > { %v2814_v10 = vpack.c.bf16 %v662_v7, %v661_v9  ;;  %v2729_v11 = vpop.f32.mrb[6].mxu0  ;;  %v871_v7 = vld [vmem:[%s4871_s19 + $0x60] sm:$0xff]  ;;  %v873_v9 = vld [vmem:[%s4871_s19 + $0x70] sm:$0xff] }
 0x179   : > { %v664_v12 = vmax.f32 %v2729_v11, 0.0  ;;  %v648_v13 = vpop.f32.mrb[7].mxu0  ;;  %v1196_v11 = vlaneseq }
 0x17a   : > { %v663_v14 = vmax.f32 %v648_v13, 0.0  ;;  %2815 = vmatprep.subr.bf16.mxu1 %v2814_v10 }
 0x17b   : > { %2817 = vmatpush3.bf16.msra.mxu1 %v2814_v10  ;;  %v874_v10 = vld [vmem:[%s4871_s19 + $0x78] sm:$0xff] }
 0x17c   : > { %v2818_v15 = vpack.c.bf16 %v664_v12, %v663_v14  ;;  %v3672_v12 = vshrl.u32 %v1196_v11, 7 }
 0x17e   : > { %2819 = vmatprep.subr.bf16.mxu1 %v2818_v15  ;;  %v1198_v13 = vsub.s32 0, %v3672_v12  ;;  %v1264_v14 = vsub.s32 1, %v3672_v12 }
 0x17f   : > { %2821 = vmatpush3.bf16.msra.mxu1 %v2818_v15  ;;  %v3677_v15 = vld [vmem:[%s3478_s12 + $0x8] sm:$0xff] }
 0x182   : > { %2747 = vmatmul.mubr.msk.f32.vlgmr.msra.gmra.mrb[0].mxu1 %vm721_vm1, %v666_v16  ;;  %v3680_v16 = vld [vmem:[%s3478_s12] sm:$0xff] }
 0x183   : > { %2749 = vmatprep.mubr.msk.f32.mxu1 %vm721_vm1, %v667_v17  ;;  %v3683_v17 = vld [vmem:[%s3478_s12 + $0x18] sm:$0xff] }
 0x186   : > { %2750 = vmatmul.mubr.msk.f32.gmra.mrb[2].mxu1 %vm721_vm1, %v668_v18  ;;  %v3686_v18 = vld [vmem:[%s3478_s12 + $0x10] sm:$0xff] }
 0x187   : > { %2752 = vmatprep.mubr.msk.f32.mxu1 %vm721_vm1, %v669_v19  ;;  %v3689_v19 = vld [vmem:[%s3478_s12 + $0x28] sm:$0xff] }
 0x18a   : > { %2753 = vmatmul.mubr.msk.f32.gmra.mrb[4].mxu1 %vm721_vm1, %v670_v20  ;;  %v3692_v20 = vld [vmem:[%s3478_s12 + $0x20] sm:$0xff] }
 0x18b   : > { %2755 = vmatprep.mubr.msk.f32.mxu1 %vm721_vm1, %v671_v21  ;;  %v3695_v21 = vld [vmem:[%s3478_s12 + $0x38] sm:$0xff] }
 0x18e   : > { %2756 = vmatmul.mubr.msk.f32.gmra.mrb[6].mxu1 %vm721_vm1, %v672_v22  ;;  %v3698_v22 = vrot.slane %v3677_v15, %v1198_v13 }
 0x255   : > { %v2748_v28 = vpop.f32.mrb[0].mxu1 }
 0x256   : > { %v818_v29 = vadd.f32 %v2748_v28, %v689_v26  ;;  %v812_v30 = vpop.f32.mrb[1].mxu1  ;;  %v3710_v26 = vld [vmem:[%s3478_s12 + $0x48] sm:$0xff]  ;;  %v3716_v28 = vrot.slane %v3683_v17, %v1198_v13 }
 0x257   : > { %v813_v31 = vadd.f32 %v812_v30, %v684_v24  ;;  %v3704_v24 = vrot.slane %v3680_v16, %v1198_v13  ;;  %v3722_v30 = vrot.slane %v3686_v18, %v1198_v13 }
 0x258   : > { %v852_v32 = vmax.f32 %v818_v29, 0.0  ;;  %v3719_v29 = vld [vmem:[%s3478_s12 + $0x40] sm:$0xff] }
 0x259   : > { %v851_v33 = vmax.f32 %v813_v31, 0.0  ;;  %v2751_v34 = vpop.f32.mrb[2].mxu1  ;;  %v3725_v31 = vrot.slane %v3683_v17, %v1264_v14 }
 0x25a   : > { %v828_v35 = vadd.f32 %v2751_v34, %v699_v27  ;;  %v822_v36 = vpop.f32.mrb[3].mxu1  ;;  %v3713_v27 = vld [vmem:[%s3478_s12 + $0x58] sm:$0xff]  ;;  %v3734_v34 = vrot.slane %v3689_v19, %v1198_v13 }
 0x25b   : > { %v2822_v38 = vpack.c.bf16 %v852_v32, %v851_v33  ;;  %v823_v39 = vadd.f32 %v822_v36, %v694_v25  ;;  %v3707_v25 = vrot.slane %v3677_v15, %v1264_v14  ;;  %v3728_v32 = vrot.slane %v3680_v16, %v1264_v14  ;;  %v3731_v33 = vld [vmem:[%s3478_s12 + $0x68] sm:$0xff] }
 0x25c   : > { %v854_v41 = vmax.f32 %v828_v35, 0.0  ;;  %v3737_v35 = vld [vmem:[%s3478_s12 + $0x50] sm:$0xff]  ;;  %v3740_v36 = vrot.slane %v3692_v20, %v1198_v13 }
 0x25d   : > { %v853_v42 = vmax.f32 %v823_v39, 0.0  ;;  %v2754_v43 = vpop.f32.mrb[4].mxu1  ;;  %2823 = vmatprep.subr.bf16.mxu0 %v2822_v38  ;;  %v3747_v39 = vld [vmem:[%s3478_s12 + $0x78] sm:$0xff] }
 0x25e   : > { %v838_v44 = vadd.f32 %v2754_v43, %v709_v37  ;;  %v832_v45 = vpop.f32.mrb[5].mxu1  ;;  %2825 = vmatpush3.bf16.msra.mxu0 %v2822_v38  ;;  %v3743_v37 = vrot.slane %v3686_v18, %v1264_v14  ;;  %v1330_v38 = vsub.s32 2, %v3672_v12  ;;  %v3759_v43 = vrot.slane %v3689_v19, %v1264_v14 }
 0x25f   : > { %v2826_v46 = vpack.c.bf16 %v854_v41, %v853_v42  ;;  %v833_v47 = vadd.f32 %v832_v45, %v704_v40  ;;  %v3750_v40 = vrot.slane %v3695_v21, %v1198_v13  ;;  %v3753_v41 = vld [vmem:[%s3478_s12 + $0x60] sm:$0xff]  ;;  %v3756_v42 = vrot.slane %v3701_v23, %v1198_v13 }
 0x260   : > { %v856_v48 = vmax.f32 %v838_v44, 0.0  ;;  %v3762_v44 = vrot.slane %v3695_v21, %v1264_v14  ;;  %v3765_v45 = vrot.slane %v3710_v26, %v1198_v13  ;;  %v3851_v11 = vrot.slane %v3713_v27, %v1330_v38 }
 0x261   : > { %v855_v50 = vmax.f32 %v833_v47, 0.0  ;;  %v2757_v51 = vpop.f32.mrb[6].mxu1  ;;  %2827 = vmatprep.subr.bf16.mxu0 %v2826_v46  ;;  %v3771_v47 = vld [vmem:[%s3478_s12 + $0x70] sm:$0xff] }
 0x262   : > { %v848_v53 = vadd.f32 %v2757_v51, %v719_v49  ;;  %v842_v54 = vpop.f32.mrb[7].mxu1  ;;  %2829 = vmatpush3.bf16.msra.mxu0 %v2826_v46  ;;  %v3768_v46 = vrot.slane %v3713_v27, %v1198_v13  ;;  %v3777_v49 = vrot.slane %v3710_v26, %v1264_v14  ;;  %v3783_v51 = vrot.slane %v3737_v35, %v1198_v13 }
 0x263   : > { %v2830_v55 = vpack.c.bf16 %v856_v48, %v855_v50  ;;  %v843_v56 = vadd.f32 %v842_v54, %v714_v52  ;;  %v3774_v48 = vrot.slane %v3719_v29, %v1198_v13  ;;  %v3780_v50 = vrot.slane %v3731_v33, %v1198_v13  ;;  %4881 = vst [vmem:[#allocation31_spill] sm:$0xff] %v3851_v11 }
 0x264   : > { %v858_v57 = vmax.f32 %v848_v53, 0.0  ;;  %v3786_v52 = vrot.slane %v3713_v27, %v1264_v14  ;;  %v1396_v53 = vsub.s32 3, %v3672_v12  ;;  %v3790_v54 = vrot.slane %v3747_v39, %v1198_v13 }
 0x265   : > { %v857_v58 = vmax.f32 %v843_v56, 0.0  ;;  %2831 = vmatprep.subr.bf16.mxu0 %v2830_v55  ;;  %v3796_v56 = vrot.slane %v3731_v33, %v1264_v14  ;;  %v3872_v11 = vrot.slane %v3737_v35, %v1330_v38 }
 0x266   : > { %2833 = vmatpush3.bf16.msra.mxu0 %v2830_v55  ;;  %v3793_v55 = vrot.slane %v3753_v41, %v1198_v13 }
 0x267   : > { %v2834_v59 = vpack.c.bf16 %v858_v57, %v857_v58  ;;  %v3799_v57 = vrot.slane %v3677_v15, %v1330_v38  ;;  %v3802_v58 = vrot.slane %v3771_v47, %v1198_v13  ;;  %v3854_v13 = vrot.slane %v3731_v33, %v1330_v38  ;;  %4888 = vst [vmem:[#allocation38_spill] sm:$0xff] %v3872_v11 }
 0x268   : > { %v1528_v11 = vsub.s32 5, %v3672_v12 }
 0x269   : > { %2835 = vmatprep.subr.bf16.mxu0 %v2834_v59  ;;  %4882 = vst [vmem:[#allocation32_spill] sm:$0xff] %v3854_v13  ;;  %v3875_v13 = vrot.slane %v3753_v41, %v1330_v38 }
 0x26a   : > { %2837 = vmatpush3.bf16.msra.mxu0 %v2834_v59  ;;  %v3805_v59 = vrot.slane %v3747_v39, %v1264_v14 }
 0x26b   : > { %4889 = vst [vmem:[#allocation39_spill] sm:$0xff] %v3875_v13  ;;  %v3895_v13 = vpop.permute.xlu0 %893 }
 0x26d   : > { %2775 = vmatmul.mubr.msk.f32.vlgmr.msra.gmra.mrb[8].mxu0 %vm721_vm1, %v860_v60  ;;  %v3808_v60 = vrot.slane %v3692_v20, %v1264_v14 }
 0x26e   : > { %2777 = vmatprep.mubr.msk.f32.mxu0 %vm721_vm1, %v861_v61  ;;  %v3811_v61 = vrot.slane %v3683_v17, %v1330_v38 }
 0x270   : > { %4872 = vst [vmem:[#allocation22_spill] sm:$0xff] %v3811_v61 }
 0x271   : > { %2778 = vmatmul.mubr.msk.f32.gmra.mrb[10].mxu0 %vm721_vm1, %v862_v62  ;;  %v3814_v62 = vrot.slane %v3701_v23, %v1264_v14 }
 0x272   : > { %2780 = vmatprep.mubr.msk.f32.mxu0 %vm721_vm1, %v863_v63  ;;  %v3817_v63 = vrot.slane %v3719_v29, %v1264_v14 }
 0x275   : > { %2781 = vmatmul.mubr.msk.f32.gmra.mrb[12].mxu0 %vm721_vm1, %v864_v0  ;;  %v3820_v0 = vrot.slane %v3680_v16, %v1330_v38 }
 0x276   : > { %2783 = vmatprep.mubr.msk.f32.mxu0 %vm721_vm1, %v865_v1  ;;  %v3823_v1 = vrot.slane %v3686_v18, %v1330_v38 }
 0x278   : > { %4873 = vst [vmem:[#allocation23_spill] sm:$0xff] %v3823_v1  ;;  %v3863_v1 = vrot.slane %v3719_v29, %v1330_v38 }
 0x279   : > { %2784 = vmatmul.mubr.msk.f32.gmra.mrb[14].mxu0 %vm721_vm1, %v866_v2  ;;  %v3826_v2 = vrot.slane %v3737_v35, %v1264_v14 }
 0x27a   : > { %2786 = vmatprep.mubr.msk.f32.mxu0 %vm721_vm1, %v867_v3  ;;  %v3829_v3 = vrot.slane %v3753_v41, %v1264_v14  ;;  %4885 = vst [vmem:[#allocation35_spill] sm:$0xff] %v3863_v1  ;;  %v3886_v1 = vrot.slane %v3695_v21, %v1396_v53 }
 0x27c   : > { %4874 = vst [vmem:[#allocation24_spill] sm:$0xff] %v3829_v3  ;;  %4892 = vst [vmem:[#allocation42_spill] sm:$0xff] %v3886_v1  ;;  %v3907_v1 = vrot.slane %v3686_v18, %v1396_v53 }
 0x27d   : > { %2787 = vmatmul.mubr.msk.f32.gmra.mrb[16].mxu0 %vm721_vm1, %v868_v4  ;;  %v3832_v4 = vrot.slane %v3689_v19, %v1330_v38 }
 0x27e   : > { %2789 = vmatprep.mubr.msk.f32.mxu0 %vm721_vm1, %v869_v5  ;;  %v3835_v5 = vrot.slane %v3677_v15, %v1396_v53  ;;  %4898 = vst [vmem:[#allocation48_spill] sm:$0xff] %v3907_v1  ;;  %v3928_v1 = vrot.slane %v3753_v41, %v1396_v53 }
 0x27f   : > { %4875 = vst [vmem:[#allocation25_spill] sm:$0xff] %v3832_v4 }
 0x280   : > { %4876 = vst [vmem:[#allocation26_spill] sm:$0xff] %v3835_v5  ;;  %v3860_v5 = vrot.slane %v3701_v23, %v1330_v38  ;;  %4905 = vst [vmem:[#allocation55_spill] sm:$0xff] %v3928_v1 }
 0x281   : > { %2790 = vmatmul.mubr.msk.f32.gmra.mrb[18].mxu0 %vm721_vm1, %v870_v6  ;;  %v3838_v6 = vrot.slane %v3771_v47, %v1264_v14  ;;  %v3857_v14 = vrot.slane %v3747_v39, %v1330_v38 }
 0x282   : > { %2792 = vmatprep.mubr.msk.f32.mxu0 %vm721_vm1, %v871_v7  ;;  %v3841_v7 = vrot.slane %v3695_v21, %v1330_v38  ;;  %4884 = vst [vmem:[#allocation34_spill] sm:$0xff] %v3860_v5  ;;  %v3881_v5 = vrot.slane %v3689_v19, %v1396_v53 }
 0x283   : > { %4877 = vst [vmem:[#allocation27_spill] sm:$0xff] %v3838_v6  ;;  %4883 = vst [vmem:[#allocation33_spill] sm:$0xff] %v3857_v14  ;;  %v3878_v14 = vrot.slane %v3771_v47, %v1330_v38 }
 0x284   : > { %4878 = vst [vmem:[#allocation28_spill] sm:$0xff] %v3841_v7  ;;  %4891 = vst [vmem:[#allocation41_spill] sm:$0xff] %v3881_v5  ;;  %v3883_v7 = vpop.permute.xlu1 %898  ;;  %v3901_v5 = vrot.slane %v3731_v33, %v1396_v53 }
 0x285   : > { %2793 = vmatmul.mubr.msk.f32.gmra.mrb[20].mxu0 %vm721_vm1, %v872_v8  ;;  %v3844_v8 = vrot.slane %v3692_v20, %v1330_v38  ;;  %4890 = vst [vmem:[#allocation40_spill] sm:$0xff] %v3878_v14  ;;  %v3904_v14 = vrot.slane %v3747_v39, %v1396_v53 }
 0x286   : > { %2795 = vmatprep.mubr.msk.f32.mxu0 %vm721_vm1, %v873_v9  ;;  %v1462_v9 = vsub.s32 4, %v3672_v12  ;;  %4896 = vst [vmem:[#allocation46_spill] sm:$0xff] %v3901_v5  ;;  %v3922_v5 = vrot.slane %v3719_v29, %v1396_v53 }
 0x287   : > { %4879 = vst [vmem:[#allocation29_spill] sm:$0xff] %v3844_v8  ;;  %v3866_v8 = vrot.slane %v3683_v17, %v1396_v53  ;;  %4897 = vst [vmem:[#allocation47_spill] sm:$0xff] %v3904_v14  ;;  %v3925_v14 = vrot.slane %v3737_v35, %v1396_v53 }
 0x288   : > { %v3916_v4 = vrot.slane %v3683_v17, %v1462_v9  ;;  %4903 = vst [vmem:[#allocation53_spill] sm:$0xff] %v3922_v5  ;;  %v1594_v5 = vsub.s32 6, %v3672_v12  ;;  %v3944_v61 = vrot.slane %v3710_v26, %v1462_v9  ;;  %v3962_v1 = vrot.slane %v3701_v23, %v1462_v9 }
 0x289   : > { %2796 = vmatmul.mubr.msk.f32.gmra.mrb[22].mxu0 %vm721_vm1, %v874_v10  ;;  %v3848_v10 = vrot.slane %v3710_v26, %v1330_v38  ;;  %4886 = vst [vmem:[#allocation36_spill] sm:$0xff] %v3866_v8  ;;  %v3889_v8 = vrot.slane %v3710_v26, %v1396_v53  ;;  %v3898_v38 = vrot.slane %v3713_v27, %v1396_v53  ;;  %4904 = vst [vmem:[#allocation54_spill] sm:$0xff] %v3925_v14 }
 0x28a   : > { %4901 = vst [vmem:[#allocation51_spill] sm:$0xff] %v3916_v4  ;;  %v3937_v4 = vrot.slane %v3695_v21, %v1462_v9  ;;  %4910 = vst [vmem:[#allocation60_spill] sm:$0xff] %v3944_v61  ;;  %v3947_v14 = vrot.slane %v3713_v27, %v1462_v9  ;;  %v3965_v61 = vrot.slane %v3680_v16, %v1528_v11 }
 0x28b   : > { %4880 = vst [vmem:[#allocation30_spill] sm:$0xff] %v3848_v10  ;;  %v3869_v10 = vrot.slane %v3680_v16, %v1396_v53  ;;  %4893 = vst [vmem:[#allocation43_spill] sm:$0xff] %v3889_v8  ;;  %v3910_v8 = vrot.slane %v3692_v20, %v1396_v53  ;;  %v3968_v6 = vrot.slane %v3719_v29, %v1462_v9 }
 0x28c   : > { %4895 = vst [vmem:[#allocation45_spill] sm:$0xff] %v3898_v38  ;;  %v3919_v38 = vrot.slane %v3680_v16, %v1462_v9  ;;  %4908 = vst [vmem:[#allocation58_spill] sm:$0xff] %v3937_v4  ;;  %v3956_v4 = vrot.slane %v3747_v39, %v1462_v9  ;;  %v4047_v3 = vrot.slane %v3713_v27, %v1594_v5 }
 0x28d   : > { %4887 = vst [vmem:[#allocation37_spill] sm:$0xff] %v3869_v10  ;;  %v3892_v10 = vrot.slane %v3677_v15, %v1462_v9  ;;  %4899 = vst [vmem:[#allocation49_spill] sm:$0xff] %v3910_v8  ;;  %v3931_v8 = vrot.slane %v3771_v47, %v1396_v53 }
 0x28e   : > { %4902 = vst [vmem:[#allocation52_spill] sm:$0xff] %v3919_v38  ;;  %v3940_v38 = vrot.slane %v3677_v15, %v1528_v11  ;;  %4911 = vst [vmem:[#allocation61_spill] sm:$0xff] %v3947_v14  ;;  %v904_v14 = vpop.permute.xlu0 %903 }
 0x28f   : > { %4894 = vst [vmem:[#allocation44_spill] sm:$0xff] %v3892_v10  ;;  %v3913_v10 = vrot.slane %v3701_v23, %v1396_v53  ;;  %4906 = vst [vmem:[#allocation56_spill] sm:$0xff] %v3931_v8  ;;  %v3950_v53 = vrot.slane %v3731_v33, %v1462_v9  ;;  %v3953_v8 = vrot.slane %v3686_v18, %v1462_v9 }
 0x290   : > { %4909 = vst [vmem:[#allocation59_spill] sm:$0xff] %v3940_v38  ;;  %4914 = vst [vmem:[#allocation64_spill] sm:$0xff] %v3956_v4  ;;  %v3959_v38 = vrot.slane %v3692_v20, %v1462_v9  ;;  %v3977_v4 = vrot.slane %v3683_v17, %v1528_v11 }
 0x291   : > { %4900 = vst [vmem:[#allocation50_spill] sm:$0xff] %v3913_v10  ;;  %v3934_v10 = vrot.slane %v3689_v19, %v1462_v9  ;;  %4912 = vst [vmem:[#allocation62_spill] sm:$0xff] %v3950_v53  ;;  %v3971_v53 = vrot.slane %v3737_v35, %v1462_v9 }
 0x292   : > { %4913 = vst [vmem:[#allocation63_spill] sm:$0xff] %v3953_v8  ;;  %4915 = vst [vmem:[#allocation65_spill] sm:$0xff] %v3959_v38  ;;  %v3974_v8 = vrot.slane %v3753_v41, %v1462_v9  ;;  %v3980_v38 = vrot.slane %v3771_v47, %v1462_v9  ;;  %v4001_v9 = vrot.slane %v3686_v18, %v1528_v11 }
 0x293   : > { %4907 = vst [vmem:[#allocation57_spill] sm:$0xff] %v3934_v10  ;;  %v909_v10 = vpop.permute.xlu1 %908  ;;  %4916 = vst [vmem:[#allocation66_spill] sm:$0xff] %v3962_v1  ;;  %v3983_v1 = vrot.slane %v3689_v19, %v1528_v11 }
 0x294   : > { %4917 = vst [vmem:[#allocation67_spill] sm:$0xff] %v3965_v61  ;;  %4918 = vst [vmem:[#allocation68_spill] sm:$0xff] %v3968_v6  ;;  %v3986_v61 = vrot.slane %v3677_v15, %v1594_v5  ;;  %v3989_v6 = vsub.s32 7, %v3672_v12  ;;  %v4010_v12 = vrot.slane %v3692_v20, %v1528_v11 }
 0x295   : > { %4919 = vst [vmem:[#allocation69_spill] sm:$0xff] %v3971_v53  ;;  %4920 = vst [vmem:[#allocation70_spill] sm:$0xff] %v3974_v8  ;;  %v3992_v53 = vrot.slane %v3695_v21, %v1528_v11  ;;  %v3995_v8 = vrot.slane %v3710_v26, %v1528_v11 }
 0x296   : > { %4921 = vst [vmem:[#allocation71_spill] sm:$0xff] %v3977_v4  ;;  %4922 = vst [vmem:[#allocation72_spill] sm:$0xff] %v3980_v38  ;;  %v3998_v4 = vrot.slane %v3713_v27, %v1528_v11 }
 0x297   : > { %4923 = vst [vmem:[#allocation73_spill] sm:$0xff] %v3983_v1  ;;  %4924 = vst [vmem:[#allocation74_spill] sm:$0xff] %v3986_v61  ;;  %v4004_v1 = vrot.slane %v3731_v33, %v1528_v11  ;;  %v4007_v61 = vrot.slane %v3747_v39, %v1528_v11  ;;  %v919_v38 = vpop.permute.xlu1 %918 }
 0x298   : > { %4925 = vst [vmem:[#allocation75_spill] sm:$0xff] %v3989_v6  ;;  %4926 = vst [vmem:[#allocation76_spill] sm:$0xff] %v3992_v53  ;;  %v4013_v53 = vrot.slane %v3680_v16, %v1594_v5 }
 0x299   : > { %4927 = vst [vmem:[#allocation77_spill] sm:$0xff] %v3995_v8  ;;  %4928 = vst [vmem:[#allocation78_spill] sm:$0xff] %v3998_v4  ;;  %v4016_v8 = vrot.slane %v3701_v23, %v1528_v11  ;;  %v4019_v4 = vrot.slane %v3719_v29, %v1528_v11 }
 0x29a   : > { %4929 = vst [vmem:[#allocation79_spill] sm:$0xff] %v4001_v9  ;;  %4930 = vst [vmem:[#allocation80_spill] sm:$0xff] %v4004_v1  ;;  %v4022_v9 = vrot.slane %v3737_v35, %v1528_v11  ;;  %v4025_v1 = vrot.slane %v3683_v17, %v1594_v5 }
 0x29b   : > { %4931 = vst [vmem:[#allocation81_spill] sm:$0xff] %v4007_v61  ;;  %4932 = vst [vmem:[#allocation82_spill] sm:$0xff] %v4010_v12  ;;  %v4028_v61 = vrot.slane %v3753_v41, %v1528_v11  ;;  %v4031_v12 = vrot.slane %v3771_v47, %v1528_v11  ;;  %v4050_v11 = vrot.slane %v3686_v18, %v1594_v5 }
 0x29c   : > { %4933 = vst [vmem:[#allocation83_spill] sm:$0xff] %v4013_v53  ;;  %4934 = vst [vmem:[#allocation84_spill] sm:$0xff] %v4016_v8  ;;  %v4034_v53 = vrot.slane %v3689_v19, %v1594_v5  ;;  %v4038_v8 = vrot.slane %v3677_v15, %v3989_v6  ;;  %v4056_v15 = vrot.slane %v3747_v39, %v1594_v5 }
 0x29d   : > { %4935 = vst [vmem:[#allocation85_spill] sm:$0xff] %v4019_v4  ;;  %4936 = vst [vmem:[#allocation86_spill] sm:$0xff] %v4022_v9  ;;  %v914_v4 = vpop.permute.xlu0 %913  ;;  %v4041_v9 = vrot.slane %v3695_v21, %v1594_v5  ;;  %v4074_v39 = vrot.slane %v3683_v17, %v3989_v6  ;;  %v4094_v17 = vrot.slane %v3695_v21, %v3989_v6 }
 0x29e   : > { %4937 = vst [vmem:[#allocation87_spill] sm:$0xff] %v4025_v1  ;;  %4938 = vst [vmem:[#allocation88_spill] sm:$0xff] %v4028_v61  ;;  %v4044_v1 = vrot.slane %v3710_v26, %v1594_v5  ;;  %v4067_v61 = vrot.slane %v3701_v23, %v1594_v5  ;;  %v4112_v21 = vrot.slane %v3731_v33, %v3989_v6 }
 0x29f   : > { %4939 = vst [vmem:[#allocation89_spill] sm:$0xff] %v4031_v12  ;;  %4940 = vst [vmem:[#allocation90_spill] sm:$0xff] %v4034_v53  ;;  %v4053_v53 = vrot.slane %v3731_v33, %v1594_v5 }
 0x2a0   : > { %4941 = vst [vmem:[#allocation91_spill] sm:$0xff] %v4038_v8  ;;  %4942 = vst [vmem:[#allocation92_spill] sm:$0xff] %v4041_v9  ;;  %v4059_v8 = vrot.slane %v3692_v20, %v1594_v5  ;;  %v4063_v9 = vrot.slane %v3680_v16, %v3989_v6  ;;  %v4081_v16 = vrot.slane %v3753_v41, %v1594_v5 }
 0x2a1   : > { %4943 = vst [vmem:[#allocation93_spill] sm:$0xff] %v4044_v1  ;;  %4944 = vst [vmem:[#allocation94_spill] sm:$0xff] %v4047_v3 }
 0x2a2   : > { %4945 = vst [vmem:[#allocation95_spill] sm:$0xff] %v4050_v11  ;;  %4946 = vst [vmem:[#allocation96_spill] sm:$0xff] %v4053_v53  ;;  %v4070_v11 = vrot.slane %v3719_v29, %v1594_v5  ;;  %v4090_v29 = vrot.slane %v3689_v19, %v3989_v6  ;;  %v4108_v19 = vrot.slane %v3713_v27, %v3989_v6 }
 0x2a3   : > { %4947 = vst [vmem:[#allocation97_spill] sm:$0xff] %v4056_v15  ;;  %4948 = vst [vmem:[#allocation98_spill] sm:$0xff] %v4059_v8  ;;  %v4078_v8 = vrot.slane %v3737_v35, %v1594_v5  ;;  %v4098_v35 = vrot.slane %v3686_v18, %v3989_v6 }
 0x2a4   : > { %4949 = vst [vmem:[#allocation99_spill] sm:$0xff] %v4063_v9  ;;  %4950 = vst [vmem:[#allocation100_spill] sm:$0xff] %v4067_v61 }
 0x2a5   : > { %4951 = vst [vmem:[#allocation101_spill] sm:$0xff] %v4070_v11  ;;  %4952 = vst [vmem:[#allocation102_spill] sm:$0xff] %v4074_v39 }
 0x2a6   : > { %4953 = vst [vmem:[#allocation103_spill] sm:$0xff] %v4078_v8  ;;  %4954 = vst [vmem:[#allocation104_spill] sm:$0xff] %v4081_v16 }
 0x2a7   : > { %4956 = vst [vmem:[#allocation106_spill] sm:$0xff] %v4090_v29  ;;  %4957 = vst [vmem:[#allocation107_spill] sm:$0xff] %v4094_v17 }
 0x2a8   : > { %4958 = vst [vmem:[#allocation108_spill] sm:$0xff] %v4098_v35  ;;  %4960 = vst [vmem:[#allocation110_spill] sm:$0xff] %v4108_v19 }
 0x2a9   : > { %4961 = vst [vmem:[#allocation111_spill] sm:$0xff] %v4112_v21 }
 0x340   : > { %v2776_v12 = vpop.f32.mrb[8].mxu0 }
 0x341   : > { %v1091_v1 = vadd.f32 %v2776_v12, %v3883_v7  ;;  %v1085_v3 = vpop.f32.mrb[9].mxu0  ;;  %v4084_v7 = vrot.slane %v3771_v47, %v1594_v5  ;;  %v4104_v47 = vrot.slane %v3710_v26, %v3989_v6 }
 0x342   : > { %v1086_v20 = vadd.f32 %v1085_v3, %v3895_v13  ;;  %v929_v3 = vpop.permute.xlu1 %928 }
 0x343   : > { %4955 = vst [vmem:[#allocation105_spill] sm:$0xff] %v4084_v7  ;;  %v4086_v23 = vmax.f32 %v1091_v1, 0.0  ;;  %4959 = vst [vmem:[#allocation109_spill] sm:$0xff] %v4104_v47  ;;  %v924_v1 = vpop.permute.xlu0 %923 }
 0x344   : > { %v4100_v41 = vmax.f32 %v1086_v20, 0.0  ;;  %v2779_v13 = vpop.f32.mrb[10].mxu0 }
 0x345   : > { %v1101_v5 = vadd.f32 %v2779_v13, %v909_v10  ;;  %v1095_v18 = vpop.f32.mrb[11].mxu0  ;;  %v1729_v12 = vmul.f32 %v3698_v22, %v4086_v23  ;;  %v1201_v20 = vmul.f32 %v3704_v24, %v4086_v23  ;;  %v1795_v26 = vmul.f32 %v3707_v25, %v4086_v23 }
 0x346   : > { %v1096_v35 = vadd.f32 %v1095_v18, %v904_v14  ;;  %v1728_v27 = vmul.f32 %v3698_v22, %v4100_v41  ;;  %v1200_v33 = vmul.f32 %v3704_v24, %v4100_v41  ;;  %v1794_v10 = vmul.f32 %v3707_v25, %v4100_v41  ;;  %v939_v47 = vpop.permute.xlu1 %938 }
 0x347   : > { %v4126_v13 = vmax.f32 %v1101_v5, 0.0  ;;  %v4130_v9 = vmul.f32 %v3728_v32, %v4100_v41  ;;  %v4134_v6 = vmul.f32 %v3728_v32, %v4086_v23  ;;  %v4138_v14 = vmul.f32 %v3799_v57, %v4100_v41 }
 0x348   : > { %v4140_v22 = vmax.f32 %v1096_v35, 0.0  ;;  %v2782_v24 = vpop.f32.mrb[12].mxu0  ;;  %v4144_v25 = vmul.f32 %v3799_v57, %v4086_v23  ;;  %v4148_v5 = vmul.f32 %v3820_v0, %v4100_v41  ;;  %v4152_v18 = vmul.f32 %v3820_v0, %v4086_v23 }
 0x349   : > { %v1111_v32 = vadd.f32 %v2782_v24, %v919_v38  ;;  %v1105_v21 = vpop.f32.mrb[13].mxu0  ;;  %v1737_v19 = vmul.f32 %v3716_v28, %v4126_v13  ;;  %v1209_v35 = vmul.f32 %v3722_v30, %v4126_v13  ;;  %v1803_v57 = vmul.f32 %v3725_v31, %v4126_v13  ;;  %v934_v24 = vpop.permute.xlu0 %933 }
 0x34a   : > { %v1106_v17 = vadd.f32 %v1105_v21, %v914_v4  ;;  %v1736_v29 = vmul.f32 %v3716_v28, %v4140_v22  ;;  %v1208_v0 = vmul.f32 %v3722_v30, %v4140_v22  ;;  %v1802_v38 = vmul.f32 %v3725_v31, %v4140_v22 }
 0x34b   : > { %v4166_v39 = vmax.f32 %v1111_v32, 0.0  ;;  %v1739_v7 = vadd.f32 %v1737_v19, %v1729_v12  ;;  %v1211_v16 = vadd.f32 %v1209_v35, %v1201_v20  ;;  %v1805_v8 = vadd.f32 %v1803_v57, %v1795_v26 }
 0x34c   : > { %v4168_v11 = vmax.f32 %v1106_v17, 0.0  ;;  %v2785_v61 = vpop.f32.mrb[14].mxu0  ;;  %v1738_v15 = vadd.f32 %v1736_v29, %v1728_v27  ;;  %v1210_v4 = vadd.f32 %v1208_v0, %v1200_v33  ;;  %v1804_v21 = vadd.f32 %v1802_v38, %v1794_v10  ;;  %v949_v27 = vpop.permute.xlu1 %948 }
 0x34d   : > { %v1121_v53 = vadd.f32 %v2785_v61, %v929_v3  ;;  %v1115_v28 = vpop.f32.mrb[15].mxu0  ;;  %v1745_v30 = vmul.f32 %v3734_v34, %v4166_v39  ;;  %v1217_v31 = vmul.f32 %v3740_v36, %v4166_v39  ;;  %v1811_v32 = vmul.f32 %v3759_v43, %v4166_v39  ;;  %v944_v0 = vpop.permute.xlu0 %943 }
 0x34e   : > { %v1116_v19 = vadd.f32 %v1115_v28, %v924_v1  ;;  %v1744_v17 = vmul.f32 %v3734_v34, %v4168_v11  ;;  %v1216_v29 = vmul.f32 %v3740_v36, %v4168_v11  ;;  %v1810_v61 = vmul.f32 %v3759_v43, %v4168_v11 }
 0x34f   : > { %v4182_v3 = vmax.f32 %v1121_v53, 0.0  ;;  %v1747_v12 = vadd.f32 %v1745_v30, %v1739_v7  ;;  %v1219_v20 = vadd.f32 %v1217_v31, %v1211_v16  ;;  %v1813_v26 = vadd.f32 %v1811_v32, %v1805_v8 }
 0x350   : > { %v4184_v33 = vmax.f32 %v1116_v19, 0.0  ;;  %v2788_v10 = vpop.f32.mrb[16].mxu0  ;;  %v1746_v35 = vadd.f32 %v1744_v17, %v1738_v15  ;;  %v1218_v1 = vadd.f32 %v1216_v29, %v1210_v4  ;;  %v1812_v57 = vadd.f32 %v1810_v61, %v1804_v21  ;;  %v2253_v61 = vld [vmem:[#allocation9 + $0x8] sm:$0xff] }
 0x351   : > { %v1131_v34 = vadd.f32 %v2788_v10, %v939_v47  ;;  %v1125_v38 = vpop.f32.mrb[17].mxu0  ;;  %v1753_v36 = vmul.f32 %v3750_v40, %v4182_v3  ;;  %v1225_v43 = vmul.f32 %v3756_v42, %v4182_v3  ;;  %v1819_v53 = vmul.f32 %v3762_v44, %v4182_v3  ;;  %2380 = vmatprep.mubr.f32.mxu0 %v2253_v61 }
 0x352   : > { %v1126_v8 = vadd.f32 %v1125_v38, %v934_v24  ;;  %v1752_v16 = vmul.f32 %v3750_v40, %v4184_v33  ;;  %v1224_v15 = vmul.f32 %v3756_v42, %v4184_v33  ;;  %v1818_v7 = vmul.f32 %v3762_v44, %v4184_v33 }
 0x353   : > { %v4198_v47 = vmax.f32 %v1131_v34, 0.0  ;;  %v1755_v4 = vadd.f32 %v1753_v36, %v1747_v12  ;;  %v1227_v21 = vadd.f32 %v1225_v43, %v1219_v20  ;;  %v1821_v28 = vadd.f32 %v1819_v53, %v1813_v26  ;;  %v2255_v12 = vld [vmem:[#allocation9 + $0x18] sm:$0xff]  ;;  %v959_v20 = vpop.permute.xlu1 %958 }
 0x354   : > { %v4200_v30 = vmax.f32 %v1126_v8, 0.0  ;;  %v2791_v31 = vpop.f32.mrb[18].mxu0  ;;  %v1754_v32 = vadd.f32 %v1752_v16, %v1746_v35  ;;  %v1226_v19 = vadd.f32 %v1224_v15, %v1218_v1  ;;  %v1820_v24 = vadd.f32 %v1818_v7, %v1812_v57  ;;  %v954_v1 = vpop.permute.xlu0 %953  ;;  %2385 = vmatprep.mubr.f32.mxu1 %v2255_v12 }
 0x355   : > { %v1141_v17 = vadd.f32 %v2791_v31, %v949_v27  ;;  %v1135_v29 = vpop.f32.mrb[19].mxu0  ;;  %v1761_v40 = vmul.f32 %v3765_v45, %v4198_v47  ;;  %v1233_v42 = vmul.f32 %v3774_v48, %v4198_v47  ;;  %v1827_v44 = vmul.f32 %v3777_v49, %v4198_v47 }
 0x356   : > { %v1136_v26 = vadd.f32 %v1135_v29, %v944_v0  ;;  %v1760_v10 = vmul.f32 %v3765_v45, %v4200_v30  ;;  %v1232_v27 = vmul.f32 %v3774_v48, %v4200_v30  ;;  %v1826_v35 = vmul.f32 %v3777_v49, %v4200_v30 }
 0x357   : > { %v4214_v57 = vmax.f32 %v1141_v17, 0.0  ;;  %v1763_v34 = vadd.f32 %v1761_v40, %v1755_v4  ;;  %v1235_v38 = vadd.f32 %v1233_v42, %v1227_v21  ;;  %v1829_v36 = vadd.f32 %v1827_v44, %v1821_v28  ;;  %v969_v29 = vpop.permute.xlu1 %968 }
 0x358   : > { %v4216_v43 = vmax.f32 %v1136_v26, 0.0  ;;  %v2794_v0 = vpop.f32.mrb[20].mxu0  ;;  %v1762_v53 = vadd.f32 %v1760_v10, %v1754_v32  ;;  %v1234_v8 = vadd.f32 %v1232_v27, %v1226_v19  ;;  %v1828_v45 = vadd.f32 %v1826_v35, %v1820_v24 }
 0x359   : > { %v1151_v16 = vadd.f32 %v2794_v0, %v959_v20  ;;  %v1145_v15 = vpop.f32.mrb[21].mxu0  ;;  %v1769_v48 = vmul.f32 %v3768_v46, %v4214_v57  ;;  %v1241_v49 = vmul.f32 %v3783_v51, %v4214_v57  ;;  %v1835_v7 = vmul.f32 %v3786_v52, %v4214_v57  ;;  %v964_v20 = vpop.permute.xlu0 %963 }
 0x35a   : > { %v1146_v4 = vadd.f32 %v1145_v15, %v954_v1  ;;  %v1768_v21 = vmul.f32 %v3768_v46, %v4216_v43  ;;  %v1240_v28 = vmul.f32 %v3783_v51, %v4216_v43  ;;  %v1834_v31 = vmul.f32 %v3786_v52, %v4216_v43 }
 0x35b   : > { %v4230_v32 = vmax.f32 %v1151_v16, 0.0  ;;  %v1771_v19 = vadd.f32 %v1769_v48, %v1763_v34  ;;  %v1243_v24 = vadd.f32 %v1241_v49, %v1235_v38  ;;  %v1837_v17 = vadd.f32 %v1835_v7, %v1829_v36 }
 0x35c   : > { %v4232_v40 = vmax.f32 %v1146_v4, 0.0  ;;  %v2797_v42 = vpop.f32.mrb[22].mxu0  ;;  %v1770_v44 = vadd.f32 %v1768_v21, %v1762_v53  ;;  %v1242_v61 = vadd.f32 %v1240_v28, %v1234_v8  ;;  %v1836_v12 = vadd.f32 %v1834_v31, %v1828_v45 }
 0x35d   : > { %v1161_v46 = vadd.f32 %v2797_v42, %v969_v29  ;;  %v1155_v26 = vpop.f32.mrb[23].mxu0  ;;  %v1777_v51 = vmul.f32 %v3780_v50, %v4230_v32  ;;  %v1249_v52 = vmul.f32 %v3793_v55, %v4230_v32  ;;  %v1843_v10 = vmul.f32 %v3796_v56, %v4230_v32 }
 0x35e   : > { %v1156_v27 = vadd.f32 %v1155_v26, %v964_v20  ;;  %v1776_v35 = vmul.f32 %v3780_v50, %v4232_v40  ;;  %v1248_v1 = vmul.f32 %v3793_v55, %v4232_v40  ;;  %v1842_v34 = vmul.f32 %v3796_v56, %v4232_v40 }
 0x35f   : > { %v4246_v38 = vmax.f32 %v1161_v46, 0.0  ;;  %v1779_v36 = vadd.f32 %v1777_v51, %v1771_v19  ;;  %v1251_v0 = vadd.f32 %v1249_v52, %v1243_v24  ;;  %v1845_v53 = vadd.f32 %v1843_v10, %v1837_v17 }
 0x360   : > { %v4248_v8 = vmax.f32 %v1156_v27, 0.0  ;;  %v1778_v45 = vadd.f32 %v1776_v35, %v1770_v44  ;;  %v1250_v16 = vadd.f32 %v1248_v1, %v1242_v61  ;;  %v1844_v15 = vadd.f32 %v1842_v34, %v1836_v12 }
 0x361   : > { %v1785_v48 = vmul.f32 %v3790_v54, %v4246_v38  ;;  %v1257_v50 = vmul.f32 %v3802_v58, %v4246_v38  ;;  %v1851_v55 = vmul.f32 %v3805_v59, %v4246_v38  ;;  %v1274_v56 = vmul.f32 %v3743_v37, %v4140_v22 }
 0x362   : > { %v1784_v49 = vmul.f32 %v3790_v54, %v4248_v8  ;;  %v1256_v7 = vmul.f32 %v3802_v58, %v4248_v8  ;;  %v1850_v4 = vmul.f32 %v3805_v59, %v4248_v8  ;;  %v1275_v21 = vmul.f32 %v3743_v37, %v4126_v13 }
 0x363   : > { %v1787_v28 = vadd.f32 %v1785_v48, %v1779_v36  ;;  %v1259_v31 = vadd.f32 %v1257_v50, %v1251_v0  ;;  %v1853_v19 = vadd.f32 %v1851_v55, %v1845_v53  ;;  %v1276_v24 = vadd.f32 %v1274_v56, %v4130_v9  ;;  %v4966_v56 = vld [vmem:[#allocation28_spill] sm:$0xff] }
 0x364   : > { %v1786_v17 = vadd.f32 %v1784_v49, %v1778_v45  ;;  %v1258_v29 = vadd.f32 %v1256_v7, %v1250_v16  ;;  %v1852_v42 = vadd.f32 %v1850_v4, %v1844_v15  ;;  %v1277_v44 = vadd.f32 %v1275_v21, %v4134_v6  ;;  %v4965_v16 = vld [vmem:[#allocation25_spill] sm:$0xff] }
 0x365   : > { %v1282_v54 = vmul.f32 %v3808_v60, %v4168_v11  ;;  %v1283_v58 = vmul.f32 %v3808_v60, %v4166_v39  ;;  %v1290_v59 = vmul.f32 %v3814_v62, %v4184_v33  ;;  %v1291_v37 = vmul.f32 %v3814_v62, %v4182_v3  ;;  %v4962_v62 = vld [vmem:[#allocation24_spill] sm:$0xff] }
 0x366   : > { %v2838_v61 = vpack.c.bf16 %v1787_v28, %v1786_v17  ;;  %v2840_v12 = vpack.c.bf16 %v1259_v31, %v1258_v29  ;;  %v2842_v9 = vpack.c.bf16 %v1853_v19, %v1852_v42  ;;  %v1298_v20 = vmul.f32 %v3817_v63, %v4200_v30  ;;  %v4967_v28 = vld [vmem:[#allocation30_spill] sm:$0xff] }
 0x367   : > { %v1284_v46 = vadd.f32 %v1282_v54, %v1276_v24  ;;  %v1285_v6 = vadd.f32 %v1283_v58, %v1277_v44  ;;  %v1299_v26 = vmul.f32 %v3817_v63, %v4198_v47  ;;  %v1306_v60 = vmul.f32 %v3826_v2, %v4216_v43  ;;  %v4963_v63 = vld [vmem:[#allocation27_spill] sm:$0xff]  ;;  %v4969_v54 = vld [vmem:[#allocation32_spill] sm:$0xff] }
 0x368   : > { %2839 = vmatprep.subr.bf16.mxu0 %v2838_v61  ;;  %2870 = vmatprep.subr.bf16.mxu1 %v2838_v61  ;;  %v1307_v51 = vmul.f32 %v3826_v2, %v4214_v57  ;;  %v1314_v52 = vmul.f32 %v4962_v62, %v4232_v40  ;;  %v1315_v10 = vmul.f32 %v4962_v62, %v4230_v32  ;;  %v4964_v2 = vld [vmem:[#allocation22_spill] sm:$0xff] }
 0x369   : > { %2841 = vmatpush3.bf16.msra.mxu0 %v2840_v12  ;;  %2878 = vmatpush3.bf16.msra.mxu1 %v2840_v12  ;;  %v1292_v27 = vadd.f32 %v1290_v59, %v1284_v46  ;;  %v1293_v35 = vadd.f32 %v1291_v37, %v1285_v6  ;;  %v1322_v1 = vmul.f32 %v4963_v63, %v4248_v8  ;;  %v4970_v12 = vld [vmem:[#allocation33_spill] sm:$0xff] }
 0x36a   : > { %2843 = vmatprep.subr.bf16.mxu0 %v2842_v9  ;;  %2871 = vmatprep.subr.bf16.mxu1 %v2842_v9  ;;  %v1323_v34 = vmul.f32 %v4963_v63, %v4246_v38  ;;  %v1868_v36 = vmul.f32 %v4964_v2, %v4140_v22  ;;  %v1869_v0 = vmul.f32 %v4964_v2, %v4126_v13 }
 0x36b   : > { %v1300_v53 = vadd.f32 %v1298_v20, %v1292_v27  ;;  %v1301_v45 = vadd.f32 %v1299_v26, %v1293_v35  ;;  %v1876_v15 = vmul.f32 %v4965_v16, %v4168_v11  ;;  %v1877_v48 = vmul.f32 %v4965_v16, %v4166_v39  ;;  %v4971_v26 = vld [vmem:[#allocation23_spill] sm:$0xff] }
 0x36c   : > { %v1870_v50 = vadd.f32 %v1868_v36, %v4138_v14  ;;  %v1871_v55 = vadd.f32 %v1869_v0, %v4144_v25  ;;  %v1884_v49 = vmul.f32 %v4966_v56, %v4184_v33  ;;  %v1885_v7 = vmul.f32 %v4966_v56, %v4182_v3  ;;  %v4968_v14 = vld [vmem:[#allocation31_spill] sm:$0xff]  ;;  %v4975_v56 = vld [vmem:[#allocation38_spill] sm:$0xff] }
 0x36d   : > { %v1308_v4 = vadd.f32 %v1306_v60, %v1300_v53  ;;  %v1309_v21 = vadd.f32 %v1307_v51, %v1301_v45  ;;  %v1892_v31 = vmul.f32 %v4967_v28, %v4200_v30  ;;  %v1893_v19 = vmul.f32 %v4967_v28, %v4198_v47  ;;  %v4974_v16 = vld [vmem:[#allocation35_spill] sm:$0xff] }
 0x36e   : > { %v1878_v24 = vadd.f32 %v1876_v15, %v1870_v50  ;;  %v1879_v17 = vadd.f32 %v1877_v48, %v1871_v55  ;;  %v1900_v29 = vmul.f32 %v4968_v14, %v4216_v43  ;;  %v1901_v25 = vmul.f32 %v4968_v14, %v4214_v57  ;;  %v4976_v28 = vld [vmem:[#allocation39_spill] sm:$0xff]  ;;  %v4977_v14 = vld [vmem:[#allocation40_spill] sm:$0xff] }
 0x36f   : > { %v1316_v42 = vadd.f32 %v1314_v52, %v1308_v4  ;;  %v1317_v44 = vadd.f32 %v1315_v10, %v1309_v21  ;;  %v1908_v58 = vmul.f32 %v4969_v54, %v4232_v40  ;;  %v1909_v59 = vmul.f32 %v4969_v54, %v4230_v32  ;;  %v4972_v10 = vld [vmem:[#allocation29_spill] sm:$0xff]  ;;  %v4978_v54 = vld [vmem:[#allocation26_spill] sm:$0xff] }
 0x370   : > { %v1886_v37 = vadd.f32 %v1884_v49, %v1878_v24  ;;  %v1887_v61 = vadd.f32 %v1885_v7, %v1879_v17  ;;  %v1916_v9 = vmul.f32 %v4970_v12, %v4248_v8  ;;  %v1917_v20 = vmul.f32 %v4970_v12, %v4246_v38 }
 0x371   : > { %v1324_v46 = vadd.f32 %v1322_v1, %v1316_v42  ;;  %v1325_v6 = vadd.f32 %v1323_v34, %v1317_v44  ;;  %v1340_v60 = vmul.f32 %v4971_v26, %v4140_v22  ;;  %v1341_v51 = vmul.f32 %v4971_v26, %v4126_v13  ;;  %v4973_v34 = vld [vmem:[#allocation34_spill] sm:$0xff] }
 0x372   : > { %v1894_v62 = vadd.f32 %v1892_v31, %v1886_v37  ;;  %v1895_v52 = vadd.f32 %v1893_v19, %v1887_v61  ;;  %v1348_v27 = vmul.f32 %v4972_v10, %v4168_v11  ;;  %v1349_v35 = vmul.f32 %v4972_v10, %v4166_v39  ;;  %v4979_v61 = vld [vmem:[#allocation36_spill] sm:$0xff] }
 0x373   : > { %v2844_v63 = vpack.c.bf16 %v1325_v6, %v1324_v46  ;;  %v1342_v2 = vadd.f32 %v1340_v60, %v4148_v5  ;;  %v1343_v1 = vadd.f32 %v1341_v51, %v4152_v18  ;;  %v1356_v36 = vmul.f32 %v4973_v34, %v4184_v33  ;;  %v4981_v51 = vld [vmem:[#allocation42_spill] sm:$0xff] }
 0x374   : > { %v1902_v0 = vadd.f32 %v1900_v29, %v1894_v62  ;;  %v1903_v53 = vadd.f32 %v1901_v25, %v1895_v52  ;;  %v1357_v45 = vmul.f32 %v4973_v34, %v4182_v3  ;;  %v1364_v15 = vmul.f32 %v4974_v16, %v4200_v30 }
 0x375   : > { %2845 = vmatpush3.bf16.msra.mxu0 %v2844_v63  ;;  %2879 = vmatpush3.bf16.msra.mxu1 %v2844_v63  ;;  %v1350_v48 = vadd.f32 %v1348_v27, %v1342_v2  ;;  %v1351_v50 = vadd.f32 %v1349_v35, %v1343_v1  ;;  %v1365_v5 = vmul.f32 %v4974_v16, %v4198_v47  ;;  %v4982_v2 = vld [vmem:[#allocation43_spill] sm:$0xff] }
 0x376   : > { %v1910_v55 = vadd.f32 %v1908_v58, %v1902_v0  ;;  %v1911_v18 = vadd.f32 %v1909_v59, %v1903_v53  ;;  %v1372_v49 = vmul.f32 %v4975_v56, %v4216_v43  ;;  %v1373_v7 = vmul.f32 %v4975_v56, %v4214_v57  ;;  %v4983_v53 = vld [vmem:[#allocation45_spill] sm:$0xff] }
 0x377   : > { %v1358_v4 = vadd.f32 %v1356_v36, %v1350_v48  ;;  %v1359_v21 = vadd.f32 %v1357_v45, %v1351_v50  ;;  %v1380_v31 = vmul.f32 %v4976_v28, %v4232_v40  ;;  %v1381_v19 = vmul.f32 %v4976_v28, %v4230_v32  ;;  %v4984_v50 = vld [vmem:[#allocation46_spill] sm:$0xff]  ;;  %v4986_v28 = vld [vmem:[#allocation37_spill] sm:$0xff] }
 0x378   : > { %v1918_v24 = vadd.f32 %v1916_v9, %v1910_v55  ;;  %v1919_v17 = vadd.f32 %v1917_v20, %v1911_v18  ;;  %v1388_v29 = vmul.f32 %v4977_v14, %v4248_v8  ;;  %v1389_v25 = vmul.f32 %v4977_v14, %v4246_v38  ;;  %v4980_v20 = vld [vmem:[#allocation41_spill] sm:$0xff] }
 0x379   : > { %v1366_v42 = vadd.f32 %v1364_v15, %v1358_v4  ;;  %v1367_v44 = vadd.f32 %v1365_v5, %v1359_v21  ;;  %v1926_v58 = vmul.f32 %v4978_v54, %v4100_v41  ;;  %v1927_v59 = vmul.f32 %v4978_v54, %v4086_v23 }
 0x37a   : > { %v2846_v37 = vpack.c.bf16 %v1919_v17, %v1918_v24  ;;  %v1934_v12 = vmul.f32 %v4979_v61, %v4140_v22  ;;  %v1935_v9 = vmul.f32 %v4979_v61, %v4126_v13  ;;  %v1942_v46 = vmul.f32 %v4980_v20, %v4168_v11  ;;  %v4987_v24 = vld [vmem:[#allocation48_spill] sm:$0xff] }
 0x37b   : > { %v1374_v6 = vadd.f32 %v1372_v49, %v1366_v42  ;;  %v1375_v26 = vadd.f32 %v1373_v7, %v1367_v44  ;;  %v1943_v60 = vmul.f32 %v4980_v20, %v4166_v39  ;;  %v1950_v62 = vmul.f32 %v4981_v51, %v4184_v33  ;;  %v4985_v49 = vld [vmem:[#allocation47_spill] sm:$0xff]  ;;  %v4988_v42 = vld [vmem:[#allocation49_spill] sm:$0xff] }
 0x37c   : > { %2847 = vmatprep.subr.bf16.mxu0 %v2846_v37  ;;  %2872 = vmatprep.subr.bf16.mxu1 %v2846_v37  ;;  %v1936_v52 = vadd.f32 %v1934_v12, %v1926_v58  ;;  %v1937_v10 = vadd.f32 %v1935_v9, %v1927_v59  ;;  %v1951_v27 = vmul.f32 %v4981_v51, %v4182_v3  ;;  %v4989_v59 = vld [vmem:[#allocation50_spill] sm:$0xff] }
 0x37d   : > { %v1382_v35 = vadd.f32 %v1380_v31, %v1374_v6  ;;  %v1383_v63 = vadd.f32 %v1381_v19, %v1375_v26  ;;  %v1958_v1 = vmul.f32 %v4982_v2, %v4200_v30  ;;  %v1959_v34 = vmul.f32 %v4982_v2, %v4198_v47  ;;  %v4990_v6 = vld [vmem:[#allocation53_spill] sm:$0xff]  ;;  %v4991_v51 = vld [vmem:[#allocation54_spill] sm:$0xff]  ;;  %v4992_v2 = vld [vmem:[#allocation55_spill] sm:$0xff] }
 0x37e   : > { %v1944_v36 = vadd.f32 %v1942_v46, %v1936_v52  ;;  %v1945_v0 = vadd.f32 %v1943_v60, %v1937_v10  ;;  %v1966_v45 = vmul.f32 %v4983_v53, %v4216_v43  ;;  %v1967_v16 = vmul.f32 %v4983_v53, %v4214_v57 }
 0x37f   : > { %v1390_v15 = vadd.f32 %v1388_v29, %v1382_v35  ;;  %v1391_v48 = vadd.f32 %v1389_v25, %v1383_v63  ;;  %v1974_v5 = vmul.f32 %v4984_v50, %v4232_v40  ;;  %v1975_v55 = vmul.f32 %v4984_v50, %v4230_v32  ;;  %v4994_v50 = vld [vmem:[#allocation44_spill] sm:$0xff] }
 0x380   : > { %v1952_v18 = vadd.f32 %v1950_v62, %v1944_v36  ;;  %v1953_v56 = vadd.f32 %v1951_v27, %v1945_v0  ;;  %v1982_v7 = vmul.f32 %v4985_v49, %v4248_v8  ;;  %v1983_v4 = vmul.f32 %v4985_v49, %v4246_v38  ;;  %v4993_v36 = vld [vmem:[#allocation56_spill] sm:$0xff] }
 0x381   : > { %v2848_v21 = vpack.c.bf16 %v1391_v48, %v1390_v15  ;;  %v1398_v31 = vmul.f32 %v4986_v28, %v4100_v41  ;;  %v1399_v19 = vmul.f32 %v4986_v28, %v4086_v23  ;;  %v1406_v17 = vmul.f32 %v4987_v24, %v4140_v22 }
 0x382   : > { %v1960_v14 = vadd.f32 %v1958_v1, %v1952_v18  ;;  %v1961_v29 = vadd.f32 %v1959_v34, %v1953_v56  ;;  %v1407_v25 = vmul.f32 %v4987_v24, %v4126_v13  ;;  %v1414_v44 = vmul.f32 %v4988_v42, %v4168_v11  ;;  %v4995_v18 = vld [vmem:[#allocation51_spill] sm:$0xff] }
 0x383   : > { %2849 = vmatpush3.bf16.msra.mxu0 %v2848_v21  ;;  %2880 = vmatpush3.bf16.msra.mxu1 %v2848_v21  ;;  %v1408_v54 = vadd.f32 %v1406_v17, %v1398_v31  ;;  %v1415_v58 = vmul.f32 %v4988_v42, %v4166_v39  ;;  %v1422_v37 = vmul.f32 %v4989_v59, %v4184_v33  ;;  %v4997_v17 = vld [vmem:[#allocation58_spill] sm:$0xff] }
 0x384   : > { %v1968_v61 = vadd.f32 %v1966_v45, %v1960_v14  ;;  %v1969_v12 = vadd.f32 %v1967_v16, %v1961_v29  ;;  %v1409_v9 = vadd.f32 %v1407_v25, %v1399_v19  ;;  %v1423_v20 = vmul.f32 %v4989_v59, %v4182_v3 }
 0x385   : > { %v1416_v46 = vadd.f32 %v1414_v44, %v1408_v54  ;;  %v1430_v26 = vmul.f32 %v4990_v6, %v4200_v30  ;;  %v1431_v60 = vmul.f32 %v4990_v6, %v4198_v47  ;;  %v1438_v62 = vmul.f32 %v4991_v51, %v4216_v43 }
 0x386   : > { %v1976_v52 = vadd.f32 %v1974_v5, %v1968_v61  ;;  %v1977_v10 = vadd.f32 %v1975_v55, %v1969_v12  ;;  %v1417_v27 = vadd.f32 %v1415_v58, %v1409_v9  ;;  %v1439_v35 = vmul.f32 %v4991_v51, %v4214_v57  ;;  %v4998_v58 = vld [vmem:[#allocation60_spill] sm:$0xff]  ;;  %v4999_v9 = vld [vmem:[#allocation61_spill] sm:$0xff] }
 0x387   : > { %v1424_v63 = vadd.f32 %v1422_v37, %v1416_v46  ;;  %v1446_v1 = vmul.f32 %v4992_v2, %v4232_v40  ;;  %v1447_v34 = vmul.f32 %v4992_v2, %v4230_v32  ;;  %v1454_v0 = vmul.f32 %v4993_v36, %v4248_v8 }
 0x388   : > { %v1984_v53 = vadd.f32 %v1982_v7, %v1976_v52  ;;  %v1985_v45 = vadd.f32 %v1983_v4, %v1977_v10  ;;  %v1425_v16 = vadd.f32 %v1423_v20, %v1417_v27  ;;  %v1455_v15 = vmul.f32 %v4993_v36, %v4246_v38  ;;  %v4996_v4 = vld [vmem:[#allocation57_spill] sm:$0xff]  ;;  %v5001_v27 = vld [vmem:[#allocation64_spill] sm:$0xff] }
 0x389   : > { %v1432_v48 = vadd.f32 %v1430_v26, %v1424_v63  ;;  %v1992_v5 = vmul.f32 %v4994_v50, %v4100_v41  ;;  %v1993_v55 = vmul.f32 %v4994_v50, %v4086_v23  ;;  %v2000_v56 = vmul.f32 %v4995_v18, %v4140_v22 }
 0x38a   : > { %v2850_v49 = vpack.c.bf16 %v1985_v45, %v1984_v53  ;;  %v1433_v21 = vadd.f32 %v1431_v60, %v1425_v16  ;;  %v2001_v7 = vmul.f32 %v4995_v18, %v4126_v13  ;;  %v2008_v28 = vmul.f32 %v4996_v4, %v4168_v11  ;;  %v5000_v60 = vld [vmem:[#allocation62_spill] sm:$0xff] }
 0x38b   : > { %v1440_v31 = vadd.f32 %v1438_v62, %v1432_v48  ;;  %v2002_v19 = vadd.f32 %v2000_v56, %v1992_v5  ;;  %v2009_v24 = vmul.f32 %v4996_v4, %v4166_v39  ;;  %v2016_v14 = vmul.f32 %v4997_v17, %v4184_v33  ;;  %v5004_v48 = vld [vmem:[#allocation65_spill] sm:$0xff]  ;;  %v5005_v56 = vld [vmem:[#allocation66_spill] sm:$0xff] }
 0x38c   : > { %2851 = vmatprep.subr.bf16.mxu0 %v2850_v49  ;;  %2873 = vmatprep.subr.bf16.mxu1 %v2850_v49  ;;  %v1441_v29 = vadd.f32 %v1439_v35, %v1433_v21  ;;  %v2003_v25 = vadd.f32 %v2001_v7, %v1993_v55  ;;  %v2017_v42 = vmul.f32 %v4997_v17, %v4182_v3 }
 0x38d   : > { %v1448_v44 = vadd.f32 %v1446_v1, %v1440_v31  ;;  %v2010_v54 = vadd.f32 %v2008_v28, %v2002_v19  ;;  %v2024_v59 = vmul.f32 %v4998_v58, %v4200_v30  ;;  %v2025_v37 = vmul.f32 %v4998_v58, %v4198_v47  ;;  %v5002_v1 = vld [vmem:[#allocation52_spill] sm:$0xff] }
 0x38e   : > { %v1449_v61 = vadd.f32 %v1447_v34, %v1441_v29  ;;  %v2011_v12 = vadd.f32 %v2009_v24, %v2003_v25  ;;  %v2032_v20 = vmul.f32 %v4999_v9, %v4216_v43  ;;  %v2033_v46 = vmul.f32 %v4999_v9, %v4214_v57  ;;  %v5006_v19 = vld [vmem:[#allocation68_spill] sm:$0xff]  ;;  %v5007_v25 = vld [vmem:[#allocation69_spill] sm:$0xff] }
 0x38f   : > { %v1456_v6 = vadd.f32 %v1454_v0, %v1448_v44  ;;  %v2018_v26 = vadd.f32 %v2016_v14, %v2010_v54  ;;  %v2040_v51 = vmul.f32 %v5000_v60, %v4232_v40  ;;  %v2041_v62 = vmul.f32 %v5000_v60, %v4230_v32  ;;  %v5003_v0 = vld [vmem:[#allocation63_spill] sm:$0xff] }
 0x390   : > { %v1457_v52 = vadd.f32 %v1455_v15, %v1449_v61  ;;  %v2019_v10 = vadd.f32 %v2017_v42, %v2011_v12  ;;  %v2048_v35 = vmul.f32 %v5001_v27, %v4248_v8  ;;  %v2049_v63 = vmul.f32 %v5001_v27, %v4246_v38  ;;  %v5010_v60 = vld [vmem:[#allocation59_spill] sm:$0xff] }
 0x391   : > { %v2026_v2 = vadd.f32 %v2024_v59, %v2018_v26  ;;  %v1464_v34 = vmul.f32 %v5002_v1, %v4100_v41  ;;  %v1465_v36 = vmul.f32 %v5002_v1, %v4086_v23  ;;  %v1472_v53 = vmul.f32 %v5003_v0, %v4140_v22  ;;  %v5008_v59 = vld [vmem:[#allocation70_spill] sm:$0xff] }
 0x392   : > { %v2852_v45 = vpack.c.bf16 %v1457_v52, %v1456_v6  ;;  %v2027_v16 = vadd.f32 %v2025_v37, %v2019_v10  ;;  %v1473_v15 = vmul.f32 %v5003_v0, %v4126_v13  ;;  %v1480_v50 = vmul.f32 %v5004_v48, %v4168_v11  ;;  %v5011_v52 = vld [vmem:[#allocation71_spill] sm:$0xff] }
 0x393   : > { %v2034_v5 = vadd.f32 %v2032_v20, %v2026_v2  ;;  %v1474_v55 = vadd.f32 %v1472_v53, %v1464_v34  ;;  %v1481_v18 = vmul.f32 %v5004_v48, %v4166_v39  ;;  %v1488_v49 = vmul.f32 %v5005_v56, %v4184_v33  ;;  %v5009_v20 = vld [vmem:[#allocation72_spill] sm:$0xff]  ;;  %v5012_v2 = vld [vmem:[#allocation73_spill] sm:$0xff] }
 0x394   : > { %2853 = vmatpush3.bf16.msra.mxu0 %v2852_v45  ;;  %2881 = vmatpush3.bf16.msra.mxu1 %v2852_v45  ;;  %v2035_v21 = vadd.f32 %v2033_v46, %v2027_v16  ;;  %v1475_v7 = vadd.f32 %v1473_v15, %v1465_v36  ;;  %v1489_v4 = vmul.f32 %v5005_v56, %v4182_v3  ;;  %v5013_v53 = vld [vmem:[#allocation76_spill] sm:$0xff] }
 0x395   : > { %v2042_v28 = vadd.f32 %v2040_v51, %v2034_v5  ;;  %v1482_v31 = vadd.f32 %v1480_v50, %v1474_v55  ;;  %v1496_v24 = vmul.f32 %v5006_v19, %v4200_v30  ;;  %v1497_v17 = vmul.f32 %v5006_v19, %v4198_v47  ;;  %v5014_v55 = vld [vmem:[#allocation77_spill] sm:$0xff] }
 0x396   : > { %v2043_v14 = vadd.f32 %v2041_v62, %v2035_v21  ;;  %v1483_v29 = vadd.f32 %v1481_v18, %v1475_v7  ;;  %v1504_v42 = vmul.f32 %v5007_v25, %v4216_v43  ;;  %v1505_v44 = vmul.f32 %v5007_v25, %v4214_v57  ;;  %v5015_v7 = vld [vmem:[#allocation78_spill] sm:$0xff] }
 0x397   : > { %v2050_v54 = vadd.f32 %v2048_v35, %v2042_v28  ;;  %v1490_v58 = vadd.f32 %v1488_v49, %v1482_v31  ;;  %v1512_v37 = vmul.f32 %v5008_v59, %v4232_v40  ;;  %v1513_v61 = vmul.f32 %v5008_v59, %v4230_v32  ;;  %v5018_v59 = vld [vmem:[#allocation67_spill] sm:$0xff] }
 0x398   : > { %v2051_v12 = vadd.f32 %v2049_v63, %v2043_v14  ;;  %v1491_v9 = vadd.f32 %v1489_v4, %v1483_v29  ;;  %v1520_v46 = vmul.f32 %v5009_v20, %v4248_v8  ;;  %v1521_v6 = vmul.f32 %v5009_v20, %v4246_v38 }
 0x399   : > { %v1498_v26 = vadd.f32 %v1496_v24, %v1490_v58  ;;  %v2058_v51 = vmul.f32 %v5010_v60, %v4100_v41  ;;  %v2059_v62 = vmul.f32 %v5010_v60, %v4086_v23  ;;  %v2066_v10 = vmul.f32 %v5011_v52, %v4140_v22  ;;  %v5016_v24 = vld [vmem:[#allocation80_spill] sm:$0xff] }
 0x39a   : > { %v2854_v27 = vpack.c.bf16 %v2051_v12, %v2050_v54  ;;  %v1499_v35 = vadd.f32 %v1497_v17, %v1491_v9  ;;  %v2067_v63 = vmul.f32 %v5011_v52, %v4126_v13  ;;  %v2074_v1 = vmul.f32 %v5012_v2, %v4168_v11  ;;  %v5019_v12 = vld [vmem:[#allocation79_spill] sm:$0xff] }
 0x39b   : > { %v1506_v34 = vadd.f32 %v1504_v42, %v1498_v26  ;;  %v2068_v36 = vadd.f32 %v2066_v10, %v2058_v51  ;;  %v2075_v0 = vmul.f32 %v5012_v2, %v4166_v39  ;;  %v2082_v45 = vmul.f32 %v5013_v53, %v4184_v33  ;;  %v5017_v42 = vld [vmem:[#allocation81_spill] sm:$0xff]  ;;  %v5020_v26 = vld [vmem:[#allocation82_spill] sm:$0xff]  ;;  %v5021_v10 = vld [vmem:[#allocation84_spill] sm:$0xff] }
 0x39c   : > { %2855 = vmatprep.subr.bf16.mxu0 %v2854_v27  ;;  %2874 = vmatprep.subr.bf16.mxu1 %v2854_v27  ;;  %v1507_v16 = vadd.f32 %v1505_v44, %v1499_v35  ;;  %v2069_v15 = vadd.f32 %v2067_v63, %v2059_v62  ;;  %v2083_v48 = vmul.f32 %v5013_v53, %v4182_v3 }
 0x39d   : > { %v1514_v50 = vadd.f32 %v1512_v37, %v1506_v34  ;;  %v2076_v5 = vadd.f32 %v2074_v1, %v2068_v36  ;;  %v2090_v18 = vmul.f32 %v5014_v55, %v4200_v30  ;;  %v2091_v56 = vmul.f32 %v5014_v55, %v4198_v47  ;;  %v5022_v36 = vld [vmem:[#allocation85_spill] sm:$0xff] }
 0x39e   : > { %v1515_v49 = vadd.f32 %v1513_v61, %v1507_v16  ;;  %v2077_v21 = vadd.f32 %v2075_v0, %v2069_v15  ;;  %v2098_v4 = vmul.f32 %v5015_v7, %v4216_v43  ;;  %v2099_v28 = vmul.f32 %v5015_v7, %v4214_v57  ;;  %v5023_v15 = vld [vmem:[#allocation86_spill] sm:$0xff] }
 0x39f   : > { %v1522_v31 = vadd.f32 %v1520_v46, %v1514_v50  ;;  %v2084_v19 = vadd.f32 %v2082_v45, %v2076_v5  ;;  %v2106_v17 = vmul.f32 %v5016_v24, %v4232_v40  ;;  %v2107_v14 = vmul.f32 %v5016_v24, %v4230_v32  ;;  %v5026_v24 = vld [vmem:[#allocation74_spill] sm:$0xff] }
 0x3a0   : > { %v1523_v29 = vadd.f32 %v1521_v6, %v1515_v49  ;;  %v2085_v25 = vadd.f32 %v2083_v48, %v2077_v21  ;;  %v2114_v44 = vmul.f32 %v5017_v42, %v4248_v8  ;;  %v2115_v54 = vmul.f32 %v5017_v42, %v4246_v38 }
 0x3a1   : > { %v2092_v58 = vadd.f32 %v2090_v18, %v2084_v19  ;;  %v1530_v37 = vmul.f32 %v5018_v59, %v4100_v41  ;;  %v1531_v61 = vmul.f32 %v5018_v59, %v4086_v23  ;;  %v1538_v9 = vmul.f32 %v5019_v12, %v4140_v22  ;;  %v5024_v18 = vld [vmem:[#allocation88_spill] sm:$0xff] }
 0x3a2   : > { %v2856_v20 = vpack.c.bf16 %v1523_v29, %v1522_v31  ;;  %v2093_v46 = vadd.f32 %v2091_v56, %v2085_v25  ;;  %v1539_v6 = vmul.f32 %v5019_v12, %v4126_v13  ;;  %v1546_v60 = vmul.f32 %v5020_v26, %v4168_v11  ;;  %v5027_v29 = vld [vmem:[#allocation87_spill] sm:$0xff] }
 0x3a3   : > { %v2100_v51 = vadd.f32 %v2098_v4, %v2092_v58  ;;  %v1540_v62 = vadd.f32 %v1538_v9, %v1530_v37  ;;  %v1547_v52 = vmul.f32 %v5020_v26, %v4166_v39  ;;  %v1554_v27 = vmul.f32 %v5021_v10, %v4184_v33  ;;  %v5025_v4 = vld [vmem:[#allocation89_spill] sm:$0xff]  ;;  %v5028_v58 = vld [vmem:[#allocation90_spill] sm:$0xff]  ;;  %v5029_v9 = vld [vmem:[#allocation92_spill] sm:$0xff] }
 0x3a4   : > { %2857 = vmatpush3.bf16.msra.mxu0 %v2856_v20  ;;  %2882 = vmatpush3.bf16.msra.mxu1 %v2856_v20  ;;  %v2101_v35 = vadd.f32 %v2099_v28, %v2093_v46  ;;  %v1541_v63 = vadd.f32 %v1539_v6, %v1531_v61  ;;  %v1555_v2 = vmul.f32 %v5021_v10, %v4182_v3 }
 0x3a5   : > { %v2108_v1 = vadd.f32 %v2106_v17, %v2100_v51  ;;  %v1548_v34 = vadd.f32 %v1546_v60, %v1540_v62  ;;  %v1562_v0 = vmul.f32 %v5022_v36, %v4200_v30  ;;  %v1563_v53 = vmul.f32 %v5022_v36, %v4198_v47  ;;  %v5030_v62 = vld [vmem:[#allocation93_spill] sm:$0xff] }
 0x3a6   : > { %v2109_v45 = vadd.f32 %v2107_v14, %v2101_v35  ;;  %v1549_v16 = vadd.f32 %v1547_v52, %v1541_v63  ;;  %v1570_v48 = vmul.f32 %v5023_v15, %v4216_v43  ;;  %v1571_v50 = vmul.f32 %v5023_v15, %v4214_v57  ;;  %v5031_v63 = vld [vmem:[#allocation94_spill] sm:$0xff] }
 0x3a7   : > { %v2116_v5 = vadd.f32 %v2114_v44, %v2108_v1  ;;  %v1556_v55 = vadd.f32 %v1554_v27, %v1548_v34  ;;  %v1578_v56 = vmul.f32 %v5024_v18, %v4232_v40  ;;  %v1579_v49 = vmul.f32 %v5024_v18, %v4230_v32  ;;  %v5034_v18 = vld [vmem:[#allocation83_spill] sm:$0xff] }
 0x3a8   : > { %v2117_v21 = vadd.f32 %v2115_v54, %v2109_v45  ;;  %v1557_v7 = vadd.f32 %v1555_v2, %v1549_v16  ;;  %v1586_v28 = vmul.f32 %v5025_v4, %v4248_v8  ;;  %v1587_v31 = vmul.f32 %v5025_v4, %v4246_v38 }
 0x3a9   : > { %v1564_v19 = vadd.f32 %v1562_v0, %v1556_v55  ;;  %v2124_v17 = vmul.f32 %v5026_v24, %v4100_v41  ;;  %v2125_v14 = vmul.f32 %v5026_v24, %v4086_v23  ;;  %v2132_v25 = vmul.f32 %v5027_v29, %v4140_v22  ;;  %v5032_v0 = vld [vmem:[#allocation96_spill] sm:$0xff] }
 0x3aa   : > { %v2858_v42 = vpack.c.bf16 %v2117_v21, %v2116_v5  ;;  %v1565_v44 = vadd.f32 %v1563_v53, %v1557_v7  ;;  %v2133_v54 = vmul.f32 %v5027_v29, %v4126_v13  ;;  %v2140_v59 = vmul.f32 %v5028_v58, %v4168_v11  ;;  %v5035_v21 = vld [vmem:[#allocation95_spill] sm:$0xff] }
 0x3ab   : > { %v1572_v37 = vadd.f32 %v1570_v48, %v1564_v19  ;;  %v2134_v61 = vadd.f32 %v2132_v25, %v2124_v17  ;;  %v2141_v12 = vmul.f32 %v5028_v58, %v4166_v39  ;;  %v2148_v20 = vmul.f32 %v5029_v9, %v4184_v33  ;;  %v5033_v48 = vld [vmem:[#allocation97_spill] sm:$0xff]  ;;  %v5036_v19 = vld [vmem:[#allocation98_spill] sm:$0xff]  ;;  %v5037_v25 = vld [vmem:[#allocation100_spill] sm:$0xff] }
 0x3ac   : > { %2859 = vmatprep.subr.bf16.mxu0 %v2858_v42  ;;  %2875 = vmatprep.subr.bf16.mxu1 %v2858_v42  ;;  %v1573_v46 = vadd.f32 %v1571_v50, %v1565_v44  ;;  %v2135_v6 = vadd.f32 %v2133_v54, %v2125_v14  ;;  %v2149_v26 = vmul.f32 %v5029_v9, %v4182_v3 }
 0x3ad   : > { %v1580_v60 = vadd.f32 %v1578_v56, %v1572_v37  ;;  %v2142_v51 = vadd.f32 %v2140_v59, %v2134_v61  ;;  %v2156_v52 = vmul.f32 %v5030_v62, %v4200_v30  ;;  %v2157_v10 = vmul.f32 %v5030_v62, %v4198_v47  ;;  %v5038_v61 = vld [vmem:[#allocation101_spill] sm:$0xff] }
 0x3ae   : > { %v1581_v27 = vadd.f32 %v1579_v49, %v1573_v46  ;;  %v2143_v35 = vadd.f32 %v2141_v12, %v2135_v6  ;;  %v2164_v2 = vmul.f32 %v5031_v63, %v4216_v43  ;;  %v2165_v1 = vmul.f32 %v5031_v63, %v4214_v57  ;;  %v5039_v6 = vld [vmem:[#allocation103_spill] sm:$0xff] }
 0x3af   : > { %v1588_v34 = vadd.f32 %v1586_v28, %v1580_v60  ;;  %v2150_v36 = vadd.f32 %v2148_v20, %v2142_v51  ;;  %v2172_v53 = vmul.f32 %v5032_v0, %v4232_v40  ;;  %v2173_v45 = vmul.f32 %v5032_v0, %v4230_v32  ;;  %v5042_v0 = vld [vmem:[#allocation91_spill] sm:$0xff] }
 0x3b0   : > { %v1589_v16 = vadd.f32 %v1587_v31, %v1581_v27  ;;  %v2151_v15 = vadd.f32 %v2149_v26, %v2143_v35  ;;  %v2180_v50 = vmul.f32 %v5033_v48, %v4248_v8  ;;  %v2181_v5 = vmul.f32 %v5033_v48, %v4246_v38 }
 0x3b1   : > { %v2158_v55 = vadd.f32 %v2156_v52, %v2150_v36  ;;  %v1596_v56 = vmul.f32 %v5034_v18, %v4100_v41  ;;  %v1597_v49 = vmul.f32 %v5034_v18, %v4086_v23  ;;  %v1604_v7 = vmul.f32 %v5035_v21, %v4140_v22  ;;  %v5040_v52 = vld [vmem:[#allocation104_spill] sm:$0xff] }
 0x3b2   : > { %v2860_v4 = vpack.c.bf16 %v1589_v16, %v1588_v34  ;;  %v2159_v28 = vadd.f32 %v2157_v10, %v2151_v15  ;;  %v1605_v31 = vmul.f32 %v5035_v21, %v4126_v13  ;;  %v1612_v24 = vmul.f32 %v5036_v19, %v4168_v11  ;;  %v5043_v16 = vld [vmem:[#allocation102_spill] sm:$0xff] }
 0x3b3   : > { %v2166_v17 = vadd.f32 %v2164_v2, %v2158_v55  ;;  %v1606_v14 = vadd.f32 %v1604_v7, %v1596_v56  ;;  %v1613_v29 = vmul.f32 %v5036_v19, %v4166_v39  ;;  %v1620_v42 = vmul.f32 %v5037_v25, %v4184_v33  ;;  %v5041_v2 = vld [vmem:[#allocation105_spill] sm:$0xff]  ;;  %v5044_v55 = vld [vmem:[#allocation106_spill] sm:$0xff]  ;;  %v5045_v7 = vld [vmem:[#allocation107_spill] sm:$0xff] }
 0x3b4   : > { %2861 = vmatpush3.bf16.msra.mxu0 %v2860_v4  ;;  %2883 = vmatpush3.bf16.msra.mxu1 %v2860_v4  ;;  %v2167_v44 = vadd.f32 %v2165_v1, %v2159_v28  ;;  %v1607_v54 = vadd.f32 %v1605_v31, %v1597_v49  ;;  %v1621_v58 = vmul.f32 %v5037_v25, %v4182_v3 }
 0x3b5   : > { %v2174_v59 = vadd.f32 %v2172_v53, %v2166_v17  ;;  %v1614_v37 = vadd.f32 %v1612_v24, %v1606_v14  ;;  %v1628_v12 = vmul.f32 %v5038_v61, %v4200_v30  ;;  %v1629_v9 = vmul.f32 %v5038_v61, %v4198_v47  ;;  %v5046_v14 = vld [vmem:[#allocation109_spill] sm:$0xff] }
 0x3b6   : > { %v2175_v20 = vadd.f32 %v2173_v45, %v2167_v44  ;;  %v1615_v46 = vadd.f32 %v1613_v29, %v1607_v54  ;;  %v1636_v26 = vmul.f32 %v5039_v6, %v4216_v43  ;;  %v1637_v60 = vmul.f32 %v5039_v6, %v4214_v57  ;;  %v5047_v54 = vld [vmem:[#allocation110_spill] sm:$0xff] }
 0x3b7   : > { %v2182_v51 = vadd.f32 %v2180_v50, %v2174_v59  ;;  %v1622_v62 = vadd.f32 %v1620_v42, %v1614_v37  ;;  %v1644_v10 = vmul.f32 %v5040_v52, %v4232_v40  ;;  %v1645_v27 = vmul.f32 %v5040_v52, %v4230_v32 }
 0x3b8   : > { %v2183_v35 = vadd.f32 %v2181_v5, %v2175_v20  ;;  %v1623_v63 = vadd.f32 %v1621_v58, %v1615_v46  ;;  %v1652_v1 = vmul.f32 %v5041_v2, %v4248_v8  ;;  %v1653_v34 = vmul.f32 %v5041_v2, %v4246_v38 }
 0x3b9   : > { %v1630_v36 = vadd.f32 %v1628_v12, %v1622_v62  ;;  %v2190_v53 = vmul.f32 %v5042_v0, %v4100_v41  ;;  %v2191_v45 = vmul.f32 %v5042_v0, %v4086_v23  ;;  %v2198_v15 = vmul.f32 %v5043_v16, %v4140_v22  ;;  %v5048_v12 = vld [vmem:[#allocation111_spill] sm:$0xff] }
 0x3ba   : > { %v2862_v48 = vpack.c.bf16 %v2183_v35, %v2182_v51  ;;  %v1631_v50 = vadd.f32 %v1629_v9, %v1623_v63  ;;  %v2199_v5 = vmul.f32 %v5043_v16, %v4126_v13  ;;  %v2206_v18 = vmul.f32 %v5044_v55, %v4168_v11  ;;  %v5050_v62 = vld [vmem:[#allocation99_spill] sm:$0xff]  ;;  %v5051_v35 = vld [vmem:[#allocation108_spill] sm:$0xff]  ;;  %v2994_v16 = vld [vmem:[%s3478_s12 + $0x20] sm:$0xff] }
 0x3bb   : > { %v1638_v56 = vadd.f32 %v1636_v26, %v1630_v36  ;;  %v2200_v49 = vadd.f32 %v2198_v15, %v2190_v53  ;;  %v2207_v21 = vmul.f32 %v5044_v55, %v4166_v39  ;;  %v2214_v4 = vmul.f32 %v5045_v7, %v4184_v33  ;;  %v2993_v26 = vld [vmem:[%s3478_s12 + $0x78] sm:$0xff]  ;;  %v2995_v15 = vld [vmem:[%s3478_s12 + $0x30] sm:$0xff] }
 0x3bc   : > { %2863 = vmatprep.subr.bf16.mxu0 %v2862_v48  ;;  %2876 = vmatprep.subr.bf16.mxu1 %v2862_v48  ;;  %v1639_v28 = vadd.f32 %v1637_v60, %v1631_v50  ;;  %v2201_v31 = vadd.f32 %v2199_v5, %v2191_v45  ;;  %v2215_v19 = vmul.f32 %v5045_v7, %v4182_v3  ;;  %v5049_v60 = vld [vmem:[#allocation75_spill] sm:$0xff] }
 0x3bd   : > { %v1646_v24 = vadd.f32 %v1644_v10, %v1638_v56  ;;  %v2208_v17 = vadd.f32 %v2206_v18, %v2200_v49  ;;  %v2222_v29 = vmul.f32 %v5046_v14, %v4200_v30  ;;  %v2223_v25 = vmul.f32 %v5046_v14, %v4198_v47  ;;  %v2997_v56 = vld [vmem:[%s3478_s12 + $0x50] sm:$0xff] }
 0x3be   : > { %v1647_v42 = vadd.f32 %v1645_v27, %v1639_v28  ;;  %v2209_v44 = vadd.f32 %v2207_v21, %v2201_v31  ;;  %v2230_v58 = vmul.f32 %v5047_v54, %v4216_v43  ;;  %v2231_v59 = vmul.f32 %v5047_v54, %v4214_v57 }
 0x3bf   : > { %v1654_v37 = vadd.f32 %v1652_v1, %v1646_v24  ;;  %v2216_v61 = vadd.f32 %v2214_v4, %v2208_v17  ;;  %v2238_v9 = vmul.f32 %v5048_v12, %v4232_v40  ;;  %v2239_v20 = vmul.f32 %v5048_v12, %v4230_v32 }
 0x3c0   : > { %v1655_v46 = vadd.f32 %v1653_v34, %v1647_v42  ;;  %v2217_v6 = vadd.f32 %v2215_v19, %v2209_v44  ;;  %v2245_v51 = vrot.slane %v2993_v26, %v5049_v60  ;;  %v1662_v52 = vmul.f32 %v5050_v62, %v4100_v41  ;;  %v2252_v26 = vld [vmem:[#allocation9] sm:$0xff] }
 0x3c1   : > { %v2224_v10 = vadd.f32 %v2222_v29, %v2216_v61  ;;  %v1663_v27 = vmul.f32 %v5050_v62, %v4086_v23  ;;  %v1670_v63 = vmul.f32 %v5051_v35, %v4140_v22  ;;  %v1671_v2 = vmul.f32 %v5051_v35, %v4126_v13  ;;  %v2996_v13 = vld [vmem:[%s3478_s12 + $0x40] sm:$0xff] }
 0x3c2   : > { %v2864_v1 = vpack.c.bf16 %v1655_v46, %v1654_v37  ;;  %v2225_v34 = vadd.f32 %v2223_v25, %v2217_v6  ;;  %v2246_v36 = vmul.f32 %v2245_v51, %v4248_v8  ;;  %v2247_v0 = vmul.f32 %v2245_v51, %v4246_v38  ;;  %v2259_v51 = vld [vmem:[#allocation9 + $0x38] sm:$0xff] }
 0x3c3   : > { %v2232_v41 = vadd.f32 %v2230_v58, %v2224_v10  ;;  %v1672_v53 = vadd.f32 %v1670_v63, %v1662_v52  ;;  %v1673_v45 = vadd.f32 %v1671_v2, %v1663_v27  ;;  %v1677_v23 = vrot.slane %v2994_v16, %v5049_v60  ;;  %v2299_v27 = vpop.permute.xlu0 %2298  ;;  %v2304_v2 = vpop.permute.xlu1 %2303 }
 0x3c4   : > { %2865 = vmatpush3.bf16.msra.mxu0 %v2864_v1  ;;  %2884 = vmatpush3.bf16.msra.mxu1 %v2864_v1  ;;  %v2233_v22 = vadd.f32 %v2231_v59, %v2225_v34  ;;  %v1685_v48 = vrot.slane %v2995_v15, %v5049_v60  ;;  %v1693_v50 = vrot.slane %v2996_v13, %v5049_v60 }
 0x3c5   : > { %v2240_v5 = vadd.f32 %v2238_v9, %v2232_v41  ;;  %v1678_v55 = vmul.f32 %v1677_v23, %v4168_v11  ;;  %v1679_v18 = vmul.f32 %v1677_v23, %v4166_v39  ;;  %v1701_v49 = vrot.slane %v2997_v56, %v5049_v60  ;;  %v2998_v39 = vld [vmem:[%s3478_s12 + $0x60] sm:$0xff] }
 0x3c6   : > { %v2241_v21 = vadd.f32 %v2239_v20, %v2233_v22  ;;  %v1686_v7 = vmul.f32 %v1685_v48, %v4184_v33  ;;  %v1687_v4 = vmul.f32 %v1685_v48, %v4182_v3  ;;  %v1694_v28 = vmul.f32 %v1693_v50, %v4200_v30  ;;  %v2999_v33 = vld [vmem:[%s3478_s12 + $0x70] sm:$0xff]  ;;  %s5052_s12 = sld [smem:[#allocation16_spill]] }
 0x3c7   : > { %v2248_v31 = vadd.f32 %v2246_v36, %v2240_v5  ;;  %v1680_v19 = vadd.f32 %v1678_v55, %v1672_v53  ;;  %v1681_v24 = vadd.f32 %v1679_v18, %v1673_v45  ;;  %v1695_v17 = vmul.f32 %v1693_v50, %v4198_v47  ;;  %v2309_v16 = vpop.permute.xlu0 %2308  ;;  %v2314_v5 = vpop.permute.xlu1 %2313 }
 0x3c8   : > { %v2249_v14 = vadd.f32 %v2247_v0, %v2241_v21  ;;  %v1702_v11 = vmul.f32 %v1701_v49, %v4216_v43  ;;  %v1709_v29 = vrot.slane %v2998_v39, %v5049_v60  ;;  %v1703_v44 = vmul.f32 %v1701_v49, %v4214_v57 }
 0x3c9   : > { %v1688_v25 = vadd.f32 %v1686_v7, %v1680_v19  ;;  %v1689_v42 = vadd.f32 %v1687_v4, %v1681_v24  ;;  %v1717_v3 = vrot.slane %v2999_v33, %v5049_v60  ;;  %v2254_v60 = vld [vmem:[#allocation9 + $0x10] sm:$0xff] }
 0x3ca   : > { %v2866_v54 = vpack.c.bf16 %v2249_v14, %v2248_v31  ;;  %v1710_v59 = vmul.f32 %v1709_v29, %v4232_v40  ;;  %v1711_v47 = vmul.f32 %v1709_v29, %v4230_v32  ;;  %v2257_v40 = vld [vmem:[#allocation9 + $0x28] sm:$0xff]  ;;  %v2256_v32 = vld [vmem:[#allocation9 + $0x20] sm:$0xff] }
 0x3cb   : > { %v1696_v30 = vadd.f32 %v1694_v28, %v1688_v25  ;;  %v1697_v58 = vadd.f32 %v1695_v17, %v1689_v42  ;;  %v1718_v61 = vmul.f32 %v1717_v3, %v4248_v8  ;;  %v1719_v12 = vmul.f32 %v1717_v3, %v4246_v38  ;;  %v2258_v8 = vld [vmem:[#allocation9 + $0x30] sm:$0xff] }
 0x3cc   : > { %2867 = vmatprep.subr.bf16.mxu0 %v2866_v54  ;;  %2877 = vmatprep.subr.bf16.mxu1 %v2866_v54  ;;  %s2610_s24 = sshll.u32 %s5052_s12, 3  ;;  %s3090_s12 = scalar_lea.vmem %s3089_s17, 1024 }
 0x3cd   : > { %v1704_v43 = vadd.f32 %v1702_v11, %v1696_v30  ;;  %v1705_v37 = vadd.f32 %v1703_v44, %v1697_v58  ;;  %s2429_s26 = sadd.s32 %s5053_s25, %s2610_s24  ;;  %p3092_p0 = scmp.lt.s32.totalorder %s3090_s12, %s3084_s5 }
 0x3ce   : > { %s2611_s18 = sshll.u32 %s2429_s26, 7 }
 0x3cf   : > { %v1712_v9 = vadd.f32 %v1710_v59, %v1704_v43  ;;  %v1713_v57 = vadd.f32 %v1711_v47, %v1705_v37  ;;  %s4681_s23 = scalar_lea.hbm %s5055_s9, %s2611_s18  ;;  %p3093_p1 = por %p3092_p0, %p3091_p12 }
 0x3d1   : > { %v1720_v20 = vadd.f32 %v1718_v61, %v1712_v9  ;;  %v1721_v46 = vadd.f32 %v1719_v12, %v1713_v57  ;;  %p3094_p13 = pnand %p3093_p1, %p3087_p11 }
 0x3d3   : > { %v2868_v6 = vpack.c.bf16 %v1721_v46, %v1720_v20 }
 0x3d5   : > { %2869 = vmatpush3.bf16.msra.mxu0 %v2868_v6  ;;  %2885 = vmatpush3.bf16.msra.mxu1 %v2868_v6 }
 0x3d8   : > { %2381 = vmatmul.mubr.f32.vlgmr.msra.gmra.mrb[24].mxu0 %v2252_v26  ;;  %2386 = vmatmul.mubr.f32.vlgmr.msra.gmra.mrb[8].mxu1 %v2254_v60 }
 0x3d9   : > { %2390 = vmatprep.mubr.f32.mxu1 %v2257_v40 }
 0x3dc   : > { %2391 = vmatmul.mubr.f32.gmra.mrb[10].mxu1 %v2256_v32 }
 0x3dd   : > { %2395 = vmatprep.mubr.f32.mxu1 %v2259_v51 }
 0x3e0   : > { %2396 = vmatmul.mubr.f32.gmra.mrb[12].mxu1 %v2258_v8 }
 0x4ab   : > { %v2698_v38 = vpop.f32.mrb[24].mxu0  ;;  %v2701_v62 = vpop.f32.mrb[8].mxu1 }
 0x4ac   : > { %v2699_v52 = vpop.f32.mrb[25].mxu0  ;;  %v2702_v10 = vpop.f32.mrb[9].mxu1 }
 0x4ad   : > { %v2700_v35 = vadd.f32 %v2699_v52, %v2698_v38  ;;  %v2703_v63 = vadd.f32 %v2702_v10, %v2701_v62 }
 0x4af   : > { %v2383_v1 = vadd.f32 %v2700_v35, %v2299_v27  ;;  %v2388_v34 = vadd.f32 %v2703_v63, %v2304_v2  ;;  %v2704_v36 = vpop.f32.mrb[10].mxu1 }
 0x4b0   : > { %v2705_v0 = vpop.f32.mrb[11].mxu1 }
 0x4b1   : > { %vm2401_vm2 = vcmp.gt.f32.partialorder %v2383_v1, 0.0  ;;  %v2405_v41 = vmul.f32 0.1, %v2383_v1  ;;  %vm2402_vm3 = vcmp.gt.f32.partialorder %v2388_v34, 0.0  ;;  %v2406_v53 = vmul.f32 0.1, %v2388_v34 }
 0x4b2   : > { %v2706_v45 = vadd.f32 %v2705_v0, %v2704_v36 }
 0x4b3   : > { %v2409_v23 = vsel %vm2401_vm2, %v2383_v1, %v2405_v41  ;;  %v2410_v22 = vsel %vm2402_vm3, %v2388_v34, %v2406_v53  ;;  %v2707_v15 = vpop.f32.mrb[12].mxu1 }
 0x4b4   : > { %2413 = vst [vmem:[%s514_s20] sm:$0xff] %v2409_v23  ;;  %2414 = vst [vmem:[%s514_s20 + $0x8] sm:$0xff] %v2410_v22  ;;  %v2393_v48 = vadd.f32 %v2706_v45, %v2309_v16  ;;  %v2708_v13 = vpop.f32.mrb[13].mxu1 }
 0x4b5   : > { %v2709_v50 = vadd.f32 %v2708_v13, %v2707_v15 }
 0x4b6   : > { %vm2403_vm4 = vcmp.gt.f32.partialorder %v2393_v48, 0.0  ;;  %v2407_v55 = vmul.f32 0.1, %v2393_v48 }
 0x4b7   : > { %v2398_v18 = vadd.f32 %v2709_v50, %v2314_v5 }
 0x4b8   : > { %v2411_v56 = vsel %vm2403_vm4, %v2393_v48, %v2407_v55 }
 0x4b9   : > { %2415 = vst [vmem:[%s514_s20 + $0x10] sm:$0xff] %v2411_v56  ;;  %vm2404_vm5 = vcmp.gt.f32.partialorder %v2398_v18, 0.0  ;;  %v2408_v49 = vmul.f32 0.1, %v2398_v18 }
 0x4bb   : > { %v2412_v21 = vsel %vm2404_vm5, %v2398_v18, %v2408_v49 }
 0x4bc   : > { %2416 = vst [vmem:[%s514_s20 + $0x18] sm:$0xff] %v2412_v21 }
 0x4bd   : > { %3097 = shalt.err (!%p3094_p13)
}
 0x4be   : > { %s3098_s25 = scalar_lea.hbm %s4681_s23, 512  ;;  %s3102_s26 = scalar_lea.hbm %s5055_s9, 2048 }
 0x4bf   : > { %p3099_p4 = scmp.ne.s32.totalorder %s4681_s23, %s3098_s25  ;;  %p3103_p7 = scmp.lt.u32.totalorder %s4681_s23, %s5055_s9 }
 0x4c0   : > { %p3104_p6 = scmp.lt.u32.totalorder %s3102_s26, %s3098_s25  ;;  %p3106_p2 = scmp.lt.u32.totalorder %s3098_s25, %s4681_s23 }
 0x4c1   : > { %p3100_p3 = pnand %p3099_p4, %p5056_p5 }
 0x4c2   : > { %p3105_p9 = por %p3104_p6, %p3103_p7 }
 0x4c3   : > { %p3101_p8 = pneg %p3100_p3 }
 0x4c4   : > { %p3107_p10 = por %p3106_p2, %p3105_p9 }
 0x4c6   : > { %p3108_p11 = pnand %p3107_p10, %p3101_p8 }
 0x4c8   : > { %3111 = shalt.err (!%p3108_p11)
}
 0x4c9   : > { %s3200_s22 = smov 128   ;;  %s3201_s5 = smov 256  }
 0x4ca   : > { %s3202_s13 = smov 8  }
 0x4cb   : > { %2896 = dma.vmem_to_hbm [thread:$0]  (%p5056_p5), %s4676_s29, 512, %s4681_s23, %s2418_s21, %s3200_s22, %s3201_s5, %s3202_s13  }
 0x4cc PF: > { %s5057_s17 = sld [smem:[#allocation14_spill]]  ;;  %s5058_s12 = sld [smem:[#allocation20_spill]] }
 0x4cd   : > { %p2913_p12 = scmp.ge.s32.totalorder %s3186_s16, 2 }
 0x4d2   : > { %s2447_s24 = sand.u32 1, %s5057_s17   ;;  %p5059_p0 = scmp.ne.s32.totalorder %s5058_s12, 0 }
 0x4d3   : > { %s2448_s25 = scalar_lea.sflag [#allocation5], %s2447_s24 }
 0x4d4   : > { %p2906_p1 = pnand %p2913_p12, %p5059_p0 }
 0x4d6   : > { %3153 = dma.done.wait (!%p2906_p1), %s2448_s25, 512  }
 0x4d7   : > { %3155 = vsyncadd (!%p2906_p1), %s2448_s25, 4294966784  ;;  %s26_s16 = sadd.s32 1, %s3186_s16   ;;  %s5060_s20 = sld [smem:[#allocation21_spill]] }
 0x4d8   : > { %p23_p13 = scmp.ge.s32.totalorder %s26_s16, 6   ;;  %s5061_s27 = sld [smem:[#allocation17_spill]] }
 0x4d9   : > { %s5062_s29 = sld [smem:[#allocation18_spill]]  ;;  %s5063_s30 = smov %s3162_s10 }
 0x4da   : > { %s5064_s10 = smov %s3166_s11  ;;  %s5066_s12 = smov %s3178_s14 }
 0x4db   : > { %s5067_s13 = smov %s3182_s15  ;;  %25 = sbr.rel (!%p23_p13) target bundleno = 11 (0xb), region = 155 }
 0x4dd   : > { %s5065_s11 = smov %s5060_s20 }
 0x4de   : > { %s5068_s14 = smov %s5061_s27 }
 0x4df   : > { %s5069_s15 = smov %s5062_s29 }
 0x4e2   :  { %2453 = vsyncpa [#allocation4], 1 }
 0x4e3   :  { %2455 = vsyncpa [#allocation4 + $0x1], 1 }
 0x4e4   :  { %2456 = vsyncpa [#allocation8], 1 }
 0x4e5   :  { %2457 = vsyncpa [#allocation5], 1 }
 0x4e6   :  { %2459 = vsyncpa [#allocation5 + $0x1], 1 }

</bundles_post_ra>
